<compile_context>
chip_gen: v7x
topology: tpu7x:2x2x1
jax: 0.10.0
libtpu: 0.0.40
codegen_flags: <defaults>
</compile_context>

<pallas_src>
import functools

import jax
import jax.numpy as jnp
from jax import lax
from jax.experimental import pallas as pl
from jax.experimental.pallas import tpu as pltpu


def basic_block_kernel(x_ref, w1_ref, w2_ref,
                       g1_ref, b1_ref, t1_ref,
                       g2_ref, b2_ref, t2_ref,
                       out_ref,
                       xpad_ref, col_ref,
                       *, H, W, C, eps1, eps2):
    """Fused conv3x3+FRN+ReLU -> conv3x3+FRN+residual+ReLU for one batch element.

    x_ref   : (1, H, W, C)        input activation (C lane-padded, mult of 128)
    w*_ref  : (9*C, C)            im2col-reshaped conv weights
    g/b/t   : (1, C)              FRN affine / threshold params
    out_ref : (1, H, W, C)
    xpad_ref: VMEM (H+2, W+2, C)  zero-haloed activation scratch (both convs)
    col_ref : VMEM (H*W, 9*C)     im2col scratch
    """

    def conv3x3_frn(w_ref, g_ref, b_ref, t_ref, eps):
        # im2col: 9 shifted views of the padded scratch -> (H*W, 9*C).
        # Lane offsets k*C are multiples of 128 -> unmasked lane-dense stores.
        for dh in range(3):
            for dw in range(3):
                k = dh * 3 + dw
                col_ref[:, k * C:(k + 1) * C] = (
                    xpad_ref[dh:dh + H, dw:dw + W, :].reshape(H * W, C))
        # single MXU matmul with K = 9*C
        acc = jnp.dot(col_ref[...], w_ref[...],
                      preferred_element_type=jnp.float32)        # (H*W, C)
        # FilterResponseNormalization (per-channel mean over spatial dims).
        # gamma is folded into the rsqrt scale: one (1,C) mul instead of a
        # full (H*W,C) mul on the VALU.
        nu2 = jnp.mean(acc * acc, axis=0, keepdims=True)         # (1, C)
        scale = g_ref[...] * lax.rsqrt(nu2 + eps)                # (1, C)
        return jnp.maximum(acc * scale + b_ref[...], t_ref[...])

    # --- zero the 1-element halo only (interior is overwritten below) ---
    # Re-zeroed every grid step: under "parallel" megacore sharding a core may
    # never execute program_id == 0, so a one-time init would be unsafe.
    zrow = jnp.zeros((1, W + 2, C), jnp.float32)
    zcol = jnp.zeros((H, 1, C), jnp.float32)
    xpad_ref[0:1, :, :] = zrow
    xpad_ref[H + 1:H + 2, :, :] = zrow
    xpad_ref[1:H + 1, 0:1, :] = zcol
    xpad_ref[1:H + 1, W + 1:W + 2, :] = zcol

    # --- stage 1: relu(FRN1(conv1(x))) ---
    x = x_ref[0]                                   # (H, W, C), loaded once
    xpad_ref[1:H + 1, 1:W + 1, :] = x
    y1 = jnp.maximum(conv3x3_frn(w1_ref, g1_ref, b1_ref, t1_ref, eps1), 0.0)

    # Stage-1 output stays resident in VMEM: overwrite the interior of the
    # padded scratch (zero halo still valid) -- no HBM round-trip.
    xpad_ref[1:H + 1, 1:W + 1, :] = y1.reshape(H, W, C)

    # --- stage 2: relu(FRN2(conv2(y1)) + x) ---
    y2 = conv3x3_frn(w2_ref, g2_ref, b2_ref, t2_ref, eps2)
    y2 = jnp.maximum(y2 + x.reshape(H * W, C), 0.0)      # residual + ReLU
    out_ref[...] = y2.reshape(1, H, W, C)


def _round_up(x, m):
    return ((x + m - 1) // m) * m


def basic_block_forward(x_nchw, params):
    """BasicBlock forward (stride=1, downsample=None). Input/output are NCHW."""
    N, C, H, W = x_nchw.shape
    assert params["w1"].shape[-1] == C, "residual path requires in_planes == planes"
    Cp = _round_up(max(C, 128), 128)                 # lane-dense channel dim
    pc = Cp - C

    # glue: NCHW -> NHWC, zero-pad channels to Cp.  Padded lanes stay exactly 0
    # through conv / FRN / ReLU because their weights, gamma, beta, tau are 0.
    x = jnp.transpose(x_nchw, (0, 2, 3, 1)).astype(jnp.float32)
    x = jnp.pad(x, ((0, 0), (0, 0), (0, 0), (0, pc)))

    def prep_w(w_hwio):                              # (3,3,Cin,Cout) -> (9*Cp, Cp)
        w = jnp.pad(w_hwio.astype(jnp.float32),
                    ((0, 0), (0, 0), (0, pc), (0, pc)))
        return w.reshape(9 * Cp, Cp)

    def prep_v(v):                                   # (1, C) -> (1, Cp)
        return jnp.pad(v.astype(jnp.float32), ((0, 0), (0, pc)))

    w1, w2 = prep_w(params["w1"]), prep_w(params["w2"])
    g1, b1, t1 = prep_v(params["g1"]), prep_v(params["b1"]), prep_v(params["t1"])
    g2, b2, t2 = prep_v(params["g2"]), prep_v(params["b2"]), prep_v(params["t2"])

    # FRN eps is not learnable here -> bake |eps| as a compile-time scalar
    # (keeps it off the vector-load path entirely).
    eps1 = abs(float(params["eps1"].reshape(())))
    eps2 = abs(float(params["eps2"].reshape(())))

    kernel = functools.partial(basic_block_kernel, H=H, W=W, C=Cp,
                               eps1=eps1, eps2=eps2)

    def vec_spec():
        return pl.BlockSpec((1, Cp), lambda n: (0, 0))

    out = pl.pallas_call(
        kernel,
        out_shape=jax.ShapeDtypeStruct((N, H, W, Cp), jnp.float32),
        grid_spec=pltpu.PrefetchScalarGridSpec(
            num_scalar_prefetch=0,
            grid=(N,),
            in_specs=[
                pl.BlockSpec((1, H, W, Cp), lambda n: (n, 0, 0, 0)),   # x
                pl.BlockSpec((9 * Cp, Cp), lambda n: (0, 0)),          # w1
                pl.BlockSpec((9 * Cp, Cp), lambda n: (0, 0)),          # w2
                vec_spec(), vec_spec(), vec_spec(),                    # g1 b1 t1
                vec_spec(), vec_spec(), vec_spec(),                    # g2 b2 t2
            ],
            out_specs=pl.BlockSpec((1, H, W, Cp), lambda n: (n, 0, 0, 0)),
            scratch_shapes=[
                pltpu.VMEM((H + 2, W + 2, Cp), jnp.float32),   # padded activations
                pltpu.VMEM((H * W, 9 * Cp), jnp.float32),      # im2col matrix
            ],
        ),
        # batch elements are independent -> let v7x shard the grid over both TCs
        compiler_params=pltpu.CompilerParams(
            dimension_semantics=("parallel",)),
    )(x, w1, w2, g1, b1, t1, g2, b2, t2)

    # drop channel padding, NHWC -> NCHW
    return jnp.transpose(out[..., :C], (0, 3, 1, 2))


# ---------------------- pure-JAX reference (for checking) ----------------------
def _frn_ref(x_nhwc, gamma, beta, tau, eps):
    nu2 = jnp.mean(x_nhwc ** 2, axis=(1, 2), keepdims=True)
    x = x_nhwc * lax.rsqrt(nu2 + jnp.abs(eps))
    g = gamma.reshape(1, 1, 1, -1)
    b = beta.reshape(1, 1, 1, -1)
    t = tau.reshape(1, 1, 1, -1)
    return jnp.maximum(g * x + b, t)


def basic_block_ref(x_nchw, params):
    x = jnp.transpose(x_nchw, (0, 2, 3, 1)).astype(jnp.float32)
    dn = ("NHWC", "HWIO", "NHWC")
    out = lax.conv_general_dilated(x, params["w1"], (1, 1), "SAME",
                                   dimension_numbers=dn)
    out = _frn_ref(out, params["g1"], params["b1"], params["t1"],
                   params["eps1"][0, 0])
    out = jnp.maximum(out, 0.0)
    out = lax.conv_general_dilated(out, params["w2"], (1, 1), "SAME",
                                   dimension_numbers=dn)
    out = _frn_ref(out, params["g2"], params["b2"], params["t2"],
                   params["eps2"][0, 0])
    out = out + x
    out = jnp.maximum(out, 0.0)
    return jnp.transpose(out, (0, 3, 1, 2))


# ------------------------------- parameters -------------------------------
def init_params(key, in_planes, planes):
    k1, k2 = jax.random.split(key)
    # torch conv weights are OIHW; build them there and convert to HWIO.
    w1_oihw = 0.1 * jax.random.normal(k1, (planes, in_planes, 3, 3), jnp.float32)
    w2_oihw = 0.1 * jax.random.normal(k2, (planes, planes, 3, 3), jnp.float32)
    w1 = jnp.transpose(w1_oihw, (2, 3, 1, 0))   # HWIO
    w2 = jnp.transpose(w2_oihw, (2, 3, 1, 0))   # HWIO
    # FRN reset_parameters(): gamma=1, beta=0, tau=0, eps=1e-6 (not learnable)
    frn = lambda c: (jnp.ones((1, c), jnp.float32),
                     jnp.zeros((1, c), jnp.float32),
                     jnp.zeros((1, c), jnp.float32),
                     jnp.full((1, 1), 1e-6, jnp.float32))
    g1, b1, t1, e1 = frn(planes)
    g2, b2, t2, e2 = frn(planes)
    return dict(w1=w1, w2=w2,
                g1=g1, b1=b1, t1=t1, eps1=e1,
                g2=g2, b2=b2, t2=t2, eps2=e2)


if __name__ == "__main__":
    # small shapes consistent with BasicBlock(in_planes=4, planes=4, stride=1)
    N, C, H, W = 2, 4, 16, 16
    key = jax.random.PRNGKey(0)
    kx, kp = jax.random.split(key)
    x_nchw = jax.random.normal(kx, (N, C, H, W), jnp.float32)
    params = init_params(kp, in_planes=C, planes=C)

    out = jax.block_until_ready(basic_block_forward(x_nchw, params))
    ref = jax.block_until_ready(basic_block_ref(x_nchw, params))

    assert out.shape == (N, C, H, W)
    err = float(jnp.max(jnp.abs(out - ref)))
    assert jnp.allclose(out, ref, rtol=1e-4, atol=1e-5), f"max abs err = {err}"
    print("KERNEL_OK")
</pallas_src>

<mosaic_0001>
module attributes {stable_mosaic.version = 11 : i64} {
  func.func @basic_block_kernel(%arg0: i32, %arg1: memref<1x16x16x128xf32, #tpu.memory_space<vmem>>, %arg2: memref<1152x128xf32, #tpu.memory_space<vmem>>, %arg3: memref<1152x128xf32, #tpu.memory_space<vmem>>, %arg4: memref<1x128xf32, #tpu.memory_space<vmem>>, %arg5: memref<1x128xf32, #tpu.memory_space<vmem>>, %arg6: memref<1x128xf32, #tpu.memory_space<vmem>>, %arg7: memref<1x128xf32, #tpu.memory_space<vmem>>, %arg8: memref<1x128xf32, #tpu.memory_space<vmem>>, %arg9: memref<1x128xf32, #tpu.memory_space<vmem>>, %arg10: memref<1x16x16x128xf32, #tpu.memory_space<vmem>>, %arg11: memref<18x18x128xf32, #tpu.memory_space<vmem>>, %arg12: memref<256x1152xf32, #tpu.memory_space<vmem>>) attributes {dimension_semantics = [#tpu.dimension_semantics<parallel>], iteration_bounds = array<i64: 2>, scalar_prefetch = 0 : i64, scratch_operands = 2 : i64, tpu.core_type = #tpu.core_type<tc>, window_params = [{transform_indices = @transform_0, window_bounds = array<i64: 1, 16, 16, 128>}, {pipeline_mode = #tpu.pipeline_mode<synchronous>, transform_indices = @transform_1, window_bounds = array<i64: 1152, 128>}, {pipeline_mode = #tpu.pipeline_mode<synchronous>, transform_indices = @transform_2, window_bounds = array<i64: 1152, 128>}, {pipeline_mode = #tpu.pipeline_mode<synchronous>, transform_indices = @transform_3, window_bounds = array<i64: 1, 128>}, {pipeline_mode = #tpu.pipeline_mode<synchronous>, transform_indices = @transform_4, window_bounds = array<i64: 1, 128>}, {pipeline_mode = #tpu.pipeline_mode<synchronous>, transform_indices = @transform_5, window_bounds = array<i64: 1, 128>}, {pipeline_mode = #tpu.pipeline_mode<synchronous>, transform_indices = @transform_6, window_bounds = array<i64: 1, 128>}, {pipeline_mode = #tpu.pipeline_mode<synchronous>, transform_indices = @transform_7, window_bounds = array<i64: 1, 128>}, {pipeline_mode = #tpu.pipeline_mode<synchronous>, transform_indices = @transform_8, window_bounds = array<i64: 1, 128>}, {transform_indices = @transform_9, window_bounds = array<i64: 1, 16, 16, 128>}]} {
    %cst = arith.constant 0.000000e+00 : f32
    %0 = vector.broadcast %cst : f32 to vector<1x18x128xf32>
    %cst_0 = arith.constant 0.000000e+00 : f32
    %1 = vector.broadcast %cst_0 : f32 to vector<16x1x128xf32>
    %c0 = arith.constant 0 : index
    %c0_1 = arith.constant 0 : index
    %c0_2 = arith.constant 0 : index
    %2 = vector.load %arg11[%c0, %c0_1, %c0_2] : memref<18x18x128xf32, #tpu.memory_space<vmem>>, vector<1x18x128xf32>
    tpu.vector_store %arg11[%c0, %c0_1, %c0_2], %0 {strides = array<i32>} : memref<18x18x128xf32, #tpu.memory_space<vmem>>, vector<1x18x128xf32>,
    %c17 = arith.constant 17 : index
    %c0_3 = arith.constant 0 : index
    %c0_4 = arith.constant 0 : index
    %3 = vector.load %arg11[%c17, %c0_3, %c0_4] : memref<18x18x128xf32, #tpu.memory_space<vmem>>, vector<1x18x128xf32>
    tpu.vector_store %arg11[%c17, %c0_3, %c0_4], %0 {strides = array<i32>} : memref<18x18x128xf32, #tpu.memory_space<vmem>>, vector<1x18x128xf32>,
    %c1 = arith.constant 1 : index
    %c0_5 = arith.constant 0 : index
    %c0_6 = arith.constant 0 : index
    %4 = vector.load %arg11[%c1, %c0_5, %c0_6] : memref<18x18x128xf32, #tpu.memory_space<vmem>>, vector<16x1x128xf32>
    tpu.vector_store %arg11[%c1, %c0_5, %c0_6], %1 {strides = array<i32>} : memref<18x18x128xf32, #tpu.memory_space<vmem>>, vector<16x1x128xf32>,
    %c1_7 = arith.constant 1 : index
    %c17_8 = arith.constant 17 : index
    %c0_9 = arith.constant 0 : index
    %5 = vector.load %arg11[%c1_7, %c17_8, %c0_9] : memref<18x18x128xf32, #tpu.memory_space<vmem>>, vector<16x1x128xf32>
    tpu.vector_store %arg11[%c1_7, %c17_8, %c0_9], %1 {strides = array<i32>} : memref<18x18x128xf32, #tpu.memory_space<vmem>>, vector<16x1x128xf32>,
    %c0_10 = arith.constant 0 : index
    %c0_11 = arith.constant 0 : index
    %c0_12 = arith.constant 0 : index
    %c0_13 = arith.constant 0 : index
    %6 = vector.load %arg1[%c0_10, %c0_11, %c0_12, %c0_13] : memref<1x16x16x128xf32, #tpu.memory_space<vmem>>, vector<1x16x16x128xf32>
    %7 = vector.shape_cast %6 : vector<1x16x16x128xf32> to vector<16x16x128xf32>
    %c1_14 = arith.constant 1 : index
    %c1_15 = arith.constant 1 : index
    %c0_16 = arith.constant 0 : index
    %8 = vector.load %arg11[%c1_14, %c1_15, %c0_16] : memref<18x18x128xf32, #tpu.memory_space<vmem>>, vector<16x16x128xf32>
    tpu.vector_store %arg11[%c1_14, %c1_15, %c0_16], %7 {strides = array<i32>} : memref<18x18x128xf32, #tpu.memory_space<vmem>>, vector<16x16x128xf32>,
    %c0_17 = arith.constant 0 : index
    %c0_18 = arith.constant 0 : index
    %c0_19 = arith.constant 0 : index
    %9 = vector.load %arg11[%c0_17, %c0_18, %c0_19] : memref<18x18x128xf32, #tpu.memory_space<vmem>>, vector<16x16x128xf32>
    %10 = vector.shape_cast %9 : vector<16x16x128xf32> to vector<256x128xf32>
    %c0_20 = arith.constant 0 : index
    %c0_21 = arith.constant 0 : index
    %11 = vector.load %arg12[%c0_20, %c0_21] : memref<256x1152xf32, #tpu.memory_space<vmem>>, vector<256x128xf32>
    tpu.vector_store %arg12[%c0_20, %c0_21], %10 {strides = array<i32>} : memref<256x1152xf32, #tpu.memory_space<vmem>>, vector<256x128xf32>,
    %c0_22 = arith.constant 0 : index
    %c1_23 = arith.constant 1 : index
    %c0_24 = arith.constant 0 : index
    %12 = vector.load %arg11[%c0_22, %c1_23, %c0_24] : memref<18x18x128xf32, #tpu.memory_space<vmem>>, vector<16x16x128xf32>
    %13 = vector.shape_cast %12 : vector<16x16x128xf32> to vector<256x128xf32>
    %c0_25 = arith.constant 0 : index
    %c128 = arith.constant 128 : index
    %14 = vector.load %arg12[%c0_25, %c128] : memref<256x1152xf32, #tpu.memory_space<vmem>>, vector<256x128xf32>
    tpu.vector_store %arg12[%c0_25, %c128], %13 {strides = array<i32>} : memref<256x1152xf32, #tpu.memory_space<vmem>>, vector<256x128xf32>,
    %c0_26 = arith.constant 0 : index
    %c2 = arith.constant 2 : index
    %c0_27 = arith.constant 0 : index
    %15 = vector.load %arg11[%c0_26, %c2, %c0_27] : memref<18x18x128xf32, #tpu.memory_space<vmem>>, vector<16x16x128xf32>
    %16 = vector.shape_cast %15 : vector<16x16x128xf32> to vector<256x128xf32>
    %c0_28 = arith.constant 0 : index
    %c256 = arith.constant 256 : index
    %17 = vector.load %arg12[%c0_28, %c256] : memref<256x1152xf32, #tpu.memory_space<vmem>>, vector<256x128xf32>
    tpu.vector_store %arg12[%c0_28, %c256], %16 {strides = array<i32>} : memref<256x1152xf32, #tpu.memory_space<vmem>>, vector<256x128xf32>,
    %c1_29 = arith.constant 1 : index
    %c0_30 = arith.constant 0 : index
    %c0_31 = arith.constant 0 : index
    %18 = vector.load %arg11[%c1_29, %c0_30, %c0_31] : memref<18x18x128xf32, #tpu.memory_space<vmem>>, vector<16x16x128xf32>
    %19 = vector.shape_cast %18 : vector<16x16x128xf32> to vector<256x128xf32>
    %c0_32 = arith.constant 0 : index
    %c384 = arith.constant 384 : index
    %20 = vector.load %arg12[%c0_32, %c384] : memref<256x1152xf32, #tpu.memory_space<vmem>>, vector<256x128xf32>
    tpu.vector_store %arg12[%c0_32, %c384], %19 {strides = array<i32>} : memref<256x1152xf32, #tpu.memory_space<vmem>>, vector<256x128xf32>,
    %c1_33 = arith.constant 1 : index
    %c1_34 = arith.constant 1 : index
    %c0_35 = arith.constant 0 : index
    %21 = vector.load %arg11[%c1_33, %c1_34, %c0_35] : memref<18x18x128xf32, #tpu.memory_space<vmem>>, vector<16x16x128xf32>
    %22 = vector.shape_cast %21 : vector<16x16x128xf32> to vector<256x128xf32>
    %c0_36 = arith.constant 0 : index
    %c512 = arith.constant 512 : index
    %23 = vector.load %arg12[%c0_36, %c512] : memref<256x1152xf32, #tpu.memory_space<vmem>>, vector<256x128xf32>
    tpu.vector_store %arg12[%c0_36, %c512], %22 {strides = array<i32>} : memref<256x1152xf32, #tpu.memory_space<vmem>>, vector<256x128xf32>,
    %c1_37 = arith.constant 1 : index
    %c2_38 = arith.constant 2 : index
    %c0_39 = arith.constant 0 : index
    %24 = vector.load %arg11[%c1_37, %c2_38, %c0_39] : memref<18x18x128xf32, #tpu.memory_space<vmem>>, vector<16x16x128xf32>
    %25 = vector.shape_cast %24 : vector<16x16x128xf32> to vector<256x128xf32>
    %c0_40 = arith.constant 0 : index
    %c640 = arith.constant 640 : index
    %26 = vector.load %arg12[%c0_40, %c640] : memref<256x1152xf32, #tpu.memory_space<vmem>>, vector<256x128xf32>
    tpu.vector_store %arg12[%c0_40, %c640], %25 {strides = array<i32>} : memref<256x1152xf32, #tpu.memory_space<vmem>>, vector<256x128xf32>,
    %c2_41 = arith.constant 2 : index
    %c0_42 = arith.constant 0 : index
    %c0_43 = arith.constant 0 : index
    %27 = vector.load %arg11[%c2_41, %c0_42, %c0_43] : memref<18x18x128xf32, #tpu.memory_space<vmem>>, vector<16x16x128xf32>
    %28 = vector.shape_cast %27 : vector<16x16x128xf32> to vector<256x128xf32>
    %c0_44 = arith.constant 0 : index
    %c768 = arith.constant 768 : index
    %29 = vector.load %arg12[%c0_44, %c768] : memref<256x1152xf32, #tpu.memory_space<vmem>>, vector<256x128xf32>
    tpu.vector_store %arg12[%c0_44, %c768], %28 {strides = array<i32>} : memref<256x1152xf32, #tpu.memory_space<vmem>>, vector<256x128xf32>,
    %c2_45 = arith.constant 2 : index
    %c1_46 = arith.constant 1 : index
    %c0_47 = arith.constant 0 : index
    %30 = vector.load %arg11[%c2_45, %c1_46, %c0_47] : memref<18x18x128xf32, #tpu.memory_space<vmem>>, vector<16x16x128xf32>
    %31 = vector.shape_cast %30 : vector<16x16x128xf32> to vector<256x128xf32>
    %c0_48 = arith.constant 0 : index
    %c896 = arith.constant 896 : index
    %32 = vector.load %arg12[%c0_48, %c896] : memref<256x1152xf32, #tpu.memory_space<vmem>>, vector<256x128xf32>
    tpu.vector_store %arg12[%c0_48, %c896], %31 {strides = array<i32>} : memref<256x1152xf32, #tpu.memory_space<vmem>>, vector<256x128xf32>,
    %c2_49 = arith.constant 2 : index
    %c2_50 = arith.constant 2 : index
    %c0_51 = arith.constant 0 : index
    %33 = vector.load %arg11[%c2_49, %c2_50, %c0_51] : memref<18x18x128xf32, #tpu.memory_space<vmem>>, vector<16x16x128xf32>
    %34 = vector.shape_cast %33 : vector<16x16x128xf32> to vector<256x128xf32>
    %c0_52 = arith.constant 0 : index
    %c1024 = arith.constant 1024 : index
    %35 = vector.load %arg12[%c0_52, %c1024] : memref<256x1152xf32, #tpu.memory_space<vmem>>, vector<256x128xf32>
    tpu.vector_store %arg12[%c0_52, %c1024], %34 {strides = array<i32>} : memref<256x1152xf32, #tpu.memory_space<vmem>>, vector<256x128xf32>,
    %c0_53 = arith.constant 0 : index
    %c0_54 = arith.constant 0 : index
    %36 = vector.load %arg12[%c0_53, %c0_54] : memref<256x1152xf32, #tpu.memory_space<vmem>>, vector<256x1152xf32>
    %c0_55 = arith.constant 0 : index
    %c0_56 = arith.constant 0 : index
    %37 = vector.load %arg2[%c0_55, %c0_56] : memref<1152x128xf32, #tpu.memory_space<vmem>>, vector<1152x128xf32>
    %cst_57 = arith.constant dense<0.000000e+00> : vector<256x128xf32>
    %38 = tpu.matmul %36, %37, %cst_57 {dimension_numbers = #tpu.dot_dimension_numbers<[1], [0], [0], [1], [0, 0, 1, 1], [], []>} : vector<256x1152xf32>, vector<1152x128xf32>, vector<256x128xf32> -> vector<256x128xf32>
    %39 = arith.mulf %38, %38 : vector<256x128xf32>
    %cst_58 = arith.constant dense<0.000000e+00> : vector<128xf32>
    %40 = vector.multi_reduction <add>, %39, %cst_58 [0] : vector<256x128xf32> to vector<128xf32>
    %41 = vector.shape_cast %40 : vector<128xf32> to vector<1x128xf32>
    %cst_59 = arith.constant 2.560000e+02 : f32
    %42 = vector.broadcast %cst_59 : f32 to vector<1x128xf32>
    %43 = arith.divf %41, %42 : vector<1x128xf32>
    %c0_60 = arith.constant 0 : index
    %c0_61 = arith.constant 0 : index
    %44 = vector.load %arg4[%c0_60, %c0_61] : memref<1x128xf32, #tpu.memory_space<vmem>>, vector<1x128xf32>
    %cst_62 = arith.constant 9.99999997E-7 : f32
    %45 = vector.broadcast %cst_62 : f32 to vector<1x128xf32>
    %46 = arith.addf %43, %45 : vector<1x128xf32>
    %47 = math.rsqrt %46 : vector<1x128xf32>
    %48 = arith.mulf %44, %47 : vector<1x128xf32>
    %49 = vector.broadcast %48 : vector<1x128xf32> to vector<256x128xf32>
    %50 = arith.mulf %38, %49 : vector<256x128xf32>
    %c0_63 = arith.constant 0 : index
    %c0_64 = arith.constant 0 : index
    %51 = vector.load %arg5[%c0_63, %c0_64] : memref<1x128xf32, #tpu.memory_space<vmem>>, vector<1x128xf32>
    %52 = vector.broadcast %51 : vector<1x128xf32> to vector<256x128xf32>
    %53 = arith.addf %50, %52 : vector<256x128xf32>
    %c0_65 = arith.constant 0 : index
    %c0_66 = arith.constant 0 : index
    %54 = vector.load %arg6[%c0_65, %c0_66] : memref<1x128xf32, #tpu.memory_space<vmem>>, vector<1x128xf32>
    %55 = vector.broadcast %54 : vector<1x128xf32> to vector<256x128xf32>
    %56 = arith.maximumf %53, %55 : vector<256x128xf32>
    %cst_67 = arith.constant 0.000000e+00 : f32
    %57 = vector.broadcast %cst_67 : f32 to vector<256x128xf32>
    %58 = arith.maximumf %56, %57 : vector<256x128xf32>
    %59 = vector.shape_cast %58 : vector<256x128xf32> to vector<16x16x128xf32>
    %c1_68 = arith.constant 1 : index
    %c1_69 = arith.constant 1 : index
    %c0_70 = arith.constant 0 : index
    %60 = vector.load %arg11[%c1_68, %c1_69, %c0_70] : memref<18x18x128xf32, #tpu.memory_space<vmem>>, vector<16x16x128xf32>
    tpu.vector_store %arg11[%c1_68, %c1_69, %c0_70], %59 {strides = array<i32>} : memref<18x18x128xf32, #tpu.memory_space<vmem>>, vector<16x16x128xf32>,
    %c0_71 = arith.constant 0 : index
    %c0_72 = arith.constant 0 : index
    %c0_73 = arith.constant 0 : index
    %61 = vector.load %arg11[%c0_71, %c0_72, %c0_73] : memref<18x18x128xf32, #tpu.memory_space<vmem>>, vector<16x16x128xf32>
    %62 = vector.shape_cast %61 : vector<16x16x128xf32> to vector<256x128xf32>
    %c0_74 = arith.constant 0 : index
    %c0_75 = arith.constant 0 : index
    %63 = vector.load %arg12[%c0_74, %c0_75] : memref<256x1152xf32, #tpu.memory_space<vmem>>, vector<256x128xf32>
    tpu.vector_store %arg12[%c0_74, %c0_75], %62 {strides = array<i32>} : memref<256x1152xf32, #tpu.memory_space<vmem>>, vector<256x128xf32>,
    %c0_76 = arith.constant 0 : index
    %c1_77 = arith.constant 1 : index
    %c0_78 = arith.constant 0 : index
    %64 = vector.load %arg11[%c0_76, %c1_77, %c0_78] : memref<18x18x128xf32, #tpu.memory_space<vmem>>, vector<16x16x128xf32>
    %65 = vector.shape_cast %64 : vector<16x16x128xf32> to vector<256x128xf32>
    %c0_79 = arith.constant 0 : index
    %c128_80 = arith.constant 128 : index
    %66 = vector.load %arg12[%c0_79, %c128_80] : memref<256x1152xf32, #tpu.memory_space<vmem>>, vector<256x128xf32>
    tpu.vector_store %arg12[%c0_79, %c128_80], %65 {strides = array<i32>} : memref<256x1152xf32, #tpu.memory_space<vmem>>, vector<256x128xf32>,
    %c0_81 = arith.constant 0 : index
    %c2_82 = arith.constant 2 : index
    %c0_83 = arith.constant 0 : index
    %67 = vector.load %arg11[%c0_81, %c2_82, %c0_83] : memref<18x18x128xf32, #tpu.memory_space<vmem>>, vector<16x16x128xf32>
    %68 = vector.shape_cast %67 : vector<16x16x128xf32> to vector<256x128xf32>
    %c0_84 = arith.constant 0 : index
    %c256_85 = arith.constant 256 : index
    %69 = vector.load %arg12[%c0_84, %c256_85] : memref<256x1152xf32, #tpu.memory_space<vmem>>, vector<256x128xf32>
    tpu.vector_store %arg12[%c0_84, %c256_85], %68 {strides = array<i32>} : memref<256x1152xf32, #tpu.memory_space<vmem>>, vector<256x128xf32>,
    %c1_86 = arith.constant 1 : index
    %c0_87 = arith.constant 0 : index
    %c0_88 = arith.constant 0 : index
    %70 = vector.load %arg11[%c1_86, %c0_87, %c0_88] : memref<18x18x128xf32, #tpu.memory_space<vmem>>, vector<16x16x128xf32>
    %71 = vector.shape_cast %70 : vector<16x16x128xf32> to vector<256x128xf32>
    %c0_89 = arith.constant 0 : index
    %c384_90 = arith.constant 384 : index
    %72 = vector.load %arg12[%c0_89, %c384_90] : memref<256x1152xf32, #tpu.memory_space<vmem>>, vector<256x128xf32>
    tpu.vector_store %arg12[%c0_89, %c384_90], %71 {strides = array<i32>} : memref<256x1152xf32, #tpu.memory_space<vmem>>, vector<256x128xf32>,
    %c1_91 = arith.constant 1 : index
    %c1_92 = arith.constant 1 : index
    %c0_93 = arith.constant 0 : index
    %73 = vector.load %arg11[%c1_91, %c1_92, %c0_93] : memref<18x18x128xf32, #tpu.memory_space<vmem>>, vector<16x16x128xf32>
    %74 = vector.shape_cast %73 : vector<16x16x128xf32> to vector<256x128xf32>
    %c0_94 = arith.constant 0 : index
    %c512_95 = arith.constant 512 : index
    %75 = vector.load %arg12[%c0_94, %c512_95] : memref<256x1152xf32, #tpu.memory_space<vmem>>, vector<256x128xf32>
    tpu.vector_store %arg12[%c0_94, %c512_95], %74 {strides = array<i32>} : memref<256x1152xf32, #tpu.memory_space<vmem>>, vector<256x128xf32>,
    %c1_96 = arith.constant 1 : index
    %c2_97 = arith.constant 2 : index
    %c0_98 = arith.constant 0 : index
    %76 = vector.load %arg11[%c1_96, %c2_97, %c0_98] : memref<18x18x128xf32, #tpu.memory_space<vmem>>, vector<16x16x128xf32>
    %77 = vector.shape_cast %76 : vector<16x16x128xf32> to vector<256x128xf32>
    %c0_99 = arith.constant 0 : index
    %c640_100 = arith.constant 640 : index
    %78 = vector.load %arg12[%c0_99, %c640_100] : memref<256x1152xf32, #tpu.memory_space<vmem>>, vector<256x128xf32>
    tpu.vector_store %arg12[%c0_99, %c640_100], %77 {strides = array<i32>} : memref<256x1152xf32, #tpu.memory_space<vmem>>, vector<256x128xf32>,
    %c2_101 = arith.constant 2 : index
    %c0_102 = arith.constant 0 : index
    %c0_103 = arith.constant 0 : index
    %79 = vector.load %arg11[%c2_101, %c0_102, %c0_103] : memref<18x18x128xf32, #tpu.memory_space<vmem>>, vector<16x16x128xf32>
    %80 = vector.shape_cast %79 : vector<16x16x128xf32> to vector<256x128xf32>
    %c0_104 = arith.constant 0 : index
    %c768_105 = arith.constant 768 : index
    %81 = vector.load %arg12[%c0_104, %c768_105] : memref<256x1152xf32, #tpu.memory_space<vmem>>, vector<256x128xf32>
    tpu.vector_store %arg12[%c0_104, %c768_105], %80 {strides = array<i32>} : memref<256x1152xf32, #tpu.memory_space<vmem>>, vector<256x128xf32>,
    %c2_106 = arith.constant 2 : index
    %c1_107 = arith.constant 1 : index
    %c0_108 = arith.constant 0 : index
    %82 = vector.load %arg11[%c2_106, %c1_107, %c0_108] : memref<18x18x128xf32, #tpu.memory_space<vmem>>, vector<16x16x128xf32>
    %83 = vector.shape_cast %82 : vector<16x16x128xf32> to vector<256x128xf32>
    %c0_109 = arith.constant 0 : index
    %c896_110 = arith.constant 896 : index
    %84 = vector.load %arg12[%c0_109, %c896_110] : memref<256x1152xf32, #tpu.memory_space<vmem>>, vector<256x128xf32>
    tpu.vector_store %arg12[%c0_109, %c896_110], %83 {strides = array<i32>} : memref<256x1152xf32, #tpu.memory_space<vmem>>, vector<256x128xf32>,
    %c2_111 = arith.constant 2 : index
    %c2_112 = arith.constant 2 : index
    %c0_113 = arith.constant 0 : index
    %85 = vector.load %arg11[%c2_111, %c2_112, %c0_113] : memref<18x18x128xf32, #tpu.memory_space<vmem>>, vector<16x16x128xf32>
    %86 = vector.shape_cast %85 : vector<16x16x128xf32> to vector<256x128xf32>
    %c0_114 = arith.constant 0 : index
    %c1024_115 = arith.constant 1024 : index
    %87 = vector.load %arg12[%c0_114, %c1024_115] : memref<256x1152xf32, #tpu.memory_space<vmem>>, vector<256x128xf32>
    tpu.vector_store %arg12[%c0_114, %c1024_115], %86 {strides = array<i32>} : memref<256x1152xf32, #tpu.memory_space<vmem>>, vector<256x128xf32>,
    %c0_116 = arith.constant 0 : index
    %c0_117 = arith.constant 0 : index
    %88 = vector.load %arg12[%c0_116, %c0_117] : memref<256x1152xf32, #tpu.memory_space<vmem>>, vector<256x1152xf32>
    %c0_118 = arith.constant 0 : index
    %c0_119 = arith.constant 0 : index
    %89 = vector.load %arg3[%c0_118, %c0_119] : memref<1152x128xf32, #tpu.memory_space<vmem>>, vector<1152x128xf32>
    %cst_120 = arith.constant dense<0.000000e+00> : vector<256x128xf32>
    %90 = tpu.matmul %88, %89, %cst_120 {dimension_numbers = #tpu.dot_dimension_numbers<[1], [0], [0], [1], [0, 0, 1, 1], [], []>} : vector<256x1152xf32>, vector<1152x128xf32>, vector<256x128xf32> -> vector<256x128xf32>
    %91 = arith.mulf %90, %90 : vector<256x128xf32>
    %cst_121 = arith.constant dense<0.000000e+00> : vector<128xf32>
    %92 = vector.multi_reduction <add>, %91, %cst_121 [0] : vector<256x128xf32> to vector<128xf32>
    %93 = vector.shape_cast %92 : vector<128xf32> to vector<1x128xf32>
    %cst_122 = arith.constant 2.560000e+02 : f32
    %94 = vector.broadcast %cst_122 : f32 to vector<1x128xf32>
    %95 = arith.divf %93, %94 : vector<1x128xf32>
    %c0_123 = arith.constant 0 : index
    %c0_124 = arith.constant 0 : index
    %96 = vector.load %arg7[%c0_123, %c0_124] : memref<1x128xf32, #tpu.memory_space<vmem>>, vector<1x128xf32>
    %cst_125 = arith.constant 9.99999997E-7 : f32
    %97 = vector.broadcast %cst_125 : f32 to vector<1x128xf32>
    %98 = arith.addf %95, %97 : vector<1x128xf32>
    %99 = math.rsqrt %98 : vector<1x128xf32>
    %100 = arith.mulf %96, %99 : vector<1x128xf32>
    %101 = vector.broadcast %100 : vector<1x128xf32> to vector<256x128xf32>
    %102 = arith.mulf %90, %101 : vector<256x128xf32>
    %c0_126 = arith.constant 0 : index
    %c0_127 = arith.constant 0 : index
    %103 = vector.load %arg8[%c0_126, %c0_127] : memref<1x128xf32, #tpu.memory_space<vmem>>, vector<1x128xf32>
    %104 = vector.broadcast %103 : vector<1x128xf32> to vector<256x128xf32>
    %105 = arith.addf %102, %104 : vector<256x128xf32>
    %c0_128 = arith.constant 0 : index
    %c0_129 = arith.constant 0 : index
    %106 = vector.load %arg9[%c0_128, %c0_129] : memref<1x128xf32, #tpu.memory_space<vmem>>, vector<1x128xf32>
    %107 = vector.broadcast %106 : vector<1x128xf32> to vector<256x128xf32>
    %108 = arith.maximumf %105, %107 : vector<256x128xf32>
    %109 = vector.shape_cast %7 : vector<16x16x128xf32> to vector<256x128xf32>
    %110 = arith.addf %108, %109 : vector<256x128xf32>
    %cst_130 = arith.constant 0.000000e+00 : f32
    %111 = vector.broadcast %cst_130 : f32 to vector<256x128xf32>
    %112 = arith.maximumf %110, %111 : vector<256x128xf32>
    %113 = vector.shape_cast %112 : vector<256x128xf32> to vector<1x16x16x128xf32>
    %c0_131 = arith.constant 0 : index
    %c0_132 = arith.constant 0 : index
    %c0_133 = arith.constant 0 : index
    %c0_134 = arith.constant 0 : index
    %114 = vector.load %arg10[%c0_131, %c0_132, %c0_133, %c0_134] : memref<1x16x16x128xf32, #tpu.memory_space<vmem>>, vector<1x16x16x128xf32>
    tpu.vector_store %arg10[%c0_131, %c0_132, %c0_133, %c0_134], %113 {strides = array<i32>} : memref<1x16x16x128xf32, #tpu.memory_space<vmem>>, vector<1x16x16x128xf32>,
    return
  }
  func.func @transform_0(%arg0: i32) -> (i32, i32, i32, i32) {
    %c0_i32 = arith.constant 0 : i32
    %c0_i32_0 = arith.constant 0 : i32
    %c0_i32_1 = arith.constant 0 : i32
    %c0_i32_2 = arith.constant 0 : i32
    return %arg0, %c0_i32, %c0_i32_0, %c0_i32_1 : i32, i32, i32, i32
  }
  func.func @transform_1(%arg0: i32) -> (i32, i32) {
    %c0_i32 = arith.constant 0 : i32
    %c0_i32_0 = arith.constant 0 : i32
    %c0_i32_1 = arith.constant 0 : i32
    return %c0_i32, %c0_i32_0 : i32, i32
  }
  func.func @transform_2(%arg0: i32) -> (i32, i32) {
    %c0_i32 = arith.constant 0 : i32
    %c0_i32_0 = arith.constant 0 : i32
    %c0_i32_1 = arith.constant 0 : i32
    return %c0_i32, %c0_i32_0 : i32, i32
  }
  func.func @transform_3(%arg0: i32) -> (i32, i32) {
    %c0_i32 = arith.constant 0 : i32
    %c0_i32_0 = arith.constant 0 : i32
    %c0_i32_1 = arith.constant 0 : i32
    return %c0_i32, %c0_i32_0 : i32, i32
  }
  func.func @transform_4(%arg0: i32) -> (i32, i32) {
    %c0_i32 = arith.constant 0 : i32
    %c0_i32_0 = arith.constant 0 : i32
    %c0_i32_1 = arith.constant 0 : i32
    return %c0_i32, %c0_i32_0 : i32, i32
  }
  func.func @transform_5(%arg0: i32) -> (i32, i32) {
    %c0_i32 = arith.constant 0 : i32
    %c0_i32_0 = arith.constant 0 : i32
    %c0_i32_1 = arith.constant 0 : i32
    return %c0_i32, %c0_i32_0 : i32, i32
  }
  func.func @transform_6(%arg0: i32) -> (i32, i32) {
    %c0_i32 = arith.constant 0 : i32
    %c0_i32_0 = arith.constant 0 : i32
    %c0_i32_1 = arith.constant 0 : i32
    return %c0_i32, %c0_i32_0 : i32, i32
  }
  func.func @transform_7(%arg0: i32) -> (i32, i32) {
    %c0_i32 = arith.constant 0 : i32
    %c0_i32_0 = arith.constant 0 : i32
    %c0_i32_1 = arith.constant 0 : i32
    return %c0_i32, %c0_i32_0 : i32, i32
  }
  func.func @transform_8(%arg0: i32) -> (i32, i32) {
    %c0_i32 = arith.constant 0 : i32
    %c0_i32_0 = arith.constant 0 : i32
    %c0_i32_1 = arith.constant 0 : i32
    return %c0_i32, %c0_i32_0 : i32, i32
  }
  func.func @transform_9(%arg0: i32) -> (i32, i32, i32, i32) {
    %c0_i32 = arith.constant 0 : i32
    %c0_i32_0 = arith.constant 0 : i32
    %c0_i32_1 = arith.constant 0 : i32
    %c0_i32_2 = arith.constant 0 : i32
    return %arg0, %c0_i32, %c0_i32_0, %c0_i32_1 : i32, i32, i32, i32
  }
}

</mosaic_0001>

<bundles_post_ra>
// kernel: tpu_custom_call.1
= control target key start
LH: loop header
LB: loop body
LE: loop exit
PB: predicated region body
PF: predicated region fallthrough
CT: control target
= control target key end

     0   :  { %14 = vsyncpa [#allocation5], 0  ;;  %s9263_s0 = inlined_call_operand.hbm [shape: f32[2,16,16,128], index: 0, kind: input, shape index: {}]   ;;  %s9264_s1 = inlined_call_operand.hbm [shape: f32[1152,128], index: 1, kind: input, shape index: {}]   ;;  %s9265_s2 = inlined_call_operand.hbm [shape: f32[1152,128], index: 2, kind: input, shape index: {}]   ;;  %s9266_s3 = inlined_call_operand.vmem [shape: f32[1,128], index: 3, kind: input, shape index: {}]   ;;  %s9267_s4 = inlined_call_operand.vmem [shape: f32[1,128], index: 4, kind: input, shape index: {}]   ;;  %s9268_s5 = inlined_call_operand.vmem [shape: f32[1,128], index: 5, kind: input, shape index: {}]   ;;  %s9269_s6 = inlined_call_operand.vmem [shape: f32[1,128], index: 6, kind: input, shape index: {}]   ;;  %s9270_s7 = inlined_call_operand.vmem [shape: f32[1,128], index: 7, kind: input, shape index: {}]   ;;  %s9271_s8 = inlined_call_operand.vmem [shape: f32[1,128], index: 8, kind: input, shape index: {}]   ;;  %s9272_s9 = inlined_call_operand.hbm [shape: f32[2,16,16,128], index: 9, kind: output, shape index: {}]  }
   0x1   :  { %16 = vsyncpa [#allocation5 + $0x1], 0 }
   0x2   :  { %17 = vsyncpa [#allocation8], 0 }
   0x3   :  { %18 = vsyncpa [#allocation6], 0 }
   0x4   :  { %20 = vsyncpa [#allocation6 + $0x1], 0  ;;  %s6855_s30 = smov 0   ;;  %s6857_s10 = smov 0  }
   0x5   :  { %s6859_s11 = smov 0   ;;  %s6861_s12 = smov 0  }
   0x6 LB: > { %s6876_s13 = sadd.s32 4294967295, %s6793_s12   ;;  %s5398_s14 = sadd.s32 4294967294, %s6793_s12   ;;  %s6793_s12 = sphi %s6861_s12, %s9449_s12   ;;  %s6789_s11 = sphi %s6859_s11, %s9448_s11   ;;  %s6785_s10 = sphi %s6857_s10, %s9447_s10   ;;  %s6781_s30 = sphi %s6855_s30, %s9446_s30  }
   0x7   : > { %p46_p0 = scmp.ne.s32.totalorder %s6785_s10, %s6781_s30  ;;  %p9273_p1 = scmp.eq.s32.totalorder %s6876_s13, 0 }
   0x8   : > { %p244_p3 = scmp.eq.s32.totalorder %s5398_s14, 1  ;;  %p5399_p5 = scmp.ge.s32.totalorder %s6793_s12, 1 }
   0x9   : > { %p6885_p4 = por %p9273_p1, %p46_p0  ;;  %p251_p7 = scmp.lt.s32.totalorder %s6793_s12, 3 }
   0xa   : > { %p6890_p6 = por %p244_p3, %p46_p0  ;;  %s6795_s18 = smov [#allocation7]  }
   0xb   : > { %s9333_s15 = scalar_select %p6885_p4, 1, 0 }
   0xc   : > { %s9334_s16 = scalar_select %p6890_p6, 1, 0 }
   0xd   : > { %p6895_p8 = pnand %p5399_p5, %p251_p7  ;;  %s263_s19 = sshll.u32 %s6795_s18, 4  ;;  %s6899_s19 = int_to_ptr.vmem [resolvable:$true] %s263_s19 }
   0xe   : > { %9335 = sst [smem:[#allocation14_spill]] %s9334_s16  ;;  %s6796_s21 = smov [#allocation9]  }
   0xf   : > { %p6538_p9 = pneg %p6895_p8  ;;  %s276_s22 = sshll.u32 %s6796_s21, 4  ;;  %s6910_s22 = int_to_ptr.vmem [resolvable:$true] %s276_s22 }
  0x10   : > { %s6637_s25 = scalar_lea.hbm %s9264_s1, 18432 }
  0x11   : > { %p6906_p11 = pnand %p6538_p9, %p9273_p1  ;;  %p6638_p12 = scmp.ne.s32.totalorder %s9264_s1, %s6637_s25 }
  0x12   : > { %p6644_p5 = scmp.lt.u32.totalorder %s6637_s25, %s9264_s1 }
  0x13   : > { %p6639_p13 = pneg %p6906_p11 }
  0x15   : > { %p6640_p0 = pnand %p6639_p13, %p6638_p12 }
  0x17   : > { %p6641_p3 = pneg %p6640_p0 }
  0x19   : > { %p6646_p7 = pnand %p6644_p5, %p6641_p3 }
  0x1b   : > { %6649 = shalt.err (!%p6646_p7)
}
  0x1c   : > { %s6650_s14 = scalar_lea.vmem %s6899_s19, 18432  ;;  %p6658_p2 = scmp.lt.s32.totalorder %s6899_s19, %s6899_s19 }
  0x1d   : > { %p6651_p9 = scmp.ne.s32.totalorder %s6899_s19, %s6650_s14  ;;  %p6659_p12 = scmp.lt.s32.totalorder %s6650_s14, %s6650_s14 }
  0x1f   : > { %p6653_p10 = pnand %p6651_p9, %p6639_p13  ;;  %p6660_p0 = por %p6659_p12, %p6658_p2 }
  0x21   : > { %p6654_p1 = pneg %p6653_p10 }
  0x23   : > { %p6661_p6 = pnand %p6660_p0, %p6654_p1 }
  0x25   : > { %6664 = shalt.err (!%p6661_p6)
}
  0x26   : > { %s9275_s18 = smov 128   ;;  %s9276_s21 = smov 8  }
  0x27   : > { %6541 = dma.hbm_to_vmem [thread:$0]  (!%p6906_p11), %s9264_s1, 18432, %s6899_s19, [#allocation8], %s9275_s18, %s9275_s18, %s9276_s21  }
  0x28   : > { %s6665_s27 = scalar_lea.hbm %s9265_s2, 18432 }
  0x29   : > { %p6666_p1 = scmp.ne.s32.totalorder %s9265_s2, %s6665_s27  ;;  %p6672_p10 = scmp.lt.u32.totalorder %s6665_s27, %s9265_s2 }
  0x2b   : > { %p6668_p2 = pnand %p6666_p1, %p6639_p13 }
  0x2d   : > { %p6669_p6 = pneg %p6668_p2 }
  0x2f   : > { %p6674_p3 = pnand %p6672_p10, %p6669_p6 }
  0x31   : > { %6677 = shalt.err (!%p6674_p3)
}
  0x32   : > { %s6678_s19 = scalar_lea.vmem %s6910_s22, 18432  ;;  %p6686_p12 = scmp.lt.s32.totalorder %s6910_s22, %s6910_s22 }
  0x33   : > { %p6679_p5 = scmp.ne.s32.totalorder %s6910_s22, %s6678_s19  ;;  %p6687_p0 = scmp.lt.s32.totalorder %s6678_s19, %s6678_s19 }
  0x35   : > { %p6681_p7 = pnand %p6679_p5, %p6639_p13  ;;  %p6688_p1 = por %p6687_p0, %p6686_p12 }
  0x37   : > { %p6682_p9 = pneg %p6681_p7 }
  0x39   : > { %p6689_p2 = pnand %p6688_p1, %p6682_p9 }
  0x3b   : > { %6692 = shalt.err (!%p6689_p2)
}
  0x3c   : > { %6544 = dma.hbm_to_vmem [thread:$0]  (!%p6906_p11), %s9265_s2, 18432, %s6910_s22, [#allocation8], %s9275_s18, %s9275_s18, %s9276_s21  }
  0x3d   : > { %s6971_s20 = sadd.s32 1, %s6793_s12   ;;  %s33_s24 = sadd.s32 1, %s6789_s11 }
  0x3e   : > { %s30_s25 = ssub.s32 %s6793_s12, %s6971_s20  ;;  %p40_p13 = scmp.ne.s32.totalorder %s6789_s11, %s6785_s10 }
  0x3f   : > { %p31_p6 = scmp.eq.s32.totalorder %s30_s25, 0  ;;  %p41_p10 = scmp.eq.s32.totalorder %s6793_s12, 0 }
  0x40   : > { %p9338_p3 = scmp.eq.s32.totalorder %s6876_s13, 1  ;;  %p6555_p7 = scmp.lt.s32.totalorder %s6793_s12, 2 }
  0x41   : > { %s6987_s27 = scalar_select %p31_p6, %s6789_s11, %s33_s24  }
  0x42   : > { %p6981_p5 = por %p9338_p3, %p40_p13  ;;  %p42_p9 = por %p41_p10, %p40_p13 }
  0x43   : > { %s308_s28 = sand.u32 1, %s6789_s11   ;;  %s5420_s22 = sshll.u32 %s6793_s12, 12 }
  0x44   : > { %s9339_s26 = scalar_select %p6981_p5, 1, 0 }
  0x45   : > { %s5403_s29 = sshll.u32 %s308_s28, 8  ;;  %s6994_s16 = scalar_lea.hbm %s9263_s0, %s5420_s22 }
  0x46   : > { %s312_s23 = scalar_lea.vmem [#allocation4], %s5403_s29  ;;  %p6998_p11 = pnand %p6555_p7, %p42_p9 }
  0x47   : > { %s319_s25 = sshll.u32 %s312_s23, 4  ;;  %s7002_s18 = scalar_lea.sflag [#allocation5], %s308_s28  ;;  %s6996_s25 = int_to_ptr.vmem [resolvable:$true] %s319_s25 }
  0x48   : > { %s6693_s21 = scalar_lea.hbm %s6994_s16, 4096  ;;  %p6695_p0 = pneg %p6998_p11 }
  0x49   : > { %p6694_p12 = scmp.ne.s32.totalorder %s6994_s16, %s6693_s21  ;;  %s6698_s14 = scalar_lea.hbm %s9263_s0, 8192 }
  0x4a   : > { %p6699_p13 = scmp.lt.u32.totalorder %s6994_s16, %s9263_s0  ;;  %p6700_p6 = scmp.lt.u32.totalorder %s6698_s14, %s6693_s21 }
  0x4b   : > { %p6696_p1 = pnand %p6695_p0, %p6694_p12  ;;  %p6702_p3 = scmp.lt.u32.totalorder %s6693_s21, %s6994_s16 }
  0x4c   : > { %p6701_p10 = por %p6700_p6, %p6699_p13 }
  0x4d   : > { %p6697_p2 = pneg %p6696_p1 }
  0x4e   : > { %p6703_p7 = por %p6702_p3, %p6701_p10 }
  0x50   : > { %p6704_p9 = pnand %p6703_p7, %p6697_p2 }
  0x52   : > { %6707 = shalt.err (!%p6704_p9)
}
  0x53   : > { %s6708_s28 = scalar_lea.vmem %s6996_s25, 4096  ;;  %s6799_s29 = smov [#allocation4]  }
  0x54   : > { %p6709_p12 = scmp.ne.s32.totalorder %s6996_s25, %s6708_s28  ;;  %s6713_s22 = sshll.u32 %s6799_s29, 4  ;;  %s6714_s22 = int_to_ptr.vmem [resolvable:$false] %s6713_s22 }
  0x55   : > { %s6715_s19 = scalar_lea.vmem %s6714_s22, 8192  ;;  %p6716_p4 = scmp.lt.s32.totalorder %s6996_s25, %s6714_s22 }
  0x56   : > { %p6711_p1 = pnand %p6709_p12, %p6695_p0  ;;  %p6717_p13 = scmp.lt.s32.totalorder %s6715_s19, %s6708_s28 }
  0x58   : > { %p6712_p5 = pneg %p6711_p1  ;;  %p6718_p6 = por %p6717_p13, %p6716_p4 }
  0x5a   : > { %p6719_p10 = pnand %p6718_p6, %p6712_p5 }
  0x5c   : > { %6722 = shalt.err (!%p6719_p10)
}
  0x5d   : > { %s9341_s21 = smov 8   ;;  %s9342_s14 = smov 128  }
  0x5e   : > { %6548 = dma.hbm_to_vmem [thread:$0]  (!%p6998_p11), %s6994_s16, 4096, %s6996_s25, %s7002_s18, %s9342_s14, %s9342_s14, %s9341_s21  }
  0x5f   : > { %331 = sbr.rel (%p6895_p8) target bundleno = 1798 (0x706), region = 56 }
  0x66   : > { %s7036_s23 = sand.u32 1, %s6785_s10   ;;  %p9343_p4 = scmp.ne.s32.totalorder %s9333_s15, 0 }
  0x67   : > { %s5407_s28 = sshll.u32 %s7036_s23, 8  ;;  %s334_s29 = scalar_lea.sflag [#allocation5], %s7036_s23 }
  0x68   : > { %s7042_s24 = scalar_lea.vmem [#allocation4], %s5407_s28 }
  0x69   : > { %6768 = dma.done.wait (%p9343_p4), %s334_s29, 4096  }
  0x6a   : > { %6770 = vsyncadd (%p9343_p4), %s334_s29, 4294963200  ;;  %p9344_p5 = scmp.eq.s32.totalorder %s6876_s13, 0 }
  0x6c   : > { %6772 = dma.done.wait (%p9344_p5), [#allocation8], 36864   ;;  %p9345_p8 = pmov %p9344_p5 }
  0x6d   : > { %v9291_v0 = vmov 0.0|0.0   ;;  %v6801_v1 = vmov 0.0   ;;  %v1349_v2 = vld [vmem:[#allocation7] sm:$0xff]  ;;  %v1350_v3 = vld [vmem:[#allocation7 + $0x8] sm:$0xff]  ;;  %v1351_v4 = vld [vmem:[#allocation7 + $0x10] sm:$0xff]  ;;  %s8968_s17 = scalar_lea.vmem [#allocation10], %s5407_s28 }
  0x6e   : > { %6774 = vsyncadd (%p9345_p8), [#allocation8], 4294930432  ;;  %5678 = vmatprep.subr.bf16.mxu0 %v9291_v0  ;;  %380 = vst [vmem:[#allocation2] sm:$0xff] %v6801_v1  ;;  %v5679_v5 = vpack.c.bf16 %v1350_v3, %v1349_v2  ;;  %v1352_v6 = vld [vmem:[#allocation7 + $0x18] sm:$0xff]  ;;  %v1353_v8 = vld [vmem:[#allocation7 + $0x20] sm:$0xff]  ;;  %s5421_s28 = sshll.u32 %s6876_s13, 12 }
  0x6f   : > { %381 = vst [vmem:[#allocation2 + $0x8] sm:$0xff] %v6801_v1  ;;  %382 = vst [vmem:[#allocation2 + $0x10] sm:$0x3] %v6801_v1  ;;  %v5682_v7 = vpack.c.bf16 %v1352_v6, %v1351_v4  ;;  %v1354_v9 = vld [vmem:[#allocation7 + $0x28] sm:$0xff]  ;;  %v1355_v11 = vld [vmem:[#allocation7 + $0x30] sm:$0xff]  ;;  %s5306_s18 = sshll.u32 %s8968_s17, 4  ;;  %s9201_s25 = scalar_lea.hbm %s9272_s9, %s5421_s28  ;;  %s9203_s18 = int_to_ptr.vmem [resolvable:$true] %s5306_s18 }
  0x70   : > { %384 = vst [vmem:[#allocation2 + $0x198] sm:$0xff] %v6801_v1  ;;  %385 = vst [vmem:[#allocation2 + $0x1a0] sm:$0xff] %v6801_v1  ;;  %5680 = vmatpush1.bf16.msra.mxu0 %v5679_v5  ;;  %v5685_v10 = vpack.c.bf16 %v1354_v9, %v1353_v8  ;;  %v1356_v12 = vld [vmem:[#allocation7 + $0x38] sm:$0xff]  ;;  %v1357_v15 = vld [vmem:[#allocation7 + $0x40] sm:$0xff]  ;;  %s5293_s22 = scalar_lea.sflag [#allocation6], %s7036_s23  ;;  %s6723_s19 = scalar_lea.vmem %s9203_s18, 4096 }
  0x71   : > { %386 = vst [vmem:[#allocation2 + $0x1a8] sm:$0x3] %v6801_v1  ;;  %388 = vst [vmem:[#allocation2 + $0x18] sm:$0x1] %v6801_v1  ;;  %5681 = vmatprep.subr.bf16.mxu0 %v9291_v0  ;;  %v5688_v14 = vpack.c.bf16 %v1356_v12, %v1355_v11  ;;  %v1358_v16 = vld [vmem:[#allocation7 + $0x48] sm:$0xff]  ;;  %v7095_v17 = vld [vmem:[%s7042_s24] sm:$0xff]  ;;  %p6724_p11 = scmp.ne.s32.totalorder %s9203_s18, %s6723_s19 }
  0x72   : > { %389 = vst [vmem:[#allocation2 + $0x30] sm:$0x1] %v6801_v1  ;;  %390 = vst [vmem:[#allocation2 + $0x48] sm:$0x1] %v6801_v1  ;;  %v7099_v18 = vld [vmem:[%s7042_s24 + $0x8] sm:$0xff]  ;;  %v7102_v19 = vld [vmem:[%s7042_s24 + $0x10] sm:$0xff]  ;;  %v5691_v22 = vpack.c.bf16 %v1358_v16, %v1357_v15 }
  0x73   : > { %391 = vst [vmem:[#allocation2 + $0x60] sm:$0x1] %v6801_v1  ;;  %392 = vst [vmem:[#allocation2 + $0x78] sm:$0x1] %v6801_v1  ;;  %v7107_v20 = vld [vmem:[%s7042_s24 + $0x18] sm:$0xff]  ;;  %v7110_v21 = vld [vmem:[%s7042_s24 + $0x20] sm:$0xff] }
  0x74   : > { %393 = vst [vmem:[#allocation2 + $0x90] sm:$0x1] %v6801_v1  ;;  %394 = vst [vmem:[#allocation2 + $0xa8] sm:$0x1] %v6801_v1  ;;  %5683 = vmatpush1.bf16.msra.mxu0 %v5682_v7  ;;  %v7115_v23 = vld [vmem:[%s7042_s24 + $0x28] sm:$0xff]  ;;  %v1359_v24 = vld [vmem:[#allocation7 + $0x50] sm:$0xff] }
  0x75   : > { %395 = vst [vmem:[#allocation2 + $0xc0] sm:$0x1] %v6801_v1  ;;  %396 = vst [vmem:[#allocation2 + $0xd8] sm:$0x1] %v6801_v1  ;;  %5684 = vmatprep.subr.bf16.mxu0 %v9291_v0  ;;  %v1360_v25 = vld [vmem:[#allocation7 + $0x58] sm:$0xff]  ;;  %v7120_v26 = vld [vmem:[%s7042_s24 + $0x30] sm:$0xff] }
  0x76   : > { %397 = vst [vmem:[#allocation2 + $0xf0] sm:$0x1] %v6801_v1  ;;  %398 = vst [vmem:[#allocation2 + $0x108] sm:$0x1] %v6801_v1  ;;  %v548_v13 = vld [vmem:[#allocation2 + $0x1] sm:$0xff]  ;;  %v7127_v28 = vld [vmem:[%s7042_s24 + $0x40] sm:$0xff]  ;;  %v5694_v31 = vpack.c.bf16 %v1360_v25, %v1359_v24 }
  0x77   : > { %399 = vst [vmem:[#allocation2 + $0x120] sm:$0x1] %v6801_v1  ;;  %400 = vst [vmem:[#allocation2 + $0x138] sm:$0x1] %v6801_v1  ;;  %1557 = vmatprep.mubr.f32.mxu0 %v548_v13  ;;  %v7124_v27 = vld [vmem:[%s7042_s24 + $0x38] sm:$0xff]  ;;  %v7132_v29 = vld [vmem:[%s7042_s24 + $0x48] sm:$0xff] }
  0x78   : > { %401 = vst [vmem:[#allocation2 + $0x150] sm:$0x1] %v6801_v1  ;;  %402 = vst [vmem:[#allocation2 + $0x168] sm:$0x1] %v6801_v1  ;;  %5686 = vmatpush1.bf16.msra.mxu0 %v5685_v10  ;;  %v7135_v30 = vld [vmem:[%s7042_s24 + $0x50] sm:$0xff]  ;;  %v7140_v32 = vld [vmem:[%s7042_s24 + $0x58] sm:$0xff] }
  0x79   : > { %403 = vst [vmem:[#allocation2 + $0x180] sm:$0x1] %v6801_v1  ;;  %404 = vst [vmem:[#allocation2 + $0x29] sm:$0x1] %v6801_v1  ;;  %5687 = vmatprep.subr.bf16.mxu0 %v9291_v0  ;;  %v1361_v33 = vld [vmem:[#allocation7 + $0x60] sm:$0xff]  ;;  %v1362_v34 = vld [vmem:[#allocation7 + $0x68] sm:$0xff] }
  0x7a   : > { %405 = vst [vmem:[#allocation2 + $0x41] sm:$0x1] %v6801_v1  ;;  %406 = vst [vmem:[#allocation2 + $0x59] sm:$0x1] %v6801_v1  ;;  %v7145_v35 = vld [vmem:[%s7042_s24 + $0x60] sm:$0xff]  ;;  %v7149_v36 = vld [vmem:[%s7042_s24 + $0x68] sm:$0xff]  ;;  %v5697_v37 = vpack.c.bf16 %v1362_v34, %v1361_v33 }
  0x7b   : > { %407 = vst [vmem:[#allocation2 + $0x71] sm:$0x1] %v6801_v1  ;;  %408 = vst [vmem:[#allocation2 + $0x89] sm:$0x1] %v6801_v1  ;;  %v7153_v38 = vld [vmem:[%s7042_s24 + $0x70] sm:$0xff]  ;;  %v1364_v40 = vld [vmem:[#allocation7 + $0x78] sm:$0xff] }
  0x7c   : > { %409 = vst [vmem:[#allocation2 + $0xa1] sm:$0x1] %v6801_v1  ;;  %410 = vst [vmem:[#allocation2 + $0xb9] sm:$0x1] %v6801_v1  ;;  %5689 = vmatpush1.bf16.msra.mxu0 %v5688_v14  ;;  %v1363_v39 = vld [vmem:[#allocation7 + $0x70] sm:$0xff]  ;;  %v7158_v41 = vld [vmem:[%s7042_s24 + $0x78] sm:$0xff] }
  0x7d   : > { %411 = vst [vmem:[#allocation2 + $0xd1] sm:$0x1] %v6801_v1  ;;  %412 = vst [vmem:[#allocation2 + $0xe9] sm:$0x1] %v6801_v1  ;;  %5690 = vmatprep.subr.bf16.mxu0 %v9291_v0  ;;  %v7162_v42 = vld [vmem:[%s7042_s24 + $0x80] sm:$0xff]  ;;  %v5700_v43 = vpack.c.bf16 %v1364_v40, %v1363_v39  ;;  %v7166_v44 = vld [vmem:[%s7042_s24 + $0x88] sm:$0xff] }
  0x7e   : > { %413 = vst [vmem:[#allocation2 + $0x101] sm:$0x1] %v6801_v1  ;;  %414 = vst [vmem:[#allocation2 + $0x119] sm:$0x1] %v6801_v1  ;;  %v1365_v45 = vld [vmem:[#allocation7 + $0x80] sm:$0xff]  ;;  %v1366_v46 = vld [vmem:[#allocation7 + $0x88] sm:$0xff] }
  0x7f   : > { %415 = vst [vmem:[#allocation2 + $0x131] sm:$0x1] %v6801_v1  ;;  %416 = vst [vmem:[#allocation2 + $0x149] sm:$0x1] %v6801_v1  ;;  %v7171_v47 = vld [vmem:[%s7042_s24 + $0x90] sm:$0xff]  ;;  %v7175_v48 = vld [vmem:[%s7042_s24 + $0x98] sm:$0xff]  ;;  %v5703_v50 = vpack.c.bf16 %v1366_v46, %v1365_v45 }
  0x80   : > { %417 = vst [vmem:[#allocation2 + $0x161] sm:$0x1] %v6801_v1  ;;  %418 = vst [vmem:[#allocation2 + $0x179] sm:$0x1] %v6801_v1  ;;  %5692 = vmatpush1.bf16.msra.mxu0 %v5691_v22  ;;  %v7178_v49 = vld [vmem:[%s7042_s24 + $0xa0] sm:$0xff]  ;;  %v7183_v51 = vld [vmem:[%s7042_s24 + $0xa8] sm:$0xff] }
  0x81   : > { %419 = vst [vmem:[#allocation2 + $0x191] sm:$0x1] %v6801_v1  ;;  %452 = vst [vmem:[#allocation2 + $0x19] sm:$0xff] %v7095_v17  ;;  %5693 = vmatprep.subr.bf16.mxu0 %v9291_v0  ;;  %v7186_v52 = vld [vmem:[%s7042_s24 + $0xb0] sm:$0xff]  ;;  %v1368_v54 = vld [vmem:[#allocation7 + $0x98] sm:$0xff]  ;;  %p9442_p0 = scmp.ne.s32.totalorder %s9339_s26, 0 }
  0x82   : > { %453 = vst [vmem:[#allocation2 + $0x21] sm:$0xff] %v7099_v18  ;;  %454 = vst [vmem:[#allocation2 + $0x31] sm:$0xff] %v7102_v19  ;;  %v1367_v53 = vld [vmem:[#allocation7 + $0x90] sm:$0xff]  ;;  %v7192_v55 = vld [vmem:[%s7042_s24 + $0xb8] sm:$0xff]  ;;  %s6802_s21 = smov [#allocation10]  }
  0x83   : > { %455 = vst [vmem:[#allocation2 + $0x39] sm:$0xff] %v7107_v20  ;;  %456 = vst [vmem:[#allocation2 + $0x49] sm:$0xff] %v7110_v21  ;;  %v7196_v56 = vld [vmem:[%s7042_s24 + $0xc0] sm:$0xff]  ;;  %v5706_v57 = vpack.c.bf16 %v1368_v54, %v1367_v53  ;;  %v1370_v59 = vld [vmem:[#allocation7 + $0xa8] sm:$0xff]  ;;  %p6725_p2 = pnand %p6724_p11, %p9442_p0  ;;  %s6727_s14 = sshll.u32 %s6802_s21, 4  ;;  %s6728_s14 = int_to_ptr.vmem [resolvable:$false] %s6727_s14 }
  0x84   : > { %457 = vst [vmem:[#allocation2 + $0x51] sm:$0xff] %v7115_v23  ;;  %458 = vst [vmem:[#allocation2 + $0x61] sm:$0xff] %v7120_v26  ;;  %5695 = vmatpush1.bf16.msra.mxu0 %v5694_v31  ;;  %v1369_v58 = vld [vmem:[#allocation7 + $0xa0] sm:$0xff]  ;;  %v7201_v60 = vld [vmem:[%s7042_s24 + $0xc8] sm:$0xff]  ;;  %s6729_s29 = scalar_lea.vmem %s6728_s14, 8192  ;;  %p6730_p7 = scmp.lt.s32.totalorder %s9203_s18, %s6728_s14 }
  0x85   : > { %459 = vst [vmem:[#allocation2 + $0x69] sm:$0xff] %v7124_v27  ;;  %460 = vst [vmem:[#allocation2 + $0x79] sm:$0xff] %v7127_v28  ;;  %5696 = vmatprep.subr.bf16.mxu0 %v9291_v0  ;;  %v5709_v61 = vpack.c.bf16 %v1370_v59, %v1369_v58  ;;  %v1371_v62 = vld [vmem:[#allocation7 + $0xb0] sm:$0xff]  ;;  %v1372_v63 = vld [vmem:[#allocation7 + $0xb8] sm:$0xff]  ;;  %p6726_p3 = pneg %p6725_p2  ;;  %p6731_p9 = scmp.lt.s32.totalorder %s6729_s29, %s6723_s19 }
  0x86   : > { %461 = vst [vmem:[#allocation2 + $0x81] sm:$0xff] %v7132_v29  ;;  %462 = vst [vmem:[#allocation2 + $0x91] sm:$0xff] %v7135_v30  ;;  %v7206_v2 = vld [vmem:[%s7042_s24 + $0xd0] sm:$0xff]  ;;  %v5712_v3 = vpack.c.bf16 %v1372_v63, %v1371_v62  ;;  %v1373_v4 = vld [vmem:[#allocation7 + $0xc0] sm:$0xff] }
  0x87   : > { %463 = vst [vmem:[#allocation2 + $0x99] sm:$0xff] %v7140_v32  ;;  %464 = vst [vmem:[#allocation2 + $0xa9] sm:$0xff] %v7145_v35  ;;  %v1374_v5 = vld [vmem:[#allocation7 + $0xc8] sm:$0xff]  ;;  %v7211_v6 = vld [vmem:[%s7042_s24 + $0xd8] sm:$0xff]  ;;  %p6732_p12 = por %p6731_p9, %p6730_p7 }
  0x88   : > { %465 = vst [vmem:[#allocation2 + $0xb1] sm:$0xff] %v7149_v36  ;;  %466 = vst [vmem:[#allocation2 + $0xc1] sm:$0xff] %v7153_v38  ;;  %5698 = vmatpush1.bf16.msra.mxu0 %v5697_v37  ;;  %v5715_v7 = vpack.c.bf16 %v1374_v5, %v1373_v4  ;;  %v1375_v8 = vld [vmem:[#allocation7 + $0xd0] sm:$0xff]  ;;  %v1376_v9 = vld [vmem:[#allocation7 + $0xd8] sm:$0xff] }
  0x89   : > { %467 = vst [vmem:[#allocation2 + $0xc9] sm:$0xff] %v7158_v41  ;;  %468 = vst [vmem:[#allocation2 + $0xd9] sm:$0xff] %v7162_v42  ;;  %5699 = vmatprep.subr.bf16.mxu0 %v9291_v0  ;;  %v7216_v10 = vld [vmem:[%s7042_s24 + $0xe0] sm:$0xff]  ;;  %v5718_v11 = vpack.c.bf16 %v1376_v9, %v1375_v8  ;;  %v1378_v13 = vld [vmem:[#allocation7 + $0xe8] sm:$0xff]  ;;  %p6733_p1 = pnand %p6732_p12, %p6726_p3 }
  0x8a   : > { %469 = vst [vmem:[#allocation2 + $0xe1] sm:$0xff] %v7166_v44  ;;  %470 = vst [vmem:[#allocation2 + $0xf1] sm:$0xff] %v7171_v47  ;;  %v1377_v12 = vld [vmem:[#allocation7 + $0xe0] sm:$0xff]  ;;  %v7221_v14 = vld [vmem:[%s7042_s24 + $0xe8] sm:$0xff] }
  0x8b   : > { %471 = vst [vmem:[#allocation2 + $0xf9] sm:$0xff] %v7175_v48  ;;  %472 = vst [vmem:[#allocation2 + $0x109] sm:$0xff] %v7178_v49  ;;  %v5721_v15 = vpack.c.bf16 %v1378_v13, %v1377_v12  ;;  %v1379_v16 = vld [vmem:[#allocation7 + $0xf0] sm:$0xff]  ;;  %v1380_v22 = vld [vmem:[#allocation7 + $0xf8] sm:$0xff] }
  0x8c   : > { %5701 = vmatpush1.bf16.msra.mxu0 %v5700_v43  ;;  %473 = vst [vmem:[#allocation2 + $0x111] sm:$0xff] %v7183_v51  ;;  %474 = vst [vmem:[#allocation2 + $0x121] sm:$0xff] %v7186_v52  ;;  %v5724_v24 = vpack.c.bf16 %v1380_v22, %v1379_v16  ;;  %v1381_v25 = vld [vmem:[#allocation7 + $0x100] sm:$0xff]  ;;  %v1382_v31 = vld [vmem:[#allocation7 + $0x108] sm:$0xff] }
  0x8d   : > { %5702 = vmatprep.subr.bf16.mxu0 %v9291_v0  ;;  %475 = vst [vmem:[#allocation2 + $0x129] sm:$0xff] %v7192_v55  ;;  %476 = vst [vmem:[#allocation2 + $0x139] sm:$0xff] %v7196_v56  ;;  %v5727_v33 = vpack.c.bf16 %v1382_v31, %v1381_v25  ;;  %v549_v34 = vld [vmem:[#allocation2 + $0x9] sm:$0xff]  ;;  %v1383_v37 = vld [vmem:[#allocation7 + $0x110] sm:$0xff] }
  0x8e   : > { %477 = vst [vmem:[#allocation2 + $0x141] sm:$0xff] %v7201_v60  ;;  %478 = vst [vmem:[#allocation2 + $0x151] sm:$0xff] %v7206_v2  ;;  %v1384_v39 = vld [vmem:[#allocation7 + $0x118] sm:$0xff]  ;;  %v1385_v43 = vld [vmem:[#allocation7 + $0x120] sm:$0xff] }
  0x8f   : > { %479 = vst [vmem:[#allocation2 + $0x159] sm:$0xff] %v7211_v6  ;;  %480 = vst [vmem:[#allocation2 + $0x169] sm:$0xff] %v7216_v10  ;;  %v5730_v40 = vpack.c.bf16 %v1384_v39, %v1383_v37  ;;  %v1386_v45 = vld [vmem:[#allocation7 + $0x128] sm:$0xff]  ;;  %v1387_v53 = vld [vmem:[#allocation7 + $0x130] sm:$0xff] }
  0x90   : > { %5704 = vmatpush1.bf16.msra.mxu0 %v5703_v50  ;;  %481 = vst [vmem:[#allocation2 + $0x171] sm:$0xff] %v7221_v14  ;;  %v7231_v46 = vld [vmem:[#allocation2 + $0x18] sm:$0xff]  ;;  %v5733_v50 = vpack.c.bf16 %v1386_v45, %v1385_v43  ;;  %v1388_v54 = vld [vmem:[#allocation7 + $0x138] sm:$0xff]  ;;  %v7241_v59 = vld [vmem:[#allocation2 + $0x30] sm:$0xff] }
  0x91   : > { %5705 = vmatprep.subr.bf16.mxu0 %v9291_v0  ;;  %v5736_v58 = vpack.c.bf16 %v1388_v54, %v1387_v53  ;;  %v7243_v62 = vld [vmem:[#allocation2 + $0x32] sm:$0xff]  ;;  %v1392_v63 = vld [vmem:[#allocation7 + $0x158] sm:$0xff]  ;;  %v1395_v9 = vld [vmem:[#allocation7 + $0x170] sm:$0xff] }
  0x92   : > { %5550 = vmatprep.mubr.f32.mxu1 %v7243_v62  ;;  %v1393_v4 = vld [vmem:[#allocation7 + $0x160] sm:$0xff]  ;;  %v1394_v5 = vld [vmem:[#allocation7 + $0x168] sm:$0xff]  ;;  %v1399_v22 = vld [vmem:[#allocation7 + $0x190] sm:$0xff] }
  0x93   : > { %v5745_v8 = vpack.c.bf16 %v1394_v5, %v1393_v4  ;;  %v1397_v13 = vld [vmem:[#allocation7 + $0x180] sm:$0xff]  ;;  %v1403_v37 = vld [vmem:[#allocation7 + $0x1b0] sm:$0xff]  ;;  %v7289_v54 = vld [vmem:[#allocation2 + $0x98] sm:$0xff] }
  0x94   : > { %5707 = vmatpush1.bf16.msra.mxu0 %v5706_v57  ;;  %v7236_v57 = vld [vmem:[#allocation2 + $0x20] sm:$0xff]  ;;  %v1401_v31 = vld [vmem:[#allocation7 + $0x1a0] sm:$0xff]  ;;  %v7313_v4 = vld [vmem:[#allocation2 + $0xd8] sm:$0xff] }
  0x95   : > { %5708 = vmatprep.subr.bf16.mxu0 %v9291_v0  ;;  %v7279_v39 = vld [vmem:[#allocation2 + $0x80] sm:$0xff]  ;;  %v1405_v43 = vld [vmem:[#allocation7 + $0x1c0] sm:$0xff] }
  0x96   : > { %v7284_v45 = vld [vmem:[#allocation2 + $0x90] sm:$0xff]  ;;  %v1407_v53 = vld [vmem:[#allocation7 + $0x1d0] sm:$0xff] }
  0x97   : > { %v7321_v5 = vld [vmem:[#allocation2 + $0xf0] sm:$0xff] }
  0x98   : > { %5710 = vmatpush1.bf16.msra.mxu0 %v5709_v61 }
  0x99   : > { %5711 = vmatprep.subr.bf16.mxu0 %v9291_v0 }
  0x9c   : > { %5713 = vmatpush1.bf16.msra.mxu0 %v5712_v3  ;;  %v7249_v3 = vld [vmem:[#allocation2 + $0x38] sm:$0xff] }
  0x9d   : > { %5714 = vmatprep.subr.bf16.mxu0 %v9291_v0 }
  0xa0   : > { %5716 = vmatpush1.bf16.msra.mxu0 %v5715_v7  ;;  %v7254_v7 = vld [vmem:[#allocation2 + $0x48] sm:$0xff] }
  0xa1   : > { %5717 = vmatprep.subr.bf16.mxu0 %v9291_v0 }
  0xa4   : > { %5719 = vmatpush1.bf16.msra.mxu0 %v5718_v11  ;;  %v7259_v11 = vld [vmem:[#allocation2 + $0x50] sm:$0xff] }
  0xa5   : > { %5720 = vmatprep.subr.bf16.mxu0 %v9291_v0 }
  0xa8   : > { %5722 = vmatpush1.bf16.msra.mxu0 %v5721_v15  ;;  %v7264_v15 = vld [vmem:[#allocation2 + $0x60] sm:$0xff] }
  0xa9   : > { %5723 = vmatprep.subr.bf16.mxu0 %v9291_v0 }
  0xac   : > { %5725 = vmatpush1.bf16.msra.mxu0 %v5724_v24  ;;  %v7269_v24 = vld [vmem:[#allocation2 + $0x68] sm:$0xff] }
  0xad   : > { %5726 = vmatprep.subr.bf16.mxu0 %v9291_v0 }
  0xaf   : > { %1558 = vmatmul.mubr.f32.vlgmr.msra.gmra.mrb[0].mxu0 %v6801_v1 }
  0xb0   : > { %5728 = vmatpush1.bf16.msra.mxu0 %v5727_v33  ;;  %1562 = vmatprep.mubr.f32.mxu0 %v549_v34  ;;  %v7274_v33 = vld [vmem:[#allocation2 + $0x78] sm:$0xff] }
  0xb1   : > { %5729 = vmatprep.subr.bf16.mxu0 %v9291_v0 }
  0xb3   : > { %1563 = vmatmul.mubr.f32.gmra.mrb[2].mxu0 %v6801_v1  ;;  %v1389_v1 = vld [vmem:[#allocation7 + $0x140] sm:$0xff] }
  0xb4   : > { %1567 = vmatprep.mubr.f32.mxu0 %v7095_v17  ;;  %5731 = vmatpush1.bf16.msra.mxu0 %v5730_v40  ;;  %v1390_v17 = vld [vmem:[#allocation7 + $0x148] sm:$0xff] }
  0xb5   : > { %5732 = vmatprep.subr.bf16.mxu0 %v9291_v0  ;;  %v5739_v61 = vpack.c.bf16 %v1390_v17, %v1389_v1  ;;  %v1409_v1 = vld [vmem:[#allocation7 + $0x1e0] sm:$0xff]  ;;  %v7294_v17 = vld [vmem:[#allocation2 + $0xa8] sm:$0xff] }
  0xb7   : > { %1568 = vmatmul.mubr.f32.gmra.mrb[4].mxu0 %v7231_v46 }
  0xb8   : > { %1572 = vmatprep.mubr.f32.mxu0 %v7099_v18  ;;  %5734 = vmatpush1.bf16.msra.mxu0 %v5733_v50  ;;  %v1391_v18 = vld [vmem:[#allocation7 + $0x150] sm:$0xff] }
  0xb9   : > { %5735 = vmatprep.subr.bf16.mxu0 %v9291_v0 }
  0xbb   : > { %1573 = vmatmul.mubr.f32.gmra.mrb[6].mxu0 %v7236_v57 }
  0xbc   : > { %1577 = vmatprep.mubr.f32.mxu0 %v7102_v19  ;;  %5737 = vmatpush1.bf16.msra.mxu0 %v5736_v58  ;;  %v5742_v19 = vpack.c.bf16 %v1392_v63, %v1391_v18  ;;  %v1411_v18 = vld [vmem:[#allocation7 + $0x1f0] sm:$0xff]  ;;  %v7299_v63 = vld [vmem:[#allocation2 + $0xb0] sm:$0xff] }
  0xbd   : > { %5738 = vmatprep.subr.bf16.mxu0 %v9291_v0 }
  0xbf   : > { %1578 = vmatmul.mubr.f32.gmra.mrb[8].mxu0 %v7241_v59 }
  0xc0   : > { %1582 = vmatprep.mubr.f32.mxu0 %v7107_v20  ;;  %5740 = vmatpush1.bf16.msra.mxu0 %v5739_v61  ;;  %v1396_v20 = vld [vmem:[#allocation7 + $0x178] sm:$0xff] }
  0xc1   : > { %5741 = vmatprep.subr.bf16.mxu0 %v9291_v0  ;;  %v5748_v12 = vpack.c.bf16 %v1396_v20, %v1395_v9  ;;  %v1413_v9 = vld [vmem:[#allocation7 + $0x200] sm:$0xff]  ;;  %v612_v20 = vld [vmem:[#allocation2 + $0x2] sm:$0xff] }
  0xc3   : > { %1583 = vmatmul.mubr.f32.gmra.mrb[10].mxu0 %v7249_v3 }
  0xc4   : > { %1587 = vmatprep.mubr.f32.mxu0 %v7110_v21  ;;  %5743 = vmatpush1.bf16.msra.mxu0 %v5742_v19  ;;  %v1398_v21 = vld [vmem:[#allocation7 + $0x188] sm:$0xff] }
  0xc5   : > { %5744 = vmatprep.subr.bf16.mxu0 %v9291_v0  ;;  %v5751_v16 = vpack.c.bf16 %v1398_v21, %v1397_v13  ;;  %v1415_v13 = vld [vmem:[#allocation7 + $0x210] sm:$0xff]  ;;  %v1416_v21 = vld [vmem:[#allocation7 + $0x218] sm:$0xff] }
  0xc7   : > { %1588 = vmatmul.mubr.f32.gmra.mrb[12].mxu0 %v7254_v7 }
  0xc8   : > { %1592 = vmatprep.mubr.f32.mxu0 %v7115_v23  ;;  %5746 = vmatpush1.bf16.msra.mxu0 %v5745_v8  ;;  %v1400_v23 = vld [vmem:[#allocation7 + $0x198] sm:$0xff] }
  0xc9   : > { %5747 = vmatprep.subr.bf16.mxu0 %v9291_v0  ;;  %v5754_v25 = vpack.c.bf16 %v1400_v23, %v1399_v22  ;;  %v7364_v8 = vld [vmem:[%s7042_s24 + $0xf8] sm:$0xff]  ;;  %v1418_v22 = vld [vmem:[#allocation7 + $0x228] sm:$0xff] }
  0xca   : > { %483 = vst [vmem:[#allocation2 + $0x189] sm:$0xff] %v7364_v8  ;;  %v7380_v23 = vld [vmem:[#allocation2 + $0x1a] sm:$0xff] }
  0xcb   : > { %1593 = vmatmul.mubr.f32.gmra.mrb[14].mxu0 %v7259_v11 }
  0xcc   : > { %1597 = vmatprep.mubr.f32.mxu0 %v7120_v26  ;;  %5749 = vmatpush1.bf16.msra.mxu0 %v5748_v12  ;;  %v1402_v26 = vld [vmem:[#allocation7 + $0x1a8] sm:$0xff] }
  0xcd   : > { %5750 = vmatprep.subr.bf16.mxu0 %v9291_v0  ;;  %v5757_v34 = vpack.c.bf16 %v1402_v26, %v1401_v31  ;;  %v1420_v31 = vld [vmem:[#allocation7 + $0x238] sm:$0xff] }
  0xcf   : > { %1598 = vmatmul.mubr.f32.gmra.mrb[16].mxu0 %v7264_v15 }
  0xd0   : > { %1602 = vmatprep.mubr.f32.mxu0 %v7124_v27  ;;  %5752 = vmatpush1.bf16.msra.mxu0 %v5751_v16  ;;  %v1404_v27 = vld [vmem:[#allocation7 + $0x1b8] sm:$0xff]  ;;  %v5778_v16 = vpack.c.bf16 %v1416_v21, %v1415_v13  ;;  %v1435_v13 = vld [vmem:[#allocation7 + $0x2b0] sm:$0xff] }
  0xd1   : > { %5753 = vmatprep.subr.bf16.mxu0 %v9291_v0  ;;  %v5760_v40 = vpack.c.bf16 %v1404_v27, %v1403_v37  ;;  %v1423_v27 = vld [vmem:[#allocation7 + $0x250] sm:$0xff] }
  0xd2   : > { %v7423_v21 = vld [vmem:[#allocation2 + $0x82] sm:$0xff] }
  0xd3   : > { %1603 = vmatmul.mubr.f32.gmra.mrb[18].mxu0 %v7269_v24 }
  0xd4   : > { %1607 = vmatprep.mubr.f32.mxu0 %v7127_v28  ;;  %5755 = vmatpush1.bf16.msra.mxu0 %v5754_v25  ;;  %v1406_v28 = vld [vmem:[#allocation7 + $0x1c8] sm:$0xff]  ;;  %v1419_v25 = vld [vmem:[#allocation7 + $0x230] sm:$0xff] }
  0xd5   : > { %5756 = vmatprep.subr.bf16.mxu0 %v9291_v0  ;;  %v5763_v50 = vpack.c.bf16 %v1406_v28, %v1405_v43  ;;  %v5784_v26 = vpack.c.bf16 %v1420_v31, %v1419_v25  ;;  %v1425_v28 = vld [vmem:[#allocation7 + $0x260] sm:$0xff]  ;;  %v7433_v25 = vld [vmem:[#allocation2 + $0x9a] sm:$0xff] }
  0xd7   : > { %1608 = vmatmul.mubr.f32.gmra.mrb[20].mxu0 %v7274_v33 }
  0xd8   : > { %1612 = vmatprep.mubr.f32.mxu0 %v7132_v29  ;;  %5758 = vmatpush1.bf16.msra.mxu0 %v5757_v34  ;;  %v1408_v29 = vld [vmem:[#allocation7 + $0x1d8] sm:$0xff]  ;;  %v1421_v34 = vld [vmem:[#allocation7 + $0x240] sm:$0xff] }
  0xd9   : > { %5759 = vmatprep.subr.bf16.mxu0 %v9291_v0  ;;  %v5766_v58 = vpack.c.bf16 %v1408_v29, %v1407_v53  ;;  %v1427_v29 = vld [vmem:[#allocation7 + $0x270] sm:$0xff] }
  0xdb   : > { %1613 = vmatmul.mubr.f32.gmra.mrb[22].mxu0 %v7279_v39 }
  0xdc   : > { %1617 = vmatprep.mubr.f32.mxu0 %v7135_v30  ;;  %5761 = vmatpush1.bf16.msra.mxu0 %v5760_v40  ;;  %v1410_v30 = vld [vmem:[#allocation7 + $0x1e8] sm:$0xff]  ;;  %v1424_v40 = vld [vmem:[#allocation7 + $0x258] sm:$0xff] }
  0xdd   : > { %5762 = vmatprep.subr.bf16.mxu0 %v9291_v0  ;;  %v5769_v61 = vpack.c.bf16 %v1410_v30, %v1409_v1  ;;  %v5790_v43 = vpack.c.bf16 %v1424_v40, %v1423_v27  ;;  %v1429_v30 = vld [vmem:[#allocation7 + $0x280] sm:$0xff] }
  0xde   : > { %v7443_v27 = vld [vmem:[#allocation2 + $0xb2] sm:$0xff] }
  0xdf   : > { %1618 = vmatmul.mubr.f32.gmra.mrb[24].mxu0 %v7284_v45 }
  0xe0   : > { %1622 = vmatprep.mubr.f32.mxu0 %v7140_v32  ;;  %5764 = vmatpush1.bf16.msra.mxu0 %v5763_v50  ;;  %v1412_v32 = vld [vmem:[#allocation7 + $0x1f8] sm:$0xff]  ;;  %v1426_v50 = vld [vmem:[#allocation7 + $0x268] sm:$0xff] }
  0xe1   : > { %5765 = vmatprep.subr.bf16.mxu0 %v9291_v0  ;;  %v5772_v19 = vpack.c.bf16 %v1412_v32, %v1411_v18  ;;  %v5793_v53 = vpack.c.bf16 %v1426_v50, %v1425_v28  ;;  %v1431_v32 = vld [vmem:[#allocation7 + $0x290] sm:$0xff]  ;;  %v7465_v28 = vld [vmem:[#allocation2 + $0xf2] sm:$0xff] }
  0xe2   : > { %v1478_v50 = vld [vmem:[#allocation7 + $0x408] sm:$0xff] }
  0xe3   : > { %1623 = vmatmul.mubr.f32.gmra.mrb[26].mxu0 %v7289_v54 }
  0xe4   : > { %1627 = vmatprep.mubr.f32.mxu0 %v7145_v35  ;;  %5767 = vmatpush1.bf16.msra.mxu0 %v5766_v58  ;;  %v7304_v35 = vld [vmem:[#allocation2 + $0xc0] sm:$0xff]  ;;  %v7403_v58 = vld [vmem:[#allocation2 + $0x52] sm:$0xff] }
  0xe5   : > { %5768 = vmatprep.subr.bf16.mxu0 %v9291_v0 }
  0xe7   : > { %1628 = vmatmul.mubr.f32.gmra.mrb[28].mxu0 %v7294_v17 }
  0xe8   : > { %1632 = vmatprep.mubr.f32.mxu0 %v7149_v36  ;;  %5770 = vmatpush1.bf16.msra.mxu0 %v5769_v61  ;;  %v7309_v36 = vld [vmem:[#allocation2 + $0xc8] sm:$0xff] }
  0xe9   : > { %5771 = vmatprep.subr.bf16.mxu0 %v9291_v0  ;;  %v7408_v61 = vld [vmem:[#allocation2 + $0x62] sm:$0xff] }
  0xeb   : > { %1633 = vmatmul.mubr.f32.gmra.mrb[30].mxu0 %v7299_v63 }
  0xec   : > { %1637 = vmatprep.mubr.f32.mxu0 %v7153_v38  ;;  %5773 = vmatpush1.bf16.msra.mxu0 %v5772_v19  ;;  %v7317_v38 = vld [vmem:[#allocation2 + $0xe0] sm:$0xff]  ;;  %v7413_v19 = vld [vmem:[#allocation2 + $0x6a] sm:$0xff] }
  0xed   : > { %5774 = vmatprep.subr.bf16.mxu0 %v9291_v0 }
  0xef   : > { %1638 = vmatmul.mubr.f32.gmra.mrb[32].mxu0 %v7304_v35 }
  0xf0   : > { %1642 = vmatprep.mubr.f32.mxu0 %v7158_v41  ;;  %v7325_v41 = vld [vmem:[#allocation2 + $0xf8] sm:$0xff] }
  0xf3   : > { %1643 = vmatmul.mubr.f32.gmra.mrb[34].mxu0 %v7309_v36 }
  0xf4   : > { %1647 = vmatprep.mubr.f32.mxu0 %v7162_v42  ;;  %v7329_v42 = vld [vmem:[#allocation2 + $0x108] sm:$0xff] }
  0xf7   : > { %1648 = vmatmul.mubr.f32.gmra.mrb[36].mxu0 %v7313_v4 }
  0xf8   : > { %1652 = vmatprep.mubr.f32.mxu0 %v7166_v44  ;;  %v7333_v44 = vld [vmem:[#allocation2 + $0x110] sm:$0xff] }
  0xfb   : > { %1653 = vmatmul.mubr.f32.gmra.mrb[38].mxu0 %v7317_v38 }
  0xfc   : > { %1657 = vmatprep.mubr.f32.mxu0 %v7171_v47  ;;  %v7337_v47 = vld [vmem:[#allocation2 + $0x120] sm:$0xff] }
  0xff   : > { %1658 = vmatmul.mubr.f32.gmra.mrb[40].mxu0 %v7321_v5 }
 0x100   : > { %1662 = vmatprep.mubr.f32.mxu0 %v7175_v48  ;;  %v7341_v48 = vld [vmem:[#allocation2 + $0x128] sm:$0xff] }
 0x103   : > { %1663 = vmatmul.mubr.f32.gmra.mrb[42].mxu0 %v7325_v41 }
 0x104   : > { %1667 = vmatprep.mubr.f32.mxu0 %v7178_v49  ;;  %v7345_v49 = vld [vmem:[#allocation2 + $0x138] sm:$0xff] }
 0x107   : > { %1668 = vmatmul.mubr.f32.gmra.mrb[44].mxu0 %v7329_v42 }
 0x108   : > { %1672 = vmatprep.mubr.f32.mxu0 %v7183_v51  ;;  %v7349_v51 = vld [vmem:[#allocation2 + $0x140] sm:$0xff] }
 0x10b   : > { %1673 = vmatmul.mubr.f32.gmra.mrb[46].mxu0 %v7333_v44 }
 0x10c   : > { %1677 = vmatprep.mubr.f32.mxu0 %v7186_v52  ;;  %v7353_v52 = vld [vmem:[#allocation2 + $0x150] sm:$0xff] }
 0x10f   : > { %1678 = vmatmul.mubr.f32.gmra.mrb[48].mxu0 %v7337_v47 }
 0x110   : > { %1682 = vmatprep.mubr.f32.mxu0 %v7192_v55  ;;  %v7356_v55 = vld [vmem:[%s7042_s24 + $0xf0] sm:$0xff] }
 0x111   : > { %482 = vst [vmem:[#allocation2 + $0x181] sm:$0xff] %v7356_v55 }
 0x113   : > { %1683 = vmatmul.mubr.f32.gmra.mrb[50].mxu0 %v7341_v48 }
 0x114   : > { %1687 = vmatprep.mubr.f32.mxu0 %v7196_v56  ;;  %v7361_v56 = vld [vmem:[#allocation2 + $0x158] sm:$0xff] }
 0x117   : > { %1688 = vmatmul.mubr.f32.gmra.mrb[52].mxu0 %v7345_v49 }
 0x118   : > { %1692 = vmatprep.mubr.f32.mxu0 %v7201_v60  ;;  %v7369_v60 = vld [vmem:[#allocation2 + $0x168] sm:$0xff] }
 0x11b   : > { %1693 = vmatmul.mubr.f32.gmra.mrb[54].mxu0 %v7349_v51 }
 0x11c   : > { %1697 = vmatprep.mubr.f32.mxu0 %v7206_v2  ;;  %v7373_v2 = vld [vmem:[#allocation2 + $0x170] sm:$0xff] }
 0x11f   : > { %1698 = vmatmul.mubr.f32.gmra.mrb[56].mxu0 %v7353_v52 }
 0x120   : > { %1702 = vmatprep.mubr.f32.mxu0 %v7211_v6  ;;  %v1414_v6 = vld [vmem:[#allocation7 + $0x208] sm:$0xff] }
 0x121   : > { %v5775_v12 = vpack.c.bf16 %v1414_v6, %v1413_v9  ;;  %v1433_v6 = vld [vmem:[#allocation7 + $0x2a0] sm:$0xff] }
 0x123   : > { %1703 = vmatmul.mubr.f32.gmra.mrb[58].mxu0 %v7361_v56 }
 0x124   : > { %1707 = vmatprep.mubr.f32.mxu0 %v7216_v10  ;;  %v613_v10 = vld [vmem:[#allocation2 + $0xa] sm:$0xff] }
 0x127   : > { %1708 = vmatmul.mubr.f32.gmra.mrb[60].mxu0 %v7369_v60 }
 0x128   : > { %1712 = vmatprep.mubr.f32.mxu0 %v7221_v14  ;;  %v1417_v14 = vld [vmem:[#allocation7 + $0x220] sm:$0xff] }
 0x12b   : > { %1713 = vmatmul.mubr.f32.gmra.mrb[62].mxu0 %v7373_v2 }
 0x12c   : > { %1782 = vmatprep.mubr.f32.mxu0 %v7231_v46  ;;  %v5781_v46 = vpack.c.bf16 %v1418_v22, %v1417_v14  ;;  %v7428_v14 = vld [vmem:[#allocation2 + $0x92] sm:$0xff] }
 0x12f   : > { %1783 = vmatmul.mubr.f32.vlgmr.msra.gmra.mrb[0].mxu0 %v612_v20  ;;  %v7418_v20 = vld [vmem:[#allocation2 + $0x7a] sm:$0xff] }
 0x130   : > { %5776 = vmatpush1.bf16.msra.mxu0 %v5775_v12  ;;  %1787 = vmatprep.mubr.f32.mxu0 %v7236_v57  ;;  %v7385_v57 = vld [vmem:[#allocation2 + $0x22] sm:$0xff] }
 0x131   : > { %5777 = vmatprep.subr.bf16.mxu0 %v9291_v0 }
 0x133   : > { %1788 = vmatmul.mubr.f32.gmra.mrb[2].mxu0 %v613_v10 }
 0x134   : > { %1792 = vmatprep.mubr.f32.mxu0 %v7241_v59  ;;  %5779 = vmatpush1.bf16.msra.mxu0 %v5778_v16  ;;  %v1422_v59 = vld [vmem:[#allocation7 + $0x248] sm:$0xff]  ;;  %v1437_v16 = vld [vmem:[#allocation7 + $0x2c0] sm:$0xff] }
 0x135   : > { %5780 = vmatprep.subr.bf16.mxu0 %v9291_v0  ;;  %v5787_v37 = vpack.c.bf16 %v1422_v59, %v1421_v34  ;;  %v7438_v34 = vld [vmem:[#allocation2 + $0xaa] sm:$0xff] }
 0x137   : > { %1793 = vmatmul.mubr.f32.gmra.mrb[4].mxu0 %v7380_v23 }
 0x138   : > { %1797 = vmatprep.mubr.f32.mxu0 %v7249_v3  ;;  %5782 = vmatpush1.bf16.msra.mxu0 %v5781_v46  ;;  %v7393_v3 = vld [vmem:[#allocation2 + $0x3a] sm:$0xff] }
 0x139   : > { %5783 = vmatprep.subr.bf16.mxu0 %v9291_v0  ;;  %v1439_v46 = vld [vmem:[#allocation7 + $0x2d0] sm:$0xff] }
 0x13b   : > { %1798 = vmatmul.mubr.f32.gmra.mrb[6].mxu0 %v7385_v57 }
 0x13c   : > { %1802 = vmatprep.mubr.f32.mxu0 %v7254_v7  ;;  %5785 = vmatpush1.bf16.msra.mxu0 %v5784_v26  ;;  %v7398_v7 = vld [vmem:[#allocation2 + $0x4a] sm:$0xff] }
 0x13d   : > { %5786 = vmatprep.subr.bf16.mxu0 %v9291_v0  ;;  %v1441_v26 = vld [vmem:[#allocation7 + $0x2e0] sm:$0xff] }
 0x13f   : > { %1803 = vmatmul.mubr.f32.gmra.mrb[8].mxu0 %v7243_v62 }
 0x140   : > { %1807 = vmatprep.mubr.f32.mxu0 %v7259_v11  ;;  %5788 = vmatpush1.bf16.msra.mxu0 %v5787_v37  ;;  %v1428_v11 = vld [vmem:[#allocation7 + $0x278] sm:$0xff]  ;;  %v1443_v37 = vld [vmem:[#allocation7 + $0x2f0] sm:$0xff] }
 0x141   : > { %5789 = vmatprep.subr.bf16.mxu0 %v9291_v0  ;;  %v5796_v1 = vpack.c.bf16 %v1428_v11, %v1427_v29  ;;  %v7485_v29 = vld [vmem:[#allocation2 + $0x12a] sm:$0xff] }
 0x143   : > { %1808 = vmatmul.mubr.f32.gmra.mrb[10].mxu0 %v7393_v3 }
 0x144   : > { %1812 = vmatprep.mubr.f32.mxu0 %v7264_v15  ;;  %5791 = vmatpush1.bf16.msra.mxu0 %v5790_v43  ;;  %v1430_v15 = vld [vmem:[#allocation7 + $0x288] sm:$0xff] }
 0x145   : > { %5792 = vmatprep.subr.bf16.mxu0 %v9291_v0  ;;  %v5799_v18 = vpack.c.bf16 %v1430_v15, %v1429_v30  ;;  %v7457_v43 = vld [vmem:[#allocation2 + $0xda] sm:$0xff] }
 0x146   : > { %v1482_v30 = vld [vmem:[#allocation7 + $0x428] sm:$0xff] }
 0x147   : > { %1813 = vmatmul.mubr.f32.gmra.mrb[12].mxu0 %v7398_v7 }
 0x148   : > { %1817 = vmatprep.mubr.f32.mxu0 %v7269_v24  ;;  %5794 = vmatpush1.bf16.msra.mxu0 %v5793_v53  ;;  %v1432_v24 = vld [vmem:[#allocation7 + $0x298] sm:$0xff] }
 0x149   : > { %5795 = vmatprep.subr.bf16.mxu0 %v9291_v0  ;;  %v5802_v9 = vpack.c.bf16 %v1432_v24, %v1431_v32  ;;  %v1484_v32 = vld [vmem:[#allocation7 + $0x438] sm:$0xff] }
 0x14b   : > { %1818 = vmatmul.mubr.f32.gmra.mrb[14].mxu0 %v7403_v58 }
 0x14c   : > { %1822 = vmatprep.mubr.f32.mxu0 %v7274_v33  ;;  %5797 = vmatpush1.bf16.msra.mxu0 %v5796_v1  ;;  %v1434_v33 = vld [vmem:[#allocation7 + $0x2a8] sm:$0xff]  ;;  %v1481_v1 = vld [vmem:[#allocation7 + $0x420] sm:$0xff] }
 0x14d   : > { %5798 = vmatprep.subr.bf16.mxu0 %v9291_v0  ;;  %v5805_v12 = vpack.c.bf16 %v1434_v33, %v1433_v6  ;;  %v5878_v15 = vpack.c.bf16 %v1482_v30, %v1481_v1  ;;  %v7497_v6 = vld [vmem:[#allocation2 + $0x152] sm:$0xff] }
 0x14e   : > { %v7532_v1 = vld [vmem:[#allocation2 + $0x31] sm:$0xff] }
 0x14f   : > { %1823 = vmatmul.mubr.f32.gmra.mrb[16].mxu0 %v7408_v61  ;;  %9348 = vst [vmem:[#allocation17_spill] sm:$0xff] %v7532_v1 }
 0x150   : > { %1827 = vmatprep.mubr.f32.mxu0 %v7279_v39  ;;  %5800 = vmatpush1.bf16.msra.mxu0 %v5799_v18  ;;  %v1436_v39 = vld [vmem:[#allocation7 + $0x2b8] sm:$0xff]  ;;  %v1483_v18 = vld [vmem:[#allocation7 + $0x430] sm:$0xff] }
 0x151   : > { %5801 = vmatprep.subr.bf16.mxu0 %v9291_v0  ;;  %v5808_v10 = vpack.c.bf16 %v1436_v39, %v1435_v13  ;;  %v5882_v24 = vpack.c.bf16 %v1484_v32, %v1483_v18  ;;  %v1488_v13 = vld [vmem:[#allocation7 + $0x458] sm:$0xff]  ;;  %v7503_v39 = vld [vmem:[#allocation2 + $0x180] sm:$0xff] }
 0x152   : > { %v7539_v18 = vld [vmem:[#allocation2 + $0x39] sm:$0xff] }
 0x153   : > { %1828 = vmatmul.mubr.f32.gmra.mrb[18].mxu0 %v7413_v19  ;;  %9349 = vst [vmem:[#allocation18_spill] sm:$0xff] %v7539_v18 }
 0x154   : > { %1832 = vmatprep.mubr.f32.mxu0 %v7284_v45  ;;  %5803 = vmatpush1.bf16.msra.mxu0 %v5802_v9  ;;  %v1438_v45 = vld [vmem:[#allocation7 + $0x2c8] sm:$0xff]  ;;  %v1485_v9 = vld [vmem:[#allocation7 + $0x440] sm:$0xff] }
 0x155   : > { %5804 = vmatprep.subr.bf16.mxu0 %v9291_v0  ;;  %v5811_v22 = vpack.c.bf16 %v1438_v45, %v1437_v16  ;;  %v1490_v16 = vld [vmem:[#allocation7 + $0x468] sm:$0xff]  ;;  %v7507_v45 = vld [vmem:[#allocation2 + $0x16a] sm:$0xff] }
 0x157   : > { %1833 = vmatmul.mubr.f32.gmra.mrb[20].mxu0 %v7418_v20 }
 0x158   : > { %1837 = vmatprep.mubr.f32.mxu0 %v7289_v54  ;;  %5806 = vmatpush1.bf16.msra.mxu0 %v5805_v12  ;;  %v1440_v54 = vld [vmem:[#allocation7 + $0x2d8] sm:$0xff]  ;;  %v7501_v12 = vld [vmem:[#allocation2 + $0x15a] sm:$0xff] }
 0x159   : > { %5807 = vmatprep.subr.bf16.mxu0 %v9291_v0  ;;  %v5814_v31 = vpack.c.bf16 %v1440_v54, %v1439_v46  ;;  %v7509_v46 = vld [vmem:[#allocation2 + $0x188] sm:$0xff]  ;;  %v1491_v54 = vld [vmem:[#allocation7 + $0x470] sm:$0xff] }
 0x15b   : > { %1838 = vmatmul.mubr.f32.gmra.mrb[22].mxu0 %v7423_v21 }
 0x15c   : > { %1842 = vmatprep.mubr.f32.mxu0 %v7294_v17  ;;  %5809 = vmatpush1.bf16.msra.mxu0 %v5808_v10  ;;  %v1442_v17 = vld [vmem:[#allocation7 + $0x2e8] sm:$0xff] }
 0x15d   : > { %5810 = vmatprep.subr.bf16.mxu0 %v9291_v0  ;;  %v5817_v59 = vpack.c.bf16 %v1442_v17, %v1441_v26  ;;  %v1445_v26 = vld [vmem:[#allocation7 + $0x300] sm:$0xff]  ;;  %v1446_v17 = vld [vmem:[#allocation7 + $0x308] sm:$0xff] }
 0x15f   : > { %1843 = vmatmul.mubr.f32.gmra.mrb[24].mxu0 %v7428_v14 }
 0x160   : > { %1847 = vmatprep.mubr.f32.mxu0 %v7299_v63  ;;  %5812 = vmatpush1.bf16.msra.mxu0 %v5811_v22  ;;  %v1444_v63 = vld [vmem:[#allocation7 + $0x2f8] sm:$0xff] }
 0x161   : > { %5813 = vmatprep.subr.bf16.mxu0 %v9291_v0  ;;  %v5820_v40 = vpack.c.bf16 %v1444_v63, %v1443_v37  ;;  %v5823_v37 = vpack.c.bf16 %v1446_v17, %v1445_v26  ;;  %v1447_v63 = vld [vmem:[#allocation7 + $0x310] sm:$0xff]  ;;  %v1464_v26 = vld [vmem:[#allocation7 + $0x398] sm:$0xff] }
 0x162   : > { %v7574_v17 = vld [vmem:[#allocation2 + $0x79] sm:$0xff] }
 0x163   : > { %1848 = vmatmul.mubr.f32.gmra.mrb[26].mxu0 %v7433_v25  ;;  %9354 = vst [vmem:[#allocation23_spill] sm:$0xff] %v7574_v17 }
 0x164   : > { %1852 = vmatprep.mubr.f32.mxu0 %v7304_v35  ;;  %5815 = vmatpush1.bf16.msra.mxu0 %v5814_v31  ;;  %v7448_v35 = vld [vmem:[#allocation2 + $0xc2] sm:$0xff] }
 0x165   : > { %5816 = vmatprep.subr.bf16.mxu0 %v9291_v0  ;;  %v1492_v31 = vld [vmem:[#allocation7 + $0x478] sm:$0xff] }
 0x167   : > { %1853 = vmatmul.mubr.f32.gmra.mrb[28].mxu0 %v7438_v34 }
 0x168   : > { %1857 = vmatprep.mubr.f32.mxu0 %v7309_v36  ;;  %5818 = vmatpush1.bf16.msra.mxu0 %v5817_v59  ;;  %v7453_v36 = vld [vmem:[#allocation2 + $0xca] sm:$0xff]  ;;  %v5898_v59 = vpack.c.bf16 %v1492_v31, %v1491_v54 }
 0x169   : > { %5819 = vmatprep.subr.bf16.mxu0 %v9291_v0  ;;  %v7567_v54 = vld [vmem:[#allocation2 + $0x69] sm:$0xff] }
 0x16a   : > { %9353 = vst [vmem:[#allocation22_spill] sm:$0xff] %v7567_v54 }
 0x16b   : > { %1858 = vmatmul.mubr.f32.gmra.mrb[30].mxu0 %v7443_v27 }
 0x16c   : > { %1862 = vmatprep.mubr.f32.mxu0 %v7313_v4  ;;  %5821 = vmatpush1.bf16.msra.mxu0 %v5820_v40  ;;  %v7461_v4 = vld [vmem:[#allocation2 + $0xe2] sm:$0xff] }
 0x16d   : > { %5822 = vmatprep.subr.bf16.mxu0 %v9291_v0  ;;  %v1448_v40 = vld [vmem:[#allocation7 + $0x318] sm:$0xff] }
 0x16f   : > { %1863 = vmatmul.mubr.f32.gmra.mrb[32].mxu0 %v7448_v35 }
 0x170   : > { %1867 = vmatprep.mubr.f32.mxu0 %v7317_v38  ;;  %v7469_v38 = vld [vmem:[#allocation2 + $0xfa] sm:$0xff] }
 0x173   : > { %1868 = vmatmul.mubr.f32.gmra.mrb[34].mxu0 %v7453_v36 }
 0x174   : > { %1872 = vmatprep.mubr.f32.mxu0 %v7321_v5  ;;  %v7473_v5 = vld [vmem:[#allocation2 + $0x10a] sm:$0xff] }
 0x177   : > { %1873 = vmatmul.mubr.f32.gmra.mrb[36].mxu0 %v7457_v43 }
 0x178   : > { %1877 = vmatprep.mubr.f32.mxu0 %v7325_v41  ;;  %v7477_v41 = vld [vmem:[#allocation2 + $0x112] sm:$0xff] }
 0x17b   : > { %1878 = vmatmul.mubr.f32.gmra.mrb[38].mxu0 %v7461_v4 }
 0x17c   : > { %1882 = vmatprep.mubr.f32.mxu0 %v7329_v42  ;;  %v1477_v42 = vld [vmem:[#allocation7 + $0x400] sm:$0xff] }
 0x17d   : > { %v5870_v53 = vpack.c.bf16 %v1478_v50, %v1477_v42  ;;  %v7518_v42 = vld [vmem:[#allocation2 + $0x19] sm:$0xff]  ;;  %v5826_v50 = vpack.c.bf16 %v1448_v40, %v1447_v63  ;;  %v7581_v63 = vld [vmem:[#allocation2 + $0x81] sm:$0xff] }
 0x17e   : > { %9346 = vst [vmem:[#allocation15_spill] sm:$0xff] %v7518_v42  ;;  %9355 = vst [vmem:[#allocation24_spill] sm:$0xff] %v7581_v63 }
 0x17f   : > { %1883 = vmatmul.mubr.f32.gmra.mrb[40].mxu0 %v7465_v28  ;;  %5871 = vmatprep.subr.bf16.mxu1 %v5870_v53 }
 0x180   : > { %1887 = vmatprep.mubr.f32.mxu0 %v7333_v44  ;;  %v7481_v44 = vld [vmem:[#allocation2 + $0x122] sm:$0xff]  ;;  %5873 = vmatpush3.bf16.msra.mxu1 %v5870_v53  ;;  %v1449_v53 = vld [vmem:[#allocation7 + $0x320] sm:$0xff] }
 0x183   : > { %1888 = vmatmul.mubr.f32.gmra.mrb[42].mxu0 %v7469_v38 }
 0x184   : > { %1892 = vmatprep.mubr.f32.mxu0 %v7337_v47  ;;  %v1479_v47 = vld [vmem:[#allocation7 + $0x410] sm:$0xff] }
 0x187   : > { %1893 = vmatmul.mubr.f32.gmra.mrb[44].mxu0 %v7473_v5 }
 0x188   : > { %1897 = vmatprep.mubr.f32.mxu0 %v7341_v48  ;;  %v1480_v48 = vld [vmem:[#allocation7 + $0x418] sm:$0xff] }
 0x189   : > { %v5874_v11 = vpack.c.bf16 %v1480_v48, %v1479_v47  ;;  %v7525_v47 = vld [vmem:[#allocation2 + $0x21] sm:$0xff] }
 0x18a   : > { %9347 = vst [vmem:[#allocation16_spill] sm:$0xff] %v7525_v47 }
 0x18b   : > { %1898 = vmatmul.mubr.f32.gmra.mrb[46].mxu0 %v7477_v41  ;;  %5875 = vmatprep.subr.bf16.mxu1 %v5874_v11 }
 0x18c   : > { %1902 = vmatprep.mubr.f32.mxu0 %v7345_v49  ;;  %v7489_v49 = vld [vmem:[#allocation2 + $0x13a] sm:$0xff]  ;;  %5877 = vmatpush3.bf16.msra.mxu1 %v5874_v11  ;;  %v1452_v11 = vld [vmem:[#allocation7 + $0x338] sm:$0xff] }
 0x18d   : > { %5879 = vmatprep.subr.bf16.mxu1 %v5878_v15 }
 0x18f   : > { %1903 = vmatmul.mubr.f32.gmra.mrb[48].mxu0 %v7481_v44 }
 0x190   : > { %1907 = vmatprep.mubr.f32.mxu0 %v7349_v51  ;;  %v7493_v51 = vld [vmem:[#allocation2 + $0x142] sm:$0xff]  ;;  %5881 = vmatpush3.bf16.msra.mxu1 %v5878_v15  ;;  %v1454_v15 = vld [vmem:[#allocation7 + $0x348] sm:$0xff] }
 0x191   : > { %5883 = vmatprep.subr.bf16.mxu1 %v5882_v24 }
 0x193   : > { %1908 = vmatmul.mubr.f32.gmra.mrb[50].mxu0 %v7485_v29 }
 0x194   : > { %1912 = vmatprep.mubr.f32.mxu0 %v7353_v52  ;;  %v1486_v52 = vld [vmem:[#allocation7 + $0x448] sm:$0xff]  ;;  %5885 = vmatpush3.bf16.msra.mxu1 %v5882_v24  ;;  %v1456_v24 = vld [vmem:[#allocation7 + $0x358] sm:$0xff] }
 0x195   : > { %v5886_v33 = vpack.c.bf16 %v1486_v52, %v1485_v9  ;;  %v7546_v9 = vld [vmem:[#allocation2 + $0x49] sm:$0xff] }
 0x196   : > { %9350 = vst [vmem:[#allocation19_spill] sm:$0xff] %v7546_v9 }
 0x197   : > { %1913 = vmatmul.mubr.f32.gmra.mrb[52].mxu0 %v7489_v49  ;;  %5887 = vmatprep.subr.bf16.mxu1 %v5886_v33 }
 0x198   : > { %1917 = vmatprep.mubr.f32.mxu0 %v7361_v56  ;;  %v1487_v56 = vld [vmem:[#allocation7 + $0x450] sm:$0xff]  ;;  %5889 = vmatpush3.bf16.msra.mxu1 %v5886_v33  ;;  %v1458_v33 = vld [vmem:[#allocation7 + $0x368] sm:$0xff] }
 0x199   : > { %v5890_v10 = vpack.c.bf16 %v1488_v13, %v1487_v56  ;;  %v7553_v56 = vld [vmem:[#allocation2 + $0x51] sm:$0xff] }
 0x19a   : > { %9351 = vst [vmem:[#allocation20_spill] sm:$0xff] %v7553_v56 }
 0x19b   : > { %1918 = vmatmul.mubr.f32.gmra.mrb[54].mxu0 %v7493_v51  ;;  %5891 = vmatprep.subr.bf16.mxu1 %v5890_v10 }
 0x19c   : > { %1922 = vmatprep.mubr.f32.mxu0 %v7369_v60  ;;  %v1489_v60 = vld [vmem:[#allocation7 + $0x460] sm:$0xff]  ;;  %5893 = vmatpush3.bf16.msra.mxu1 %v5890_v10  ;;  %v1460_v10 = vld [vmem:[#allocation7 + $0x378] sm:$0xff] }
 0x19d   : > { %v5894_v22 = vpack.c.bf16 %v1490_v16, %v1489_v60  ;;  %v7560_v60 = vld [vmem:[#allocation2 + $0x61] sm:$0xff] }
 0x19e   : > { %9352 = vst [vmem:[#allocation21_spill] sm:$0xff] %v7560_v60 }
 0x19f   : > { %1923 = vmatmul.mubr.f32.gmra.mrb[56].mxu0 %v7497_v6  ;;  %5895 = vmatprep.subr.bf16.mxu1 %v5894_v22 }
 0x1a0   : > { %1927 = vmatprep.mubr.f32.mxu0 %v7373_v2  ;;  %v7513_v2 = vld [vmem:[#allocation2 + $0x172] sm:$0xff]  ;;  %5897 = vmatpush3.bf16.msra.mxu1 %v5894_v22 }
 0x1a1   : > { %5899 = vmatprep.subr.bf16.mxu1 %v5898_v59  ;;  %v1462_v22 = vld [vmem:[#allocation7 + $0x388] sm:$0xff] }
 0x1a3   : > { %1928 = vmatmul.mubr.f32.gmra.mrb[58].mxu0 %v7501_v12 }
 0x1a4   : > { %1932 = vmatprep.mubr.f32.mxu0 %v7503_v39  ;;  %5901 = vmatpush3.bf16.msra.mxu1 %v5898_v59 }
 0x1a5   : > { %5902 = vmatprep.subr.bf16.mxu1 %v9291_v0 }
 0x1a7   : > { %1933 = vmatmul.mubr.f32.gmra.mrb[60].mxu0 %v7507_v45  ;;  %5551 = vmatmul.mubr.f32.vlgmr.msra.gmra.mrb[0].mxu1 %v7393_v3 }
 0x1a8   : > { %1937 = vmatprep.mubr.f32.mxu0 %v7509_v46  ;;  %5553 = vmatprep.mubr.f32.mxu1 %v7398_v7 }
 0x1ab   : > { %1938 = vmatmul.mubr.f32.gmra.mrb[62].mxu0 %v7513_v2  ;;  %5554 = vmatmul.mubr.f32.gmra.mrb[2].mxu1 %v7403_v58 }
 0x1ac   : > { %2007 = vmatprep.mubr.f32.mxu0 %v7380_v23  ;;  %v1450_v23 = vld [vmem:[#allocation7 + $0x328] sm:$0xff]  ;;  %5556 = vmatprep.mubr.f32.mxu1 %v7408_v61 }
 0x1ad   : > { %v5829_v48 = vpack.c.bf16 %v1450_v23, %v1449_v53  ;;  %v7588_v53 = vld [vmem:[#allocation2 + $0x91] sm:$0xff] }
 0x1ae   : > { %9356 = vst [vmem:[#allocation25_spill] sm:$0xff] %v7588_v53 }
 0x1af   : > { %2008 = vmatmul.mubr.f32.vlgmr.msra.gmra.mrb[0].mxu0 %v7518_v42  ;;  %5557 = vmatmul.mubr.f32.gmra.mrb[4].mxu1 %v7413_v19 }
 0x1b0   : > { %5824 = vmatpush1.bf16.msra.mxu0 %v5823_v37  ;;  %2012 = vmatprep.mubr.f32.mxu0 %v7385_v57  ;;  %v1451_v57 = vld [vmem:[#allocation7 + $0x330] sm:$0xff]  ;;  %v1466_v37 = vld [vmem:[#allocation7 + $0x3a8] sm:$0xff] }
 0x1b1   : > { %5825 = vmatprep.subr.bf16.mxu0 %v9291_v0  ;;  %v5832_v30 = vpack.c.bf16 %v1452_v11, %v1451_v57  ;;  %5559 = vmatprep.mubr.f32.mxu1 %v7418_v20  ;;  %v7595_v57 = vld [vmem:[#allocation2 + $0x99] sm:$0xff] }
 0x1b2   : > { %9357 = vst [vmem:[#allocation26_spill] sm:$0xff] %v7595_v57 }
 0x1b3   : > { %2013 = vmatmul.mubr.f32.gmra.mrb[2].mxu0 %v7525_v47  ;;  %5560 = vmatmul.mubr.f32.gmra.mrb[6].mxu1 %v7423_v21 }
 0x1b4   : > { %2017 = vmatprep.mubr.f32.mxu0 %v7243_v62  ;;  %5827 = vmatpush1.bf16.msra.mxu0 %v5826_v50  ;;  %v1453_v62 = vld [vmem:[#allocation7 + $0x340] sm:$0xff]  ;;  %v1468_v50 = vld [vmem:[#allocation7 + $0x3b8] sm:$0xff] }
 0x1b5   : > { %5828 = vmatprep.subr.bf16.mxu0 %v9291_v0  ;;  %v5835_v32 = vpack.c.bf16 %v1454_v15, %v1453_v62  ;;  %5562 = vmatprep.mubr.f32.mxu1 %v7428_v14  ;;  %v7602_v62 = vld [vmem:[#allocation2 + $0xa9] sm:$0xff] }
 0x1b6   : > { %9358 = vst [vmem:[#allocation27_spill] sm:$0xff] %v7602_v62 }
 0x1b7   : > { %2018 = vmatmul.mubr.f32.gmra.mrb[4].mxu0 %v7532_v1  ;;  %5563 = vmatmul.mubr.f32.gmra.mrb[8].mxu1 %v7433_v25 }
 0x1b8   : > { %2022 = vmatprep.mubr.f32.mxu0 %v7393_v3  ;;  %5830 = vmatpush1.bf16.msra.mxu0 %v5829_v48  ;;  %v1455_v3 = vld [vmem:[#allocation7 + $0x350] sm:$0xff]  ;;  %v1470_v48 = vld [vmem:[#allocation7 + $0x3c8] sm:$0xff] }
 0x1b9   : > { %5831 = vmatprep.subr.bf16.mxu0 %v9291_v0  ;;  %v5838_v52 = vpack.c.bf16 %v1456_v24, %v1455_v3  ;;  %5565 = vmatprep.mubr.f32.mxu1 %v7438_v34  ;;  %v7609_v3 = vld [vmem:[#allocation2 + $0xb1] sm:$0xff] }
 0x1ba   : > { %9359 = vst [vmem:[#allocation28_spill] sm:$0xff] %v7609_v3 }
 0x1bb   : > { %2023 = vmatmul.mubr.f32.gmra.mrb[6].mxu0 %v7539_v18  ;;  %5566 = vmatmul.mubr.f32.gmra.mrb[10].mxu1 %v7443_v27 }
 0x1bc   : > { %2027 = vmatprep.mubr.f32.mxu0 %v7398_v7  ;;  %5833 = vmatpush1.bf16.msra.mxu0 %v5832_v30  ;;  %v1457_v7 = vld [vmem:[#allocation7 + $0x360] sm:$0xff]  ;;  %v1472_v30 = vld [vmem:[#allocation7 + $0x3d8] sm:$0xff] }
 0x1bd   : > { %5834 = vmatprep.subr.bf16.mxu0 %v9291_v0  ;;  %v5841_v13 = vpack.c.bf16 %v1458_v33, %v1457_v7  ;;  %5568 = vmatprep.mubr.f32.mxu1 %v7448_v35  ;;  %v1476_v7 = vld [vmem:[#allocation7 + $0x3f8] sm:$0xff] }
 0x1be   : > { %v835_v33 = vld [vmem:[#allocation2 + $0x18a] sm:$0xff] }
 0x1bf   : > { %2028 = vmatmul.mubr.f32.gmra.mrb[8].mxu0 %v7546_v9  ;;  %5569 = vmatmul.mubr.f32.gmra.mrb[12].mxu1 %v7453_v36 }
 0x1c0   : > { %2032 = vmatprep.mubr.f32.mxu0 %v7403_v58  ;;  %5836 = vmatpush1.bf16.msra.mxu0 %v5835_v32  ;;  %v1459_v58 = vld [vmem:[#allocation7 + $0x370] sm:$0xff]  ;;  %v1474_v32 = vld [vmem:[#allocation7 + $0x3e8] sm:$0xff] }
 0x1c1   : > { %5837 = vmatprep.subr.bf16.mxu0 %v9291_v0  ;;  %v5844_v16 = vpack.c.bf16 %v1460_v10, %v1459_v58  ;;  %5571 = vmatprep.mubr.f32.mxu1 %v7457_v43  ;;  %v7624_v10 = vld [vmem:[#allocation2 + $0xd9] sm:$0xff] }
 0x1c2   : > { %9362 = vst [vmem:[#allocation31_spill] sm:$0xff] %v7624_v10 }
 0x1c3   : > { %2033 = vmatmul.mubr.f32.gmra.mrb[10].mxu0 %v7553_v56  ;;  %5572 = vmatmul.mubr.f32.gmra.mrb[14].mxu1 %v7461_v4 }
 0x1c4   : > { %2037 = vmatprep.mubr.f32.mxu0 %v7408_v61  ;;  %5839 = vmatpush1.bf16.msra.mxu0 %v5838_v52  ;;  %v1461_v61 = vld [vmem:[#allocation7 + $0x380] sm:$0xff]  ;;  %v834_v52 = vld [vmem:[#allocation2 + $0x182] sm:$0xff] }
 0x1c5   : > { %5840 = vmatprep.subr.bf16.mxu0 %v9291_v0  ;;  %v5847_v31 = vpack.c.bf16 %v1462_v22, %v1461_v61  ;;  %5574 = vmatprep.mubr.f32.mxu1 %v7465_v28  ;;  %v7640_v61 = vld [vmem:[#allocation2 + $0x109] sm:$0xff]  ;;  %v933_v22 = vld [vmem:[#allocation2 + $0x31] sm:$0xff] }
 0x1c6   : > { %9366 = vst [vmem:[#allocation35_spill] sm:$0xff] %v7640_v61 }
 0x1c7   : > { %2038 = vmatmul.mubr.f32.gmra.mrb[12].mxu0 %v7560_v60  ;;  %5575 = vmatmul.mubr.f32.gmra.mrb[16].mxu1 %v7469_v38 }
 0x1c8   : > { %2042 = vmatprep.mubr.f32.mxu0 %v7413_v19  ;;  %5842 = vmatpush1.bf16.msra.mxu0 %v5841_v13  ;;  %v1463_v19 = vld [vmem:[#allocation7 + $0x390] sm:$0xff] }
 0x1c9   : > { %5843 = vmatprep.subr.bf16.mxu0 %v9291_v0  ;;  %v5850_v59 = vpack.c.bf16 %v1464_v26, %v1463_v19  ;;  %5577 = vmatprep.mubr.f32.mxu1 %v7473_v5  ;;  %v7615_v13 = vld [vmem:[#allocation2 + $0xc1] sm:$0xff]  ;;  %v935_v19 = vld [vmem:[#allocation2 + $0x49] sm:$0xff] }
 0x1ca   : > { %9360 = vst [vmem:[#allocation29_spill] sm:$0xff] %v7615_v13  ;;  %v871_v26 = vld [vmem:[#allocation2 + $0x48] sm:$0xff] }
 0x1cb   : > { %2043 = vmatmul.mubr.f32.gmra.mrb[14].mxu0 %v7567_v54  ;;  %5578 = vmatmul.mubr.f32.gmra.mrb[18].mxu1 %v7477_v41 }
 0x1cc   : > { %2047 = vmatprep.mubr.f32.mxu0 %v7418_v20  ;;  %5845 = vmatpush1.bf16.msra.mxu0 %v5844_v16  ;;  %v1465_v20 = vld [vmem:[#allocation7 + $0x3a0] sm:$0xff]  ;;  %v7628_v16 = vld [vmem:[#allocation2 + $0xe1] sm:$0xff] }
 0x1cd   : > { %5846 = vmatprep.subr.bf16.mxu0 %v9291_v0  ;;  %v5853_v40 = vpack.c.bf16 %v1466_v37, %v1465_v20  ;;  %5580 = vmatprep.mubr.f32.mxu1 %v7481_v44  ;;  %9363 = vst [vmem:[#allocation32_spill] sm:$0xff] %v7628_v16  ;;  %v872_v20 = vld [vmem:[#allocation2 + $0x50] sm:$0xff]  ;;  %v937_v37 = vld [vmem:[#allocation2 + $0x61] sm:$0xff] }
 0x1cf   : > { %2048 = vmatmul.mubr.f32.gmra.mrb[16].mxu0 %v7574_v17  ;;  %5581 = vmatmul.mubr.f32.gmra.mrb[20].mxu1 %v7485_v29  ;;  %v3879_v17 = vld [vmem:[#allocation9 + $0x470] sm:$0xff] }
 0x1d0   : > { %2052 = vmatprep.mubr.f32.mxu0 %v7423_v21  ;;  %5848 = vmatpush1.bf16.msra.mxu0 %v5847_v31  ;;  %v1467_v21 = vld [vmem:[#allocation7 + $0x3b0] sm:$0xff] }
 0x1d1   : > { %5849 = vmatprep.subr.bf16.mxu0 %v9291_v0  ;;  %v5856_v23 = vpack.c.bf16 %v1468_v50, %v1467_v21  ;;  %5583 = vmatprep.mubr.f32.mxu1 %v7489_v49  ;;  %v934_v31 = vld [vmem:[#allocation2 + $0x39] sm:$0xff] }
 0x1d2   : > { %v939_v21 = vld [vmem:[#allocation2 + $0x79] sm:$0xff] }
 0x1d3   : > { %2053 = vmatmul.mubr.f32.gmra.mrb[18].mxu0 %v7581_v63  ;;  %5584 = vmatmul.mubr.f32.gmra.mrb[22].mxu1 %v7493_v51  ;;  %v875_v50 = vld [vmem:[#allocation2 + $0x78] sm:$0xff] }
 0x1d4   : > { %2057 = vmatprep.mubr.f32.mxu0 %v7428_v14  ;;  %5851 = vmatpush1.bf16.msra.mxu0 %v5850_v59  ;;  %v1469_v14 = vld [vmem:[#allocation7 + $0x3c0] sm:$0xff]  ;;  %v3770_v63 = vld [vmem:[#allocation9 + $0x108] sm:$0xff] }
 0x1d5   : > { %5852 = vmatprep.subr.bf16.mxu0 %v9291_v0  ;;  %v5859_v11 = vpack.c.bf16 %v1470_v48, %v1469_v14  ;;  %5586 = vmatprep.mubr.f32.mxu1 %v7497_v6  ;;  %v936_v59 = vld [vmem:[#allocation2 + $0x51] sm:$0xff]  ;;  %v876_v14 = vld [vmem:[#allocation2 + $0x80] sm:$0xff] }
 0x1d6   : > { %v941_v48 = vld [vmem:[#allocation2 + $0x91] sm:$0xff] }
 0x1d7   : > { %2058 = vmatmul.mubr.f32.gmra.mrb[20].mxu0 %v7588_v53  ;;  %5587 = vmatmul.mubr.f32.gmra.mrb[24].mxu1 %v7501_v12  ;;  %v2938_v53 = vld [vmem:[#allocation2 + $0x9] sm:$0xff] }
 0x1d8   : > { %2062 = vmatprep.mubr.f32.mxu0 %v7433_v25  ;;  %5854 = vmatpush1.bf16.msra.mxu0 %v5853_v40  ;;  %v1471_v25 = vld [vmem:[#allocation7 + $0x3d0] sm:$0xff]  ;;  %v938_v40 = vld [vmem:[#allocation2 + $0x69] sm:$0xff] }
 0x1d9   : > { %5855 = vmatprep.subr.bf16.mxu0 %v9291_v0  ;;  %v5862_v15 = vpack.c.bf16 %v1472_v30, %v1471_v25  ;;  %5589 = vmatprep.mubr.f32.mxu1 %v7507_v45  ;;  %v942_v25 = vld [vmem:[#allocation2 + $0x99] sm:$0xff] }
 0x1da   : > { %v878_v30 = vld [vmem:[#allocation2 + $0x98] sm:$0xff] }
 0x1db   : > { %2063 = vmatmul.mubr.f32.gmra.mrb[22].mxu0 %v7595_v57  ;;  %5590 = vmatmul.mubr.f32.gmra.mrb[26].mxu1 %v7513_v2 }
 0x1dc   : > { %2067 = vmatprep.mubr.f32.mxu0 %v7438_v34  ;;  %5857 = vmatpush1.bf16.msra.mxu0 %v5856_v23  ;;  %v1473_v34 = vld [vmem:[#allocation7 + $0x3e0] sm:$0xff]  ;;  %v940_v23 = vld [vmem:[#allocation2 + $0x81] sm:$0xff] }
 0x1dd   : > { %5858 = vmatprep.subr.bf16.mxu0 %v9291_v0  ;;  %v5865_v24 = vpack.c.bf16 %v1474_v32, %v1473_v34  ;;  %5592 = vmatprep.mubr.f32.mxu1 %v834_v52  ;;  %v879_v34 = vld [vmem:[#allocation2 + $0xa8] sm:$0xff]  ;;  %v944_v32 = vld [vmem:[#allocation2 + $0xb1] sm:$0xff] }
 0x1df   : > { %2068 = vmatmul.mubr.f32.gmra.mrb[24].mxu0 %v7602_v62  ;;  %5593 = vmatmul.mubr.f32.gmra.mrb[28].mxu1 %v835_v33 }
 0x1e0   : > { %2072 = vmatprep.mubr.f32.mxu0 %v7443_v27  ;;  %5860 = vmatpush1.bf16.msra.mxu0 %v5859_v11  ;;  %v1475_v27 = vld [vmem:[#allocation7 + $0x3f0] sm:$0xff]  ;;  %v877_v11 = vld [vmem:[#allocation2 + $0x90] sm:$0xff] }
 0x1e1   : > { %5861 = vmatprep.subr.bf16.mxu0 %v9291_v0  ;;  %v5868_v58 = vpack.c.bf16 %v1476_v7, %v1475_v27  ;;  %v881_v27 = vld [vmem:[#allocation2 + $0xc0] sm:$0xff]  ;;  %v946_v7 = vld [vmem:[#allocation2 + $0xc9] sm:$0xff] }
 0x1e3   : > { %2073 = vmatmul.mubr.f32.gmra.mrb[26].mxu0 %v7609_v3 }
 0x1e4   : > { %2077 = vmatprep.mubr.f32.mxu0 %v7448_v35  ;;  %5863 = vmatpush1.bf16.msra.mxu0 %v5862_v15  ;;  %v7620_v35 = vld [vmem:[#allocation2 + $0xc9] sm:$0xff] }
 0x1e5   : > { %5864 = vmatprep.subr.bf16.mxu0 %v9291_v0  ;;  %9361 = vst [vmem:[#allocation30_spill] sm:$0xff] %v7620_v35  ;;  %v943_v15 = vld [vmem:[#allocation2 + $0xa9] sm:$0xff] }
 0x1e7   : > { %2078 = vmatmul.mubr.f32.gmra.mrb[28].mxu0 %v7615_v13 }
 0x1e8   : > { %2082 = vmatprep.mubr.f32.mxu0 %v7453_v36  ;;  %5866 = vmatpush1.bf16.msra.mxu0 %v5865_v24  ;;  %v7632_v36 = vld [vmem:[#allocation2 + $0xf1] sm:$0xff] }
 0x1e9   : > { %5867 = vmatprep.subr.bf16.mxu0 %v9291_v0  ;;  %9364 = vst [vmem:[#allocation33_spill] sm:$0xff] %v7632_v36  ;;  %v880_v24 = vld [vmem:[#allocation2 + $0xb0] sm:$0xff] }
 0x1eb   : > { %2083 = vmatmul.mubr.f32.gmra.mrb[30].mxu0 %v7620_v35  ;;  %v3749_v35 = vld [vmem:[#allocation9 + $0x60] sm:$0xff] }
 0x1ec   : > { %2087 = vmatprep.mubr.f32.mxu0 %v7457_v43  ;;  %5869 = vmatpush1.bf16.msra.mxu0 %v5868_v58  ;;  %v7636_v43 = vld [vmem:[#allocation2 + $0xf9] sm:$0xff] }
 0x1ed   : > { %9365 = vst [vmem:[#allocation34_spill] sm:$0xff] %v7636_v43  ;;  %v947_v58 = vld [vmem:[#allocation2 + $0xd9] sm:$0xff] }
 0x1ef   : > { %2088 = vmatmul.mubr.f32.gmra.mrb[32].mxu0 %v7624_v10 }
 0x1f0   : > { %2092 = vmatprep.mubr.f32.mxu0 %v7461_v4  ;;  %v7644_v4 = vld [vmem:[#allocation2 + $0x111] sm:$0xff] }
 0x1f1   : > { %9367 = vst [vmem:[#allocation36_spill] sm:$0xff] %v7644_v4 }
 0x1f3   : > { %2093 = vmatmul.mubr.f32.gmra.mrb[34].mxu0 %v7628_v16 }
 0x1f4   : > { %2097 = vmatprep.mubr.f32.mxu0 %v7465_v28  ;;  %v7648_v28 = vld [vmem:[#allocation2 + $0x121] sm:$0xff] }
 0x1f5   : > { %9368 = vst [vmem:[#allocation37_spill] sm:$0xff] %v7648_v28 }
 0x1f7   : > { %2098 = vmatmul.mubr.f32.gmra.mrb[36].mxu0 %v7632_v36  ;;  %v3746_v36 = vld [vmem:[#allocation9 + $0x48] sm:$0xff] }
 0x1f8   : > { %2102 = vmatprep.mubr.f32.mxu0 %v7469_v38  ;;  %v7652_v38 = vld [vmem:[#allocation2 + $0x129] sm:$0xff] }
 0x1f9   : > { %9369 = vst [vmem:[#allocation38_spill] sm:$0xff] %v7652_v38 }
 0x1fb   : > { %2103 = vmatmul.mubr.f32.gmra.mrb[38].mxu0 %v7636_v43 }
 0x1fc   : > { %2107 = vmatprep.mubr.f32.mxu0 %v7473_v5  ;;  %v7656_v5 = vld [vmem:[#allocation2 + $0x139] sm:$0xff] }
 0x1fd   : > { %9370 = vst [vmem:[#allocation39_spill] sm:$0xff] %v7656_v5 }
 0x1ff   : > { %2108 = vmatmul.mubr.f32.gmra.mrb[40].mxu0 %v7640_v61 }
 0x200   : > { %2112 = vmatprep.mubr.f32.mxu0 %v7477_v41  ;;  %v7660_v41 = vld [vmem:[#allocation2 + $0x141] sm:$0xff] }
 0x201   : > { %9371 = vst [vmem:[#allocation40_spill] sm:$0xff] %v7660_v41 }
 0x203   : > { %2113 = vmatmul.mubr.f32.gmra.mrb[42].mxu0 %v7644_v4 }
 0x204   : > { %2117 = vmatprep.mubr.f32.mxu0 %v7481_v44  ;;  %v7664_v44 = vld [vmem:[#allocation2 + $0x151] sm:$0xff] }
 0x205   : > { %9372 = vst [vmem:[#allocation41_spill] sm:$0xff] %v7664_v44 }
 0x207   : > { %2118 = vmatmul.mubr.f32.gmra.mrb[44].mxu0 %v7648_v28 }
 0x208   : > { %2122 = vmatprep.mubr.f32.mxu0 %v7485_v29  ;;  %v7668_v29 = vld [vmem:[#allocation2 + $0x159] sm:$0xff] }
 0x209   : > { %9373 = vst [vmem:[#allocation42_spill] sm:$0xff] %v7668_v29 }
 0x20b   : > { %2123 = vmatmul.mubr.f32.gmra.mrb[46].mxu0 %v7652_v38 }
 0x20c   : > { %2127 = vmatprep.mubr.f32.mxu0 %v7489_v49  ;;  %v7672_v49 = vld [vmem:[#allocation2 + $0x169] sm:$0xff] }
 0x20d   : > { %9374 = vst [vmem:[#allocation43_spill] sm:$0xff] %v7672_v49 }
 0x20f   : > { %2128 = vmatmul.mubr.f32.gmra.mrb[48].mxu0 %v7656_v5 }
 0x210   : > { %2132 = vmatprep.mubr.f32.mxu0 %v7493_v51  ;;  %v7676_v51 = vld [vmem:[#allocation2 + $0x171] sm:$0xff] }
 0x211   : > { %9375 = vst [vmem:[#allocation44_spill] sm:$0xff] %v7676_v51 }
 0x213   : > { %2133 = vmatmul.mubr.f32.gmra.mrb[50].mxu0 %v7660_v41  ;;  %v3742_v41 = vld [vmem:[#allocation9 + $0x28] sm:$0xff] }
 0x214   : > { %2137 = vmatprep.mubr.f32.mxu0 %v7497_v6  ;;  %v1027_v6 = vld [vmem:[#allocation2 + $0x19a] sm:$0xff] }
 0x215   : > { %5595 = vmatprep.mubr.f32.mxu1 %v1027_v6  ;;  %v883_v6 = vld [vmem:[#allocation2 + $0xd8] sm:$0xff] }
 0x217   : > { %2138 = vmatmul.mubr.f32.gmra.mrb[52].mxu0 %v7664_v44  ;;  %v3741_v44 = vld [vmem:[#allocation9 + $0x20] sm:$0xff] }
 0x218   : > { %2142 = vmatprep.mubr.f32.mxu0 %v7501_v12  ;;  %v1028_v12 = vld [vmem:[#allocation2 + $0x1a2] sm:$0xff]  ;;  %v5909_v5 = vpack.c.bf16 %v3742_v41, %v3741_v44 }
 0x219   : > { %5596 = vmatmul.mubr.f32.gmra.mrb[30].mxu1 %v1028_v12  ;;  %v948_v12 = vld [vmem:[#allocation2 + $0xe1] sm:$0xff] }
 0x21b   : > { %2143 = vmatmul.mubr.f32.gmra.mrb[54].mxu0 %v7668_v29 }
 0x21c   : > { %2147 = vmatprep.mubr.f32.mxu0 %v7507_v45  ;;  %v869_v45 = vld [vmem:[#allocation2 + $0x30] sm:$0xff] }
 0x21f   : > { %2148 = vmatmul.mubr.f32.gmra.mrb[56].mxu0 %v7672_v49 }
 0x220   : > { %2152 = vmatprep.mubr.f32.mxu0 %v7513_v2  ;;  %v870_v2 = vld [vmem:[#allocation2 + $0x38] sm:$0xff] }
 0x223   : > { %2153 = vmatmul.mubr.f32.gmra.mrb[58].mxu0 %v7676_v51  ;;  %v3740_v51 = vld [vmem:[#allocation9 + $0x18] sm:$0xff] }
 0x224   : > { %2157 = vmatprep.mubr.f32.mxu0 %v834_v52  ;;  %v945_v52 = vld [vmem:[#allocation2 + $0xc1] sm:$0xff] }
 0x227   : > { %2158 = vmatmul.mubr.f32.gmra.mrb[60].mxu0 %v7356_v55  ;;  %v873_v55 = vld [vmem:[#allocation2 + $0x60] sm:$0xff] }
 0x228   : > { %2162 = vmatprep.mubr.f32.mxu0 %v835_v33  ;;  %v882_v33 = vld [vmem:[#allocation2 + $0xc8] sm:$0xff] }
 0x22b   : > { %2163 = vmatmul.mubr.f32.gmra.mrb[62].mxu0 %v7364_v8  ;;  %v874_v8 = vld [vmem:[#allocation2 + $0x68] sm:$0xff] }
 0x22c   : > { %2232 = vmatprep.mubr.f32.mxu0 %v933_v22  ;;  %v884_v22 = vld [vmem:[#allocation2 + $0xe0] sm:$0xff] }
 0x22f   : > { %2233 = vmatmul.mubr.f32.vlgmr.msra.gmra.mrb[0].mxu0 %v869_v45  ;;  %v949_v45 = vld [vmem:[#allocation2 + $0xf1] sm:$0xff] }
 0x230   : > { %2237 = vmatprep.mubr.f32.mxu0 %v934_v31  ;;  %v885_v31 = vld [vmem:[#allocation2 + $0xf0] sm:$0xff] }
 0x233   : > { %2238 = vmatmul.mubr.f32.gmra.mrb[2].mxu0 %v870_v2  ;;  %v950_v2 = vld [vmem:[#allocation2 + $0xf9] sm:$0xff] }
 0x234   : > { %2242 = vmatprep.mubr.f32.mxu0 %v935_v19  ;;  %v886_v19 = vld [vmem:[#allocation2 + $0xf8] sm:$0xff] }
 0x237   : > { %2243 = vmatmul.mubr.f32.gmra.mrb[4].mxu0 %v871_v26  ;;  %v951_v26 = vld [vmem:[#allocation2 + $0x109] sm:$0xff] }
 0x238   : > { %2247 = vmatprep.mubr.f32.mxu0 %v936_v59  ;;  %v887_v59 = vld [vmem:[#allocation2 + $0x108] sm:$0xff] }
 0x23b   : > { %2248 = vmatmul.mubr.f32.gmra.mrb[6].mxu0 %v872_v20  ;;  %v952_v20 = vld [vmem:[#allocation2 + $0x111] sm:$0xff] }
 0x23c   : > { %2252 = vmatprep.mubr.f32.mxu0 %v937_v37  ;;  %v888_v37 = vld [vmem:[#allocation2 + $0x110] sm:$0xff] }
 0x23f   : > { %2253 = vmatmul.mubr.f32.gmra.mrb[8].mxu0 %v873_v55  ;;  %v953_v55 = vld [vmem:[#allocation2 + $0x121] sm:$0xff] }
 0x240   : > { %2257 = vmatprep.mubr.f32.mxu0 %v938_v40  ;;  %v889_v40 = vld [vmem:[#allocation2 + $0x120] sm:$0xff] }
 0x243   : > { %2258 = vmatmul.mubr.f32.gmra.mrb[10].mxu0 %v874_v8  ;;  %v954_v8 = vld [vmem:[#allocation2 + $0x129] sm:$0xff] }
 0x244   : > { %2262 = vmatprep.mubr.f32.mxu0 %v939_v21  ;;  %v890_v21 = vld [vmem:[#allocation2 + $0x128] sm:$0xff] }
 0x247   : > { %2263 = vmatmul.mubr.f32.gmra.mrb[12].mxu0 %v875_v50  ;;  %v955_v50 = vld [vmem:[#allocation2 + $0x139] sm:$0xff] }
 0x248   : > { %2267 = vmatprep.mubr.f32.mxu0 %v940_v23 }
 0x24b   : > { %2268 = vmatmul.mubr.f32.gmra.mrb[14].mxu0 %v876_v14 }
 0x24c   : > { %2272 = vmatprep.mubr.f32.mxu0 %v941_v48  ;;  %v891_v48 = vld [vmem:[#allocation2 + $0x138] sm:$0xff] }
 0x24f   : > { %2273 = vmatmul.mubr.f32.gmra.mrb[16].mxu0 %v877_v11  ;;  %v956_v11 = vld [vmem:[#allocation2 + $0x141] sm:$0xff] }
 0x250   : > { %2277 = vmatprep.mubr.f32.mxu0 %v942_v25  ;;  %v892_v25 = vld [vmem:[#allocation2 + $0x140] sm:$0xff] }
 0x253   : > { %2278 = vmatmul.mubr.f32.gmra.mrb[18].mxu0 %v878_v30  ;;  %v957_v30 = vld [vmem:[#allocation2 + $0x151] sm:$0xff] }
 0x254   : > { %2282 = vmatprep.mubr.f32.mxu0 %v943_v15 }
 0x257   : > { %2283 = vmatmul.mubr.f32.gmra.mrb[20].mxu0 %v879_v34 }
 0x258   : > { %2287 = vmatprep.mubr.f32.mxu0 %v944_v32  ;;  %v893_v32 = vld [vmem:[#allocation2 + $0x150] sm:$0xff] }
 0x25b   : > { %2288 = vmatmul.mubr.f32.gmra.mrb[22].mxu0 %v880_v24  ;;  %v958_v24 = vld [vmem:[#allocation2 + $0x159] sm:$0xff] }
 0x25c   : > { %2292 = vmatprep.mubr.f32.mxu0 %v945_v52  ;;  %v894_v52 = vld [vmem:[#allocation2 + $0x158] sm:$0xff] }
 0x25f   : > { %2293 = vmatmul.mubr.f32.gmra.mrb[24].mxu0 %v881_v27  ;;  %v959_v27 = vld [vmem:[#allocation2 + $0x169] sm:$0xff] }
 0x260   : > { %2297 = vmatprep.mubr.f32.mxu0 %v946_v7 }
 0x263   : > { %2298 = vmatmul.mubr.f32.gmra.mrb[26].mxu0 %v882_v33 }
 0x264   : > { %2302 = vmatprep.mubr.f32.mxu0 %v947_v58  ;;  %v895_v58 = vld [vmem:[#allocation2 + $0x168] sm:$0xff] }
 0x267   : > { %2303 = vmatmul.mubr.f32.gmra.mrb[28].mxu0 %v883_v6  ;;  %v960_v6 = vld [vmem:[#allocation2 + $0x171] sm:$0xff] }
 0x268   : > { %2307 = vmatprep.mubr.f32.mxu0 %v948_v12  ;;  %v896_v12 = vld [vmem:[#allocation2 + $0x170] sm:$0xff] }
 0x26b   : > { %2308 = vmatmul.mubr.f32.gmra.mrb[30].mxu0 %v884_v22 }
 0x26c   : > { %2312 = vmatprep.mubr.f32.mxu0 %v949_v45 }
 0x26f   : > { %2313 = vmatmul.mubr.f32.gmra.mrb[32].mxu0 %v885_v31  ;;  %v7697_v31 = vld [vmem:[#allocation2 + $0x181] sm:$0xff] }
 0x270   : > { %2317 = vmatprep.mubr.f32.mxu0 %v950_v2  ;;  %9376 = vst [vmem:[#allocation45_spill] sm:$0xff] %v7697_v31  ;;  %v7701_v2 = vld [vmem:[#allocation2 + $0x189] sm:$0xff] }
 0x271   : > { %9377 = vst [vmem:[#allocation46_spill] sm:$0xff] %v7701_v2 }
 0x273   : > { %2318 = vmatmul.mubr.f32.gmra.mrb[34].mxu0 %v886_v19  ;;  %v963_v19 = vld [vmem:[#allocation2 + $0x199] sm:$0xff] }
 0x274   : > { %2322 = vmatprep.mubr.f32.mxu0 %v951_v26 }
 0x277   : > { %2323 = vmatmul.mubr.f32.gmra.mrb[36].mxu0 %v887_v59 }
 0x278   : > { %2327 = vmatprep.mubr.f32.mxu0 %v952_v20  ;;  %v964_v20 = vld [vmem:[#allocation2 + $0x1a1] sm:$0xff] }
 0x27a   : > { %v7681_v23 = vpop.f32.mrb[0].mxu1 }
 0x27b   : > { %2328 = vmatmul.mubr.f32.gmra.mrb[38].mxu0 %v888_v37  ;;  %v7683_v14 = vpop.f32.mrb[1].mxu1  ;;  %v7709_v37 = vld [vmem:[#allocation2] sm:$0xff] }
 0x27c   : > { %2332 = vmatprep.mubr.f32.mxu0 %v953_v55 }
 0x27e   : > { %v7685_v15 = vpop.f32.mrb[2].mxu1 }
 0x27f   : > { %2333 = vmatmul.mubr.f32.gmra.mrb[40].mxu0 %v889_v40  ;;  %v7687_v34 = vpop.f32.mrb[3].mxu1 }
 0x280   : > { %2337 = vmatprep.mubr.f32.mxu0 %v954_v8 }
 0x282   : > { %v7689_v7 = vpop.f32.mrb[4].mxu1 }
 0x283   : > { %2338 = vmatmul.mubr.f32.gmra.mrb[42].mxu0 %v890_v21  ;;  %v7691_v33 = vpop.f32.mrb[5].mxu1 }
 0x284   : > { %2342 = vmatprep.mubr.f32.mxu0 %v955_v50 }
 0x286   : > { %v7693_v22 = vpop.f32.mrb[6].mxu1 }
 0x287   : > { %2343 = vmatmul.mubr.f32.gmra.mrb[44].mxu0 %v891_v48  ;;  %v7695_v45 = vpop.f32.mrb[7].mxu1 }
 0x288   : > { %2347 = vmatprep.mubr.f32.mxu0 %v956_v11 }
 0x28a   : > { %v7704_v26 = vpop.f32.mrb[8].mxu1 }
 0x28b   : > { %2348 = vmatmul.mubr.f32.gmra.mrb[46].mxu0 %v892_v25  ;;  %v7706_v59 = vpop.f32.mrb[9].mxu1 }
 0x28c   : > { %2352 = vmatprep.mubr.f32.mxu0 %v957_v30 }
 0x28e   : > { %v7712_v55 = vpop.f32.mrb[10].mxu1 }
 0x28f   : > { %2353 = vmatmul.mubr.f32.gmra.mrb[48].mxu0 %v893_v32 }
 0x290   : > { %2357 = vmatprep.mubr.f32.mxu0 %v958_v24 }
 0x293   : > { %2358 = vmatmul.mubr.f32.gmra.mrb[50].mxu0 %v894_v52 }
 0x294   : > { %2362 = vmatprep.mubr.f32.mxu0 %v959_v27 }
 0x297   : > { %2363 = vmatmul.mubr.f32.gmra.mrb[52].mxu0 %v895_v58 }
 0x298   : > { %2367 = vmatprep.mubr.f32.mxu0 %v960_v6  ;;  %v3737_v6 = vld [vmem:[#allocation9] sm:$0xff] }
 0x29b   : > { %2368 = vmatmul.mubr.f32.gmra.mrb[54].mxu0 %v896_v12  ;;  %v3738_v12 = vld [vmem:[#allocation9 + $0x8] sm:$0xff] }
 0x29c   : > { %2372 = vmatprep.mubr.f32.mxu0 %v7697_v31 }
 0x29f   : > { %2373 = vmatmul.mubr.f32.gmra.mrb[56].mxu0 %v7503_v39  ;;  %v7714_v39 = vpop.f32.mrb[11].mxu1 }
 0x2a0   : > { %2377 = vmatprep.mubr.f32.mxu0 %v7701_v2  ;;  %v7717_v40 = vpop.f32.mrb[12].mxu1  ;;  %v3739_v2 = vld [vmem:[#allocation9 + $0x10] sm:$0xff] }
 0x2a1   : > { %v7719_v8 = vpop.f32.mrb[13].mxu1  ;;  %v5906_v29 = vpack.c.bf16 %v3740_v51, %v3739_v2 }
 0x2a2   : > { %v7721_v21 = vpop.f32.mrb[14].mxu1 }
 0x2a3   : > { %2378 = vmatmul.mubr.f32.gmra.mrb[58].mxu0 %v7509_v46  ;;  %v7723_v46 = vpop.f32.mrb[15].mxu1 }
 0x2a4   : > { %2382 = vmatprep.mubr.f32.mxu0 %v963_v19  ;;  %v7725_v50 = vpop.f32.mrb[16].mxu1  ;;  %v5903_v19 = vpack.c.bf16 %v3738_v12, %v3737_v6  ;;  %v3743_v6 = vld [vmem:[#allocation9 + $0x30] sm:$0xff]  ;;  %v3744_v12 = vld [vmem:[#allocation9 + $0x38] sm:$0xff] }
 0x2a5   : > { %v7727_v48 = vpop.f32.mrb[17].mxu1  ;;  %v5912_v28 = vpack.c.bf16 %v3744_v12, %v3743_v6 }
 0x2a6   : > { %v7729_v11 = vpop.f32.mrb[18].mxu1  ;;  %5904 = vmatpush1.bf16.msra.mxu1 %v5903_v19 }
 0x2a7   : > { %2383 = vmatmul.mubr.f32.gmra.mrb[60].mxu0 %v7709_v37  ;;  %v7731_v25 = vpop.f32.mrb[19].mxu1  ;;  %5905 = vmatprep.subr.bf16.mxu1 %v9291_v0 }
 0x2a8   : > { %2387 = vmatprep.mubr.f32.mxu0 %v964_v20  ;;  %v7733_v30 = vpop.f32.mrb[20].mxu1 }
 0x2a9   : > { %v7735_v32 = vpop.f32.mrb[21].mxu1 }
 0x2aa   : > { %v7737_v24 = vpop.f32.mrb[22].mxu1  ;;  %5907 = vmatpush1.bf16.msra.mxu1 %v5906_v29 }
 0x2ab   : > { %2388 = vmatmul.mubr.f32.gmra.mrb[62].mxu0 %v7709_v37  ;;  %v7739_v52 = vpop.f32.mrb[23].mxu1  ;;  %5908 = vmatprep.subr.bf16.mxu1 %v9291_v0 }
 0x2ac   : > { %v7741_v27 = vpop.f32.mrb[24].mxu1 }
 0x2ad   : > { %v7743_v58 = vpop.f32.mrb[25].mxu1 }
 0x2ae   : > { %v7745_v20 = vpop.f32.mrb[26].mxu1  ;;  %5910 = vmatpush1.bf16.msra.mxu1 %v5909_v5 }
 0x2af   : > { %v7748_v49 = vpop.f32.mrb[27].mxu1  ;;  %5911 = vmatprep.subr.bf16.mxu1 %v9291_v0 }
 0x2b2   : > { %v7751_v38 = vpop.f32.mrb[28].mxu1  ;;  %5913 = vmatpush1.bf16.msra.mxu1 %v5912_v28 }
 0x2b3   : > { %v7754_v19 = vpop.f32.mrb[29].mxu1  ;;  %5914 = vmatprep.subr.bf16.mxu1 %v9291_v0  ;;  %v3745_v0 = vld [vmem:[#allocation9 + $0x40] sm:$0xff] }
 0x2ec   : > { %v7757_v51 = vpop.f32.mrb[30].mxu1 }
 0x2ed   : > { %v7759_v29 = vpop.f32.mrb[31].mxu1 }
 0x302   : > { %v2234_v2 = vpop.f32.mrb[0].mxu0 }
 0x303   : > { %v7762_v41 = vadd.f32 %v7683_v14, %v2234_v2  ;;  %v2236_v5 = vpop.f32.mrb[1].mxu0  ;;  %v5915_v14 = vpack.c.bf16 %v3746_v36, %v3745_v0 }
 0x304   : > { %v9378_v5 = vmov 0.0|0.0  }
 0x305   : > { %5916 = vmatpush1.bf16.msra.mxu1 %v5915_v14  ;;  %v3751_v14 = vld [vmem:[#allocation9 + $0x70] sm:$0xff] }
 0x306   : > { %v2239_v44 = vpop.f32.mrb[2].mxu0  ;;  %5917 = vmatprep.subr.bf16.mxu1 %v9378_v5 }
 0x307   : > { %v7765_v4 = vadd.f32 %v7681_v23, %v2239_v44  ;;  %v2241_v61 = vpop.f32.mrb[3].mxu0  ;;  %v3747_v23 = vld [vmem:[#allocation9 + $0x50] sm:$0xff]  ;;  %v3748_v44 = vld [vmem:[#allocation9 + $0x58] sm:$0xff] }
 0x30a   : > { %v2244_v43 = vpop.f32.mrb[4].mxu0 }
 0x30b   : > { %v7768_v6 = vadd.f32 %v7687_v34, %v2244_v43  ;;  %v2246_v28 = vpop.f32.mrb[5].mxu0  ;;  %v5918_v34 = vpack.c.bf16 %v3748_v44, %v3747_v23 }
 0x30d   : > { %5919 = vmatpush1.bf16.msra.mxu1 %v5918_v34  ;;  %v3753_v34 = vld [vmem:[#allocation9 + $0x80] sm:$0xff] }
 0x30e   : > { %v2249_v12 = vpop.f32.mrb[6].mxu0  ;;  %5920 = vmatprep.subr.bf16.mxu1 %v9378_v5 }
 0x30f   : > { %v7771_v16 = vadd.f32 %v7685_v15, %v2249_v12  ;;  %v2251_v10 = vpop.f32.mrb[7].mxu0  ;;  %v3750_v15 = vld [vmem:[#allocation9 + $0x68] sm:$0xff] }
 0x310   : > { %v5921_v36 = vpack.c.bf16 %v3750_v15, %v3749_v35 }
 0x312   : > { %v2254_v2 = vpop.f32.mrb[8].mxu0  ;;  %5922 = vmatpush1.bf16.msra.mxu1 %v5921_v36  ;;  %v3755_v36 = vld [vmem:[#allocation9 + $0x90] sm:$0xff] }
 0x313   : > { %v7775_v61 = vadd.f32 %v7691_v33, %v2254_v2  ;;  %v2256_v43 = vpop.f32.mrb[9].mxu0  ;;  %5923 = vmatprep.subr.bf16.mxu1 %v9378_v5  ;;  %v3752_v33 = vld [vmem:[#allocation9 + $0x78] sm:$0xff] }
 0x314   : > { %v5924_v44 = vpack.c.bf16 %v3752_v33, %v3751_v14 }
 0x316   : > { %v2259_v28 = vpop.f32.mrb[10].mxu0  ;;  %5925 = vmatpush1.bf16.msra.mxu1 %v5924_v44  ;;  %v3757_v44 = vld [vmem:[#allocation9 + $0xa0] sm:$0xff] }
 0x317   : > { %v7779_v10 = vadd.f32 %v7689_v7, %v2259_v28  ;;  %v2261_v0 = vpop.f32.mrb[11].mxu0  ;;  %5926 = vmatprep.subr.bf16.mxu1 %v9378_v5  ;;  %v3754_v7 = vld [vmem:[#allocation9 + $0x88] sm:$0xff] }
 0x318   : > { %v5927_v15 = vpack.c.bf16 %v3754_v7, %v3753_v34 }
 0x31a   : > { %v2264_v12 = vpop.f32.mrb[12].mxu0  ;;  %5928 = vmatpush1.bf16.msra.mxu1 %v5927_v15  ;;  %v3759_v15 = vld [vmem:[#allocation9 + $0xb0] sm:$0xff] }
 0x31b   : > { %v7783_v2 = vadd.f32 %v7695_v45, %v2264_v12  ;;  %v2266_v23 = vpop.f32.mrb[13].mxu0  ;;  %5929 = vmatprep.subr.bf16.mxu1 %v9378_v5  ;;  %v3756_v45 = vld [vmem:[#allocation9 + $0x98] sm:$0xff] }
 0x31c   : > { %v5930_v33 = vpack.c.bf16 %v3756_v45, %v3755_v36  ;;  %v3865_v45 = vld [vmem:[#allocation9 + $0x400] sm:$0xff] }
 0x31e   : > { %v2269_v43 = vpop.f32.mrb[14].mxu0  ;;  %5931 = vmatpush1.bf16.msra.mxu1 %v5930_v33 }
 0x31f   : > { %v7787_v28 = vadd.f32 %v7693_v22, %v2269_v43  ;;  %v2271_v35 = vpop.f32.mrb[15].mxu0  ;;  %5932 = vmatprep.subr.bf16.mxu1 %v9378_v5  ;;  %v3758_v22 = vld [vmem:[#allocation9 + $0xa8] sm:$0xff] }
 0x320   : > { %v5933_v7 = vpack.c.bf16 %v3758_v22, %v3757_v44  ;;  %v3762_v44 = vld [vmem:[#allocation9 + $0xc8] sm:$0xff] }
 0x322   : > { %v2274_v0 = vpop.f32.mrb[16].mxu0  ;;  %5934 = vmatpush1.bf16.msra.mxu1 %v5933_v7  ;;  %v3868_v7 = vld [vmem:[#allocation9 + $0x418] sm:$0xff] }
 0x323   : > { %v7791_v12 = vadd.f32 %v7706_v59, %v2274_v0  ;;  %v2276_v14 = vpop.f32.mrb[17].mxu0  ;;  %5935 = vmatprep.subr.bf16.mxu1 %v9378_v5  ;;  %v3760_v59 = vld [vmem:[#allocation9 + $0xb8] sm:$0xff] }
 0x324   : > { %v3866_v14 = vld [vmem:[#allocation9 + $0x408] sm:$0xff]  ;;  %v5936_v33 = vpack.c.bf16 %v3760_v59, %v3759_v15 }
 0x325   : > { %v7801_v13 = vpack.c.bf16 %v3866_v14, %v3865_v45  ;;  %v3764_v45 = vld [vmem:[#allocation9 + $0xd8] sm:$0xff] }
 0x326   : > { %v2279_v23 = vpop.f32.mrb[18].mxu0  ;;  %5937 = vmatpush1.bf16.msra.mxu1 %v5936_v33  ;;  %v3869_v33 = vld [vmem:[#allocation9 + $0x420] sm:$0xff] }
 0x327   : > { %v7795_v43 = vadd.f32 %v7704_v26, %v2279_v23  ;;  %v2281_v34 = vpop.f32.mrb[19].mxu0  ;;  %9379 = vst [vmem:[#allocation47_spill] sm:$0xff] %v7801_v13  ;;  %6095 = vmatprep.subr.bf16.mxu0 %v7801_v13  ;;  %5938 = vmatprep.subr.bf16.mxu1 %v9378_v5  ;;  %v3761_v23 = vld [vmem:[#allocation9 + $0xc0] sm:$0xff] }
 0x328   : > { %6097 = vmatpush3.bf16.msra.mxu0 %v7801_v13 }
 0x32a   : > { %v2284_v35 = vpop.f32.mrb[20].mxu0 }
 0x32b   : > { %v7799_v0 = vadd.f32 %v7714_v39, %v2284_v35  ;;  %v2286_v36 = vpop.f32.mrb[21].mxu0  ;;  %v3867_v39 = vld [vmem:[#allocation9 + $0x410] sm:$0xff]  ;;  %v5939_v35 = vpack.c.bf16 %v3762_v44, %v3761_v23 }
 0x32c   : > { %v7809_v15 = vpack.c.bf16 %v3868_v7, %v3867_v39  ;;  %v3763_v36 = vld [vmem:[#allocation9 + $0xd0] sm:$0xff]  ;;  %v3765_v39 = vld [vmem:[#allocation9 + $0xe0] sm:$0xff]  ;;  %v3766_v7 = vld [vmem:[#allocation9 + $0xe8] sm:$0xff] }
 0x32d   : > { %5940 = vmatpush1.bf16.msra.mxu1 %v5939_v35  ;;  %v5945_v3 = vpack.c.bf16 %v3766_v7, %v3765_v39  ;;  %v3873_v39 = vld [vmem:[#allocation9 + $0x440] sm:$0xff]  ;;  %v3874_v7 = vld [vmem:[#allocation9 + $0x448] sm:$0xff] }
 0x32e   : > { %v2289_v26 = vpop.f32.mrb[22].mxu0  ;;  %9380 = vst [vmem:[#allocation48_spill] sm:$0xff] %v7809_v15  ;;  %6099 = vmatprep.subr.bf16.mxu0 %v7809_v15  ;;  %5941 = vmatprep.subr.bf16.mxu1 %v9378_v5 }
 0x32f   : > { %v7806_v22 = vadd.f32 %v7712_v55, %v2289_v26  ;;  %v2291_v34 = vpop.f32.mrb[23].mxu0  ;;  %6101 = vmatpush3.bf16.msra.mxu0 %v7809_v15  ;;  %v3870_v26 = vld [vmem:[#allocation9 + $0x428] sm:$0xff]  ;;  %v3804_v15 = vld [vmem:[#allocation9 + $0x218] sm:$0xff] }
 0x330   : > { %v5942_v34 = vpack.c.bf16 %v3764_v45, %v3763_v36  ;;  %v7817_v23 = vpack.c.bf16 %v3870_v26, %v3869_v33  ;;  %v3767_v33 = vld [vmem:[#allocation9 + $0xf0] sm:$0xff]  ;;  %v3768_v26 = vld [vmem:[#allocation9 + $0xf8] sm:$0xff] }
 0x332   : > { %v2294_v59 = vpop.f32.mrb[24].mxu0  ;;  %9381 = vst [vmem:[#allocation49_spill] sm:$0xff] %v7817_v23  ;;  %5943 = vmatpush1.bf16.msra.mxu1 %v5942_v34  ;;  %6103 = vmatprep.subr.bf16.mxu0 %v7817_v23 }
 0x333   : > { %v7814_v14 = vadd.f32 %v7719_v8, %v2294_v59  ;;  %v2296_v55 = vpop.f32.mrb[25].mxu0  ;;  %5944 = vmatprep.subr.bf16.mxu1 %v9378_v5  ;;  %6105 = vmatpush3.bf16.msra.mxu0 %v7817_v23  ;;  %v3871_v59 = vld [vmem:[#allocation9 + $0x430] sm:$0xff] }
 0x334   : > { %v3872_v55 = vld [vmem:[#allocation9 + $0x438] sm:$0xff]  ;;  %v3803_v23 = vld [vmem:[#allocation9 + $0x210] sm:$0xff] }
 0x335   : > { %v7825_v36 = vpack.c.bf16 %v3872_v55, %v3871_v59  ;;  %v2618_v59 = vmul.f32 %v7762_v41, %v7762_v41  ;;  %v2620_v55 = vmul.f32 %v7768_v6, %v7768_v6  ;;  %v6002_v13 = vpack.c.bf16 %v3804_v15, %v3803_v23  ;;  %v3809_v23 = vld [vmem:[#allocation9 + $0x240] sm:$0xff] }
 0x336   : > { %v2299_v44 = vpop.f32.mrb[26].mxu0  ;;  %5946 = vmatpush1.bf16.msra.mxu1 %v5945_v3  ;;  %v7835_v3 = vpack.c.bf16 %v3874_v7, %v3873_v39  ;;  %v3875_v39 = vld [vmem:[#allocation9 + $0x450] sm:$0xff]  ;;  %v3876_v7 = vld [vmem:[#allocation9 + $0x458] sm:$0xff] }
 0x337   : > { %v7822_v35 = vadd.f32 %v7717_v40, %v2299_v44  ;;  %v2301_v8 = vpop.f32.mrb[27].mxu0  ;;  %9382 = vst [vmem:[#allocation50_spill] sm:$0xff] %v7825_v36  ;;  %6107 = vmatprep.subr.bf16.mxu0 %v7825_v36  ;;  %5947 = vmatprep.subr.bf16.mxu1 %v9378_v5  ;;  %v2619_v40 = vmul.f32 %v7765_v4, %v7765_v4 }
 0x338   : > { %6109 = vmatpush3.bf16.msra.mxu0 %v7825_v36  ;;  %v5948_v8 = vpack.c.bf16 %v3768_v26, %v3767_v33  ;;  %9383 = vst [vmem:[#allocation51_spill] sm:$0xff] %v7835_v3 }
 0x339   : > { %6111 = vmatprep.subr.bf16.mxu0 %v7835_v3 }
 0x33a   : > { %v2304_v45 = vpop.f32.mrb[28].mxu0  ;;  %5949 = vmatpush1.bf16.msra.mxu1 %v5948_v8  ;;  %v7849_v8 = vpack.c.bf16 %v3876_v7, %v3875_v39  ;;  %v3877_v39 = vld [vmem:[#allocation9 + $0x460] sm:$0xff]  ;;  %v3878_v7 = vld [vmem:[#allocation9 + $0x468] sm:$0xff] }
 0x33b   : > { %v7832_v34 = vadd.f32 %v7723_v46, %v2304_v45  ;;  %v2306_v44 = vpop.f32.mrb[29].mxu0  ;;  %v2937_v46 = vld [vmem:[#allocation2 + $0x1] sm:$0xff]  ;;  %5950 = vmatprep.subr.bf16.mxu1 %v9378_v5  ;;  %v2650_v45 = vadd.f32 %v2619_v40, %v2618_v59  ;;  %v2622_v40 = vmul.f32 %v7775_v61, %v7775_v61 }
 0x33c   : > { %v2621_v44 = vmul.f32 %v7771_v16, %v7771_v16  ;;  %6113 = vmatpush3.bf16.msra.mxu0 %v7835_v3  ;;  %3945 = vmatprep.mubr.f32.mxu1 %v2937_v46  ;;  %9384 = vst [vmem:[#allocation52_spill] sm:$0xff] %v7849_v8 }
 0x33d   : > { %3946 = vmatmul.mubr.f32.vlgmr.msra.gmra.mrb[32].mxu1 %v7709_v37  ;;  %v2651_v57 = vadd.f32 %v2650_v45, %v2620_v55  ;;  %6115 = vmatprep.subr.bf16.mxu0 %v7849_v8  ;;  %v7861_v55 = vpack.c.bf16 %v3878_v7, %v3877_v39  ;;  %v3772_v7 = vld [vmem:[#allocation9 + $0x118] sm:$0xff] }
 0x33e   : > { %v2309_v62 = vpop.f32.mrb[30].mxu0  ;;  %3950 = vmatprep.mubr.f32.mxu1 %v2938_v53  ;;  %v2625_v53 = vmul.f32 %v7787_v28, %v7787_v28 }
 0x33f   : > { %v7846_v33 = vadd.f32 %v7721_v21, %v2309_v62  ;;  %v2311_v26 = vpop.f32.mrb[31].mxu0  ;;  %v2652_v62 = vadd.f32 %v2651_v57, %v2621_v44  ;;  %v2623_v21 = vmul.f32 %v7779_v10, %v7779_v10  ;;  %9385 = vst [vmem:[#allocation53_spill] sm:$0xff] %v7861_v55  ;;  %v2624_v57 = vmul.f32 %v7783_v2, %v7783_v2  ;;  %v3769_v44 = vld [vmem:[#allocation9 + $0x100] sm:$0xff] }
 0x340   : > { %6117 = vmatpush3.bf16.msra.mxu0 %v7849_v8 }
 0x341   : > { %3951 = vmatmul.mubr.f32.gmra.mrb[34].mxu1 %v7709_v37  ;;  %v2653_v45 = vadd.f32 %v2652_v62, %v2622_v40  ;;  %6119 = vmatprep.subr.bf16.mxu0 %v7861_v55  ;;  %v3771_v62 = vld [vmem:[#allocation9 + $0x110] sm:$0xff] }
 0x342   : > { %v2314_v59 = vpop.f32.mrb[32].mxu0 }
 0x343   : > { %v7858_v26 = vadd.f32 %v7727_v48, %v2314_v59  ;;  %v2316_v46 = vpop.f32.mrb[33].mxu0  ;;  %v5951_v48 = vpack.c.bf16 %v3770_v63, %v3769_v44  ;;  %v3880_v59 = vld [vmem:[#allocation9 + $0x478] sm:$0xff]  ;;  %v2626_v63 = vmul.f32 %v7791_v12, %v7791_v12 }
 0x344   : > { %v2654_v46 = vadd.f32 %v2653_v45, %v2623_v21  ;;  %6121 = vmatpush3.bf16.msra.mxu0 %v7861_v55  ;;  %v7873_v40 = vpack.c.bf16 %v3880_v59, %v3879_v17  ;;  %v5954_v21 = vpack.c.bf16 %v3772_v7, %v3771_v62  ;;  %v3774_v62 = vld [vmem:[#allocation9 + $0x128] sm:$0xff] }
 0x345   : > { %5952 = vmatpush1.bf16.msra.mxu1 %v5951_v48  ;;  %v2628_v48 = vmul.f32 %v7799_v0, %v7799_v0 }
 0x346   : > { %v2319_v54 = vpop.f32.mrb[34].mxu0  ;;  %9386 = vst [vmem:[#allocation54_spill] sm:$0xff] %v7873_v40  ;;  %v2655_v60 = vadd.f32 %v2654_v46, %v2624_v57  ;;  %6123 = vmatprep.subr.bf16.mxu0 %v7873_v40  ;;  %5953 = vmatprep.subr.bf16.mxu1 %v9378_v5 }
 0x347   : > { %v7870_v39 = vadd.f32 %v7725_v50, %v2319_v54  ;;  %v2321_v37 = vpop.f32.mrb[35].mxu0  ;;  %v2627_v50 = vmul.f32 %v7795_v43, %v7795_v43 }
 0x348   : > { %v2656_v54 = vadd.f32 %v2655_v60, %v2625_v53  ;;  %6125 = vmatpush3.bf16.msra.mxu0 %v7873_v40  ;;  %v2629_v60 = vmul.f32 %v7806_v22, %v7806_v22  ;;  %v3773_v37 = vld [vmem:[#allocation9 + $0x120] sm:$0xff] }
 0x349   : > { %5955 = vmatpush1.bf16.msra.mxu1 %v5954_v21  ;;  %v5957_v21 = vpack.c.bf16 %v3774_v62, %v3773_v37  ;;  %v3775_v62 = vld [vmem:[#allocation9 + $0x130] sm:$0xff] }
 0x34a   : > { %v2324_v45 = vpop.f32.mrb[36].mxu0  ;;  %v2657_v57 = vadd.f32 %v2656_v54, %v2626_v63  ;;  %5956 = vmatprep.subr.bf16.mxu1 %v9378_v5  ;;  %v2630_v63 = vmul.f32 %v7814_v14, %v7814_v14 }
 0x34b   : > { %v7882_v17 = vadd.f32 %v7731_v25, %v2324_v45  ;;  %v2326_v44 = vpop.f32.mrb[37].mxu0 }
 0x34c   : > { %v2658_v46 = vadd.f32 %v2657_v57, %v2627_v50  ;;  %v2631_v44 = vmul.f32 %v7822_v35, %v7822_v35 }
 0x34d   : > { %5958 = vmatpush1.bf16.msra.mxu1 %v5957_v21  ;;  %v2634_v21 = vmul.f32 %v7858_v26, %v7858_v26 }
 0x34e   : > { %v2329_v59 = vpop.f32.mrb[38].mxu0  ;;  %v2659_v7 = vadd.f32 %v2658_v46, %v2628_v48  ;;  %5959 = vmatprep.subr.bf16.mxu1 %v9378_v5  ;;  %v2632_v48 = vmul.f32 %v7832_v34, %v7832_v34 }
 0x34f   : > { %v7891_v53 = vadd.f32 %v7729_v11, %v2329_v59  ;;  %v2331_v25 = vpop.f32.mrb[39].mxu0 }
 0x350   : > { %v2660_v54 = vadd.f32 %v2659_v7, %v2629_v60  ;;  %v2633_v25 = vmul.f32 %v7846_v33, %v7846_v33 }
 0x352   : > { %v2334_v45 = vpop.f32.mrb[40].mxu0  ;;  %v2661_v11 = vadd.f32 %v2660_v54, %v2630_v63 }
 0x353   : > { %v7898_v50 = vadd.f32 %v7735_v32, %v2334_v45  ;;  %v2336_v57 = vpop.f32.mrb[41].mxu0  ;;  %v3776_v32 = vld [vmem:[#allocation9 + $0x138] sm:$0xff] }
 0x354   : > { %v2662_v46 = vadd.f32 %v2661_v11, %v2631_v44  ;;  %v5960_v45 = vpack.c.bf16 %v3776_v32, %v3775_v62  ;;  %v2635_v57 = vmul.f32 %v7870_v39, %v7870_v39  ;;  %v3777_v32 = vld [vmem:[#allocation9 + $0x140] sm:$0xff] }
 0x356   : > { %v2339_v59 = vpop.f32.mrb[42].mxu0  ;;  %v2663_v7 = vadd.f32 %v2662_v46, %v2632_v48  ;;  %5961 = vmatpush1.bf16.msra.mxu1 %v5960_v45  ;;  %v2636_v48 = vmul.f32 %v7882_v17, %v7882_v17  ;;  %v2638_v45 = vmul.f32 %v7898_v50, %v7898_v50 }
 0x357   : > { %v7906_v60 = vadd.f32 %v7733_v30, %v2339_v59  ;;  %v2341_v37 = vpop.f32.mrb[43].mxu0  ;;  %5962 = vmatprep.subr.bf16.mxu1 %v9378_v5 }
 0x358   : > { %v2664_v54 = vadd.f32 %v2663_v7, %v2633_v25  ;;  %v2637_v37 = vmul.f32 %v7891_v53, %v7891_v53 }
 0x35a   : > { %v2344_v63 = vpop.f32.mrb[44].mxu0  ;;  %v2665_v30 = vadd.f32 %v2664_v54, %v2634_v21 }
 0x35b   : > { %v7913_v44 = vadd.f32 %v7739_v52, %v2344_v63  ;;  %v2346_v11 = vpop.f32.mrb[45].mxu0  ;;  %v3778_v52 = vld [vmem:[#allocation9 + $0x148] sm:$0xff] }
 0x35c   : > { %v2666_v46 = vadd.f32 %v2665_v30, %v2635_v57  ;;  %v5963_v63 = vpack.c.bf16 %v3778_v52, %v3777_v32  ;;  %v2639_v11 = vmul.f32 %v7906_v60, %v7906_v60  ;;  %v3779_v52 = vld [vmem:[#allocation9 + $0x150] sm:$0xff] }
 0x35e   : > { %v2349_v59 = vpop.f32.mrb[46].mxu0  ;;  %v2667_v7 = vadd.f32 %v2666_v46, %v2636_v48  ;;  %5964 = vmatpush1.bf16.msra.mxu1 %v5963_v63  ;;  %v2640_v48 = vmul.f32 %v7913_v44, %v7913_v44 }
 0x35f   : > { %v7921_v25 = vadd.f32 %v7737_v24, %v2349_v59  ;;  %v2351_v62 = vpop.f32.mrb[47].mxu0  ;;  %5965 = vmatprep.subr.bf16.mxu1 %v9378_v5 }
 0x360   : > { %v2668_v54 = vadd.f32 %v2667_v7, %v2637_v37 }
 0x361   : > { %v2641_v62 = vmul.f32 %v7921_v25, %v7921_v25 }
 0x362   : > { %v2354_v21 = vpop.f32.mrb[48].mxu0  ;;  %v2669_v24 = vadd.f32 %v2668_v54, %v2638_v45 }
 0x363   : > { %v7928_v57 = vadd.f32 %v7743_v58, %v2354_v21  ;;  %v2356_v30 = vpop.f32.mrb[49].mxu0  ;;  %v3780_v58 = vld [vmem:[#allocation9 + $0x158] sm:$0xff] }
 0x364   : > { %v2670_v46 = vadd.f32 %v2669_v24, %v2639_v11  ;;  %v5966_v21 = vpack.c.bf16 %v3780_v58, %v3779_v52  ;;  %v3781_v52 = vld [vmem:[#allocation9 + $0x160] sm:$0xff]  ;;  %v3782_v58 = vld [vmem:[#allocation9 + $0x168] sm:$0xff] }
 0x365   : > { %v2642_v63 = vmul.f32 %v7928_v57, %v7928_v57 }
 0x366   : > { %v2359_v59 = vpop.f32.mrb[50].mxu0  ;;  %v2671_v7 = vadd.f32 %v2670_v46, %v2640_v48  ;;  %5967 = vmatpush1.bf16.msra.mxu1 %v5966_v21 }
 0x367   : > { %v7936_v37 = vadd.f32 %v7741_v27, %v2359_v59  ;;  %v2361_v32 = vpop.f32.mrb[51].mxu0  ;;  %5968 = vmatprep.subr.bf16.mxu1 %v9378_v5 }
 0x368   : > { %v2672_v54 = vadd.f32 %v2671_v7, %v2641_v62 }
 0x369   : > { %v2643_v30 = vmul.f32 %v7936_v37, %v7936_v37 }
 0x36a   : > { %v2364_v45 = vpop.f32.mrb[52].mxu0  ;;  %v2673_v27 = vadd.f32 %v2672_v54, %v2642_v63 }
 0x36b   : > { %v7943_v11 = vadd.f32 %v7748_v49, %v2364_v45  ;;  %v2366_v24 = vpop.f32.mrb[53].mxu0  ;;  %v5969_v45 = vpack.c.bf16 %v3782_v58, %v3781_v52 }
 0x36c   : > { %v2674_v46 = vadd.f32 %v2673_v27, %v2643_v30 }
 0x36d   : > { %v2644_v48 = vmul.f32 %v7943_v11, %v7943_v11  ;;  %5970 = vmatpush1.bf16.msra.mxu1 %v5969_v45 }
 0x36e   : > { %v2369_v59 = vpop.f32.mrb[54].mxu0  ;;  %5971 = vmatprep.subr.bf16.mxu1 %v9378_v5 }
 0x36f   : > { %v7949_v32 = vadd.f32 %v7745_v20, %v2369_v59  ;;  %v2371_v62 = vpop.f32.mrb[55].mxu0  ;;  %v2675_v7 = vadd.f32 %v2674_v46, %v2644_v48  ;;  %v3783_v46 = vld [vmem:[#allocation9 + $0x170] sm:$0xff] }
 0x370   : > { %v3784_v62 = vld [vmem:[#allocation9 + $0x178] sm:$0xff] }
 0x371   : > { %v2645_v49 = vmul.f32 %v7949_v32, %v7949_v32  ;;  %v5972_v52 = vpack.c.bf16 %v3784_v62, %v3783_v46 }
 0x372   : > { %v2374_v21 = vpop.f32.mrb[56].mxu0 }
 0x373   : > { %v2676_v24 = vadd.f32 %v2675_v7, %v2645_v49  ;;  %v7954_v63 = vadd.f32 %v7754_v19, %v2374_v21  ;;  %v2376_v54 = vpop.f32.mrb[57].mxu0  ;;  %5973 = vmatpush1.bf16.msra.mxu1 %v5972_v52 }
 0x374   : > { %5974 = vmatprep.subr.bf16.mxu1 %v9378_v5 }
 0x375   : > { %v2646_v20 = vmul.f32 %v7954_v63, %v7954_v63 }
 0x376   : > { %v2379_v30 = vpop.f32.mrb[58].mxu0 }
 0x377   : > { %v2677_v27 = vadd.f32 %v2676_v24, %v2646_v20  ;;  %v7960_v48 = vadd.f32 %v7751_v38, %v2379_v30  ;;  %v2381_v59 = vpop.f32.mrb[59].mxu0  ;;  %v3785_v30 = vld [vmem:[#allocation9 + $0x180] sm:$0xff] }
 0x378   : > { %v3786_v59 = vld [vmem:[#allocation9 + $0x188] sm:$0xff] }
 0x379   : > { %v2647_v19 = vmul.f32 %v7960_v48, %v7960_v48  ;;  %v5975_v46 = vpack.c.bf16 %v3786_v59, %v3785_v30  ;;  %v2694_v59 = vlaneseq }
 0x37a   : > { %v2384_v58 = vpop.f32.mrb[60].mxu0 }
 0x37b   : > { %v2678_v7 = vadd.f32 %v2677_v27, %v2647_v19  ;;  %v7965_v49 = vadd.f32 %v7759_v29, %v2384_v58  ;;  %v2386_v45 = vpop.f32.mrb[61].mxu0  ;;  %5976 = vmatpush1.bf16.msra.mxu1 %v5975_v46  ;;  %v3787_v19 = vld [vmem:[#allocation9 + $0x190] sm:$0xff]  ;;  %v3788_v58 = vld [vmem:[#allocation9 + $0x198] sm:$0xff] }
 0x37c   : > { %5977 = vmatprep.subr.bf16.mxu1 %v9378_v5  ;;  %v5978_v45 = vpack.c.bf16 %v3788_v58, %v3787_v19  ;;  %v3791_v46 = vld [vmem:[#allocation9 + $0x1b0] sm:$0xff]  ;;  %v3793_v19 = vld [vmem:[#allocation9 + $0x1c0] sm:$0xff]  ;;  %v3794_v58 = vld [vmem:[#allocation9 + $0x1c8] sm:$0xff] }
 0x37d   : > { %v2648_v38 = vmul.f32 %v7965_v49, %v7965_v49 }
 0x37e   : > { %v2389_v21 = vpop.f32.mrb[62].mxu0 }
 0x37f   : > { %v2679_v24 = vadd.f32 %v2678_v7, %v2648_v38  ;;  %v2615_v54 = vadd.f32 %v7757_v51, %v2389_v21  ;;  %v2391_v20 = vpop.f32.mrb[63].mxu0  ;;  %5979 = vmatpush1.bf16.msra.mxu1 %v5978_v45  ;;  %v3789_v38 = vld [vmem:[#allocation9 + $0x1a0] sm:$0xff]  ;;  %v3790_v21 = vld [vmem:[#allocation9 + $0x1a8] sm:$0xff] }
 0x380   : > { %5980 = vmatprep.subr.bf16.mxu1 %v9378_v5  ;;  %v5981_v20 = vpack.c.bf16 %v3790_v21, %v3789_v38  ;;  %v7986_v38 = vld [vmem:[%s9267_s4] ss:$0 sm:$0xff] }
 0x381   : > { %v2649_v62 = vmul.f32 %v2615_v54, %v2615_v54 }
 0x383   : > { %v2680_v27 = vadd.f32 %v2679_v24, %v2649_v62  ;;  %5982 = vmatpush1.bf16.msra.mxu1 %v5981_v20  ;;  %v3792_v62 = vld [vmem:[#allocation9 + $0x1b8] sm:$0xff] }
 0x384   : > { %5983 = vmatprep.subr.bf16.mxu1 %v9378_v5 }
 0x385   : > { %v2681_v29 = vrot.slane %v2680_v27, 4 }
 0x387   : > { %v2682_v52 = vadd.f32 %v2681_v29, %v2680_v27  ;;  %v5984_v27 = vpack.c.bf16 %v3792_v62, %v3791_v46  ;;  %v7974_v29 = vshrl.u32 %v2694_v59, 7  ;;  %v7995_v59 = vld [vmem:[%s9268_s5] ss:$0 sm:$0xff] }
 0x389   : > { %v2683_v56 = vrot.slane %v2682_v52, 2  ;;  %9387 = vst [vmem:[#allocation55_spill] sm:$0xff] %v7974_v29  ;;  %5985 = vmatpush1.bf16.msra.mxu1 %v5984_v27 }
 0x38a   : > { %5986 = vmatprep.subr.bf16.mxu1 %v9378_v5 }
 0x38b   : > { %v2684_v9 = vadd.f32 %v2683_v56, %v2682_v52  ;;  %v9308_v56 = vsub.s32 0, %v7974_v29 }
 0x38d   : > { %v2685_v51 = vrot.slane %v2684_v9, 1 }
 0x38f   : > { %v2686_v7 = vadd.f32 %v2685_v51, %v2684_v9  ;;  %v2689_v9 = vld [vmem:[%s9266_s3] sm:$0x1]  ;;  %v5987_v51 = vpack.c.bf16 %v3794_v58, %v3793_v19 }
 0x391   : > { %v2688_v30 = vmul.f32 0.00390625, %v2686_v7  ;;  %5988 = vmatpush1.bf16.msra.mxu1 %v5987_v51 }
 0x392   : > { %5989 = vmatprep.subr.bf16.mxu1 %v9378_v5 }
 0x393   : > { %v2690_v24 = vadd.f32 1e-06, %v2688_v30 }
 0x395   : > { %6599 = vrsqrt.f32 %v2690_v24 }
 0x39f   : > { %v6600_v52 = vpop.eup %6599 }
 0x3a0   : > { %v2692_v45 = vmul.f32 %v6600_v52, %v2689_v9 }
 0x3a2   : > { %v2697_v7 = vrot.slane %v2692_v45, %v9308_v56 }
 0x3a4   : > { %v2730_v21 = vmul.f32 %v2697_v7, %v2615_v54  ;;  %v2699_v20 = vmul.f32 %v2697_v7, %v7762_v41  ;;  %v2700_v30 = vmul.f32 %v2697_v7, %v7765_v4  ;;  %v2701_v24 = vmul.f32 %v2697_v7, %v7768_v6 }
 0x3a5   : > { %v2702_v46 = vmul.f32 %v2697_v7, %v7771_v16  ;;  %v2703_v62 = vmul.f32 %v2697_v7, %v7775_v61  ;;  %v2704_v27 = vmul.f32 %v2697_v7, %v7779_v10  ;;  %v2705_v9 = vmul.f32 %v2697_v7, %v7783_v2 }
 0x3a6   : > { %v2769_v54 = vadd.f32 %v7986_v38, %v2730_v21  ;;  %v2706_v41 = vmul.f32 %v2697_v7, %v7787_v28  ;;  %v2707_v4 = vmul.f32 %v2697_v7, %v7791_v12  ;;  %v2708_v6 = vmul.f32 %v2697_v7, %v7795_v43 }
 0x3a7   : > { %v2709_v52 = vmul.f32 %v2697_v7, %v7799_v0  ;;  %v2710_v19 = vmul.f32 %v2697_v7, %v7806_v22  ;;  %v2711_v16 = vmul.f32 %v2697_v7, %v7814_v14  ;;  %v2712_v61 = vmul.f32 %v2697_v7, %v7822_v35 }
 0x3a8   : > { %v2808_v10 = vmax.f32 %v2769_v54, %v7995_v59  ;;  %v2713_v2 = vmul.f32 %v2697_v7, %v7832_v34  ;;  %v2714_v58 = vmul.f32 %v2697_v7, %v7846_v33  ;;  %v2715_v28 = vmul.f32 %v2697_v7, %v7858_v26 }
 0x3a9   : > { %v2716_v12 = vmul.f32 %v2697_v7, %v7870_v39  ;;  %v2717_v43 = vmul.f32 %v2697_v7, %v7882_v17  ;;  %v2718_v0 = vmul.f32 %v2697_v7, %v7891_v53  ;;  %v2719_v22 = vmul.f32 %v2697_v7, %v7898_v50 }
 0x3aa   : > { %v2840_v45 = vmax.f32 %v2808_v10, 0.0  ;;  %v2720_v14 = vmul.f32 %v2697_v7, %v7906_v60  ;;  %v2721_v35 = vmul.f32 %v2697_v7, %v7913_v44  ;;  %v2722_v51 = vmul.f32 %v2697_v7, %v7921_v25 }
 0x3ab   : > { %v2723_v34 = vmul.f32 %v2697_v7, %v7928_v57  ;;  %v2724_v33 = vmul.f32 %v2697_v7, %v7936_v37  ;;  %v2725_v26 = vmul.f32 %v2697_v7, %v7943_v11  ;;  %v2726_v39 = vmul.f32 %v2697_v7, %v7949_v32 }
 0x3ac   : > { %v2727_v17 = vmul.f32 %v2697_v7, %v7954_v63  ;;  %v2728_v53 = vmul.f32 %v2697_v7, %v7960_v48  ;;  %v2729_v50 = vmul.f32 %v2697_v7, %v7965_v49  ;;  %2872 = vst [vmem:[#allocation2 + $0x189] sm:$0xff] %v2840_v45  ;;  %v2738_v60 = vadd.f32 %v7986_v38, %v2699_v20 }
 0x3ad   : > { %v2739_v44 = vadd.f32 %v7986_v38, %v2700_v30  ;;  %v2740_v25 = vadd.f32 %v7986_v38, %v2701_v24  ;;  %v2741_v57 = vadd.f32 %v7986_v38, %v2702_v46  ;;  %v2742_v37 = vadd.f32 %v7986_v38, %v2703_v62 }
 0x3ae   : > { %v2743_v11 = vadd.f32 %v7986_v38, %v2704_v27  ;;  %v2744_v32 = vadd.f32 %v7986_v38, %v2705_v9  ;;  %v2745_v63 = vadd.f32 %v7986_v38, %v2706_v41  ;;  %v2746_v48 = vadd.f32 %v7986_v38, %v2707_v4 }
 0x3af   : > { %v2747_v49 = vadd.f32 %v7986_v38, %v2708_v6  ;;  %v2748_v7 = vadd.f32 %v7986_v38, %v2709_v52  ;;  %v8039_v21 = vadd.f32 %v7986_v38, %v2710_v19  ;;  %v8042_v20 = vadd.f32 %v7986_v38, %v2711_v16 }
 0x3b0   : > { %v8045_v30 = vadd.f32 %v7986_v38, %v2712_v61  ;;  %v8048_v24 = vadd.f32 %v7986_v38, %v2713_v2  ;;  %v8051_v46 = vadd.f32 %v7986_v38, %v2714_v58  ;;  %v8054_v62 = vadd.f32 %v7986_v38, %v2715_v28 }
 0x3b1   : > { %v8057_v27 = vadd.f32 %v7986_v38, %v2716_v12  ;;  %v8060_v9 = vadd.f32 %v7986_v38, %v2717_v43  ;;  %v8063_v54 = vadd.f32 %v7986_v38, %v2718_v0  ;;  %v8066_v41 = vadd.f32 %v7986_v38, %v2719_v22 }
 0x3b2   : > { %v8069_v4 = vadd.f32 %v7986_v38, %v2720_v14  ;;  %v8072_v6 = vadd.f32 %v7986_v38, %v2721_v35  ;;  %v8075_v52 = vadd.f32 %v7986_v38, %v2722_v51  ;;  %v8078_v19 = vadd.f32 %v7986_v38, %v2723_v34 }
 0x3b3   : > { %v8081_v16 = vadd.f32 %v7986_v38, %v2724_v33  ;;  %v8084_v61 = vadd.f32 %v7986_v38, %v2725_v26  ;;  %v8087_v10 = vadd.f32 %v7986_v38, %v2726_v39  ;;  %v8090_v2 = vadd.f32 %v7986_v38, %v2727_v17 }
 0x3b4   : > { %v8093_v58 = vadd.f32 %v7986_v38, %v2728_v53  ;;  %v8096_v28 = vadd.f32 %v7986_v38, %v2729_v50  ;;  %v2777_v12 = vmax.f32 %v2738_v60, %v7995_v59  ;;  %v2778_v43 = vmax.f32 %v2739_v44, %v7995_v59 }
 0x3b5   : > { %v2779_v0 = vmax.f32 %v2740_v25, %v7995_v59  ;;  %v2780_v22 = vmax.f32 %v2741_v57, %v7995_v59  ;;  %v2781_v45 = vmax.f32 %v2742_v37, %v7995_v59  ;;  %v2782_v14 = vmax.f32 %v2743_v11, %v7995_v59 }
 0x3b6   : > { %v2783_v35 = vmax.f32 %v2744_v32, %v7995_v59  ;;  %v2784_v51 = vmax.f32 %v2745_v63, %v7995_v59  ;;  %v2785_v34 = vmax.f32 %v2746_v48, %v7995_v59  ;;  %v2786_v38 = vmax.f32 %v2747_v49, %v7995_v59 }
 0x3b7   : > { %v2787_v33 = vmax.f32 %v2748_v7, %v7995_v59  ;;  %v2788_v26 = vmax.f32 %v8039_v21, %v7995_v59  ;;  %v2789_v39 = vmax.f32 %v8042_v20, %v7995_v59  ;;  %v2790_v17 = vmax.f32 %v8045_v30, %v7995_v59 }
 0x3b8   : > { %v2791_v53 = vmax.f32 %v8048_v24, %v7995_v59  ;;  %v2792_v50 = vmax.f32 %v8051_v46, %v7995_v59  ;;  %v2793_v60 = vmax.f32 %v8054_v62, %v7995_v59  ;;  %v2794_v44 = vmax.f32 %v8057_v27, %v7995_v59 }
 0x3b9   : > { %v2795_v25 = vmax.f32 %v8060_v9, %v7995_v59  ;;  %v2796_v57 = vmax.f32 %v8063_v54, %v7995_v59  ;;  %v2797_v37 = vmax.f32 %v8066_v41, %v7995_v59  ;;  %v2798_v11 = vmax.f32 %v8069_v4, %v7995_v59 }
 0x3ba   : > { %v2799_v32 = vmax.f32 %v8072_v6, %v7995_v59  ;;  %v2800_v63 = vmax.f32 %v8075_v52, %v7995_v59  ;;  %v2801_v48 = vmax.f32 %v8078_v19, %v7995_v59  ;;  %v2802_v49 = vmax.f32 %v8081_v16, %v7995_v59 }
 0x3bb   : > { %v2803_v7 = vmax.f32 %v8084_v61, %v7995_v59  ;;  %v2804_v21 = vmax.f32 %v8087_v10, %v7995_v59  ;;  %v2805_v20 = vmax.f32 %v8090_v2, %v7995_v59  ;;  %v2806_v30 = vmax.f32 %v8093_v58, %v7995_v59 }
 0x3bc   : > { %v2807_v24 = vmax.f32 %v8096_v28, %v7995_v59  ;;  %v2809_v46 = vmax.f32 %v2777_v12, 0.0  ;;  %v8149_v62 = vmax.f32 %v2778_v43, 0.0  ;;  %v8151_v27 = vmax.f32 %v2779_v0, 0.0 }
 0x3bd   : > { %v8153_v9 = vmax.f32 %v2780_v22, 0.0  ;;  %v8155_v54 = vmax.f32 %v2781_v45, 0.0  ;;  %v8157_v41 = vmax.f32 %v2782_v14, 0.0  ;;  %v8159_v4 = vmax.f32 %v2783_v35, 0.0  ;;  %v3795_v35 = vld [vmem:[#allocation9 + $0x1d0] sm:$0xff] }
 0x3be   : > { %v8161_v6 = vmax.f32 %v2784_v51, 0.0  ;;  %v8163_v52 = vmax.f32 %v2785_v34, 0.0  ;;  %v8165_v19 = vmax.f32 %v2786_v38, 0.0  ;;  %v8167_v59 = vmax.f32 %v2787_v33, 0.0  ;;  %2841 = vst [vmem:[#allocation2 + $0x19] sm:$0xff] %v2809_v46  ;;  %2842 = vst [vmem:[#allocation2 + $0x21] sm:$0xff] %v8149_v62  ;;  %3955 = vmatprep.mubr.f32.mxu1 %v2809_v46 }
 0x3bf   : > { %2843 = vst [vmem:[#allocation2 + $0x31] sm:$0xff] %v8151_v27  ;;  %v8171_v16 = vmax.f32 %v2788_v26, 0.0  ;;  %v8173_v61 = vmax.f32 %v2789_v39, 0.0  ;;  %v8175_v10 = vmax.f32 %v2790_v17, 0.0  ;;  %v8177_v2 = vmax.f32 %v2791_v53, 0.0  ;;  %2844 = vst [vmem:[#allocation2 + $0x39] sm:$0xff] %v8153_v9 }
 0x3c0   : > { %2845 = vst [vmem:[#allocation2 + $0x49] sm:$0xff] %v8155_v54  ;;  %2846 = vst [vmem:[#allocation2 + $0x51] sm:$0xff] %v8157_v41  ;;  %v8183_v58 = vmax.f32 %v2792_v50, 0.0  ;;  %v8185_v28 = vmax.f32 %v2793_v60, 0.0  ;;  %v8187_v12 = vmax.f32 %v2794_v44, 0.0  ;;  %v8189_v43 = vmax.f32 %v2795_v25, 0.0 }
 0x3c1   : > { %2847 = vst [vmem:[#allocation2 + $0x61] sm:$0xff] %v8159_v4  ;;  %2848 = vst [vmem:[#allocation2 + $0x69] sm:$0xff] %v8161_v6  ;;  %v8195_v0 = vmax.f32 %v2796_v57, 0.0  ;;  %v8197_v22 = vmax.f32 %v2797_v37, 0.0  ;;  %v8199_v45 = vmax.f32 %v2798_v11, 0.0  ;;  %v8201_v14 = vmax.f32 %v2799_v32, 0.0 }
 0x3c2   : > { %2849 = vst [vmem:[#allocation2 + $0x79] sm:$0xff] %v8163_v52  ;;  %2850 = vst [vmem:[#allocation2 + $0x81] sm:$0xff] %v8165_v19  ;;  %v3796_v51 = vld [vmem:[#allocation9 + $0x1d8] sm:$0xff]  ;;  %v8207_v34 = vmax.f32 %v2800_v63, 0.0  ;;  %v8209_v38 = vmax.f32 %v2801_v48, 0.0  ;;  %v8211_v33 = vmax.f32 %v2802_v49, 0.0 }
 0x3c3   : > { %2851 = vst [vmem:[#allocation2 + $0x91] sm:$0xff] %v8167_v59  ;;  %2852 = vst [vmem:[#allocation2 + $0x99] sm:$0xff] %v8171_v16  ;;  %v8213_v26 = vmax.f32 %v2803_v7, 0.0  ;;  %v8219_v39 = vmax.f32 %v2804_v21, 0.0  ;;  %v8221_v17 = vmax.f32 %v2805_v20, 0.0  ;;  %v8223_v53 = vmax.f32 %v2806_v30, 0.0 }
 0x3c4   : > { %2853 = vst [vmem:[#allocation2 + $0xa9] sm:$0xff] %v8173_v61  ;;  %2854 = vst [vmem:[#allocation2 + $0xb1] sm:$0xff] %v8175_v10  ;;  %v2839_v50 = vmax.f32 %v2807_v24, 0.0  ;;  %v5990_v60 = vpack.c.bf16 %v3796_v51, %v3795_v35  ;;  %v3797_v25 = vld [vmem:[#allocation9 + $0x1e0] sm:$0xff]  ;;  %v3798_v57 = vld [vmem:[#allocation9 + $0x1e8] sm:$0xff] }
 0x3c5   : > { %2855 = vst [vmem:[#allocation2 + $0xc1] sm:$0xff] %v8177_v2  ;;  %2856 = vst [vmem:[#allocation2 + $0xc9] sm:$0xff] %v8183_v58  ;;  %v8236_v44 = vld [vmem:[#allocation2 + $0x18] sm:$0xff]  ;;  %v5993_v63 = vpack.c.bf16 %v3798_v57, %v3797_v25  ;;  %v8249_v48 = vld [vmem:[#allocation2 + $0x20] sm:$0xff] }
 0x3c6   : > { %2857 = vst [vmem:[#allocation2 + $0xd9] sm:$0xff] %v8185_v28  ;;  %2858 = vst [vmem:[#allocation2 + $0xe1] sm:$0xff] %v8187_v12  ;;  %v8238_v37 = vld [vmem:[#allocation2 + $0x32] sm:$0xff]  ;;  %3956 = vmatmul.mubr.f32.gmra.mrb[36].mxu1 %v8236_v44  ;;  %v8241_v11 = vld [vmem:[#allocation2 + $0x3a] sm:$0xff] }
 0x3c7   : > { %2859 = vst [vmem:[#allocation2 + $0xf1] sm:$0xff] %v8189_v43  ;;  %2860 = vst [vmem:[#allocation2 + $0xf9] sm:$0xff] %v8195_v0  ;;  %5630 = vmatprep.mubr.f32.mxu0 %v8238_v37  ;;  %3960 = vmatprep.mubr.f32.mxu1 %v8149_v62  ;;  %v8246_v32 = vld [vmem:[#allocation2 + $0x4a] sm:$0xff]  ;;  %v3799_v49 = vld [vmem:[#allocation9 + $0x1f0] sm:$0xff] }
 0x3c8   : > { %2861 = vst [vmem:[#allocation2 + $0x109] sm:$0xff] %v8197_v22  ;;  %2862 = vst [vmem:[#allocation2 + $0x111] sm:$0xff] %v8199_v45  ;;  %5631 = vmatmul.mubr.f32.vlgmr.msra.gmra.mrb[64].mxu0 %v8241_v11  ;;  %5991 = vmatpush1.bf16.msra.mxu1 %v5990_v60  ;;  %v3800_v7 = vld [vmem:[#allocation9 + $0x1f8] sm:$0xff]  ;;  %v8253_v21 = vld [vmem:[#allocation2 + $0x52] sm:$0xff] }
 0x3c9   : > { %2863 = vst [vmem:[#allocation2 + $0x121] sm:$0xff] %v8201_v14  ;;  %2864 = vst [vmem:[#allocation2 + $0x129] sm:$0xff] %v8207_v34  ;;  %5633 = vmatprep.mubr.f32.mxu0 %v8246_v32  ;;  %5992 = vmatprep.subr.bf16.mxu1 %v9378_v5  ;;  %v8257_v20 = vld [vmem:[#allocation2 + $0x62] sm:$0xff]  ;;  %v5996_v30 = vpack.c.bf16 %v3800_v7, %v3799_v49  ;;  %v8260_v24 = vld [vmem:[#allocation2 + $0x30] sm:$0xff] }
 0x3ca   : > { %2865 = vst [vmem:[#allocation2 + $0x139] sm:$0xff] %v8209_v38  ;;  %2866 = vst [vmem:[#allocation2 + $0x141] sm:$0xff] %v8211_v33  ;;  %3961 = vmatmul.mubr.f32.gmra.mrb[38].mxu1 %v8249_v48  ;;  %v8264_v46 = vld [vmem:[#allocation2 + $0x6a] sm:$0xff]  ;;  %v8268_v62 = vld [vmem:[#allocation2 + $0x7a] sm:$0xff] }
 0x3cb   : > { %2867 = vst [vmem:[#allocation2 + $0x151] sm:$0xff] %v8213_v26  ;;  %2868 = vst [vmem:[#allocation2 + $0x159] sm:$0xff] %v8219_v39  ;;  %3965 = vmatprep.mubr.f32.mxu1 %v8151_v27  ;;  %v8271_v27 = vld [vmem:[#allocation2 + $0x38] sm:$0xff]  ;;  %v8275_v35 = vld [vmem:[#allocation2 + $0x82] sm:$0xff] }
 0x3cc   : > { %2869 = vst [vmem:[#allocation2 + $0x169] sm:$0xff] %v8221_v17  ;;  %2870 = vst [vmem:[#allocation2 + $0x171] sm:$0xff] %v8223_v53  ;;  %5634 = vmatmul.mubr.f32.gmra.mrb[66].mxu0 %v8253_v21  ;;  %5994 = vmatpush1.bf16.msra.mxu1 %v5993_v63  ;;  %v8282_v51 = vld [vmem:[#allocation2 + $0x48] sm:$0xff]  ;;  %v8295_v25 = vld [vmem:[#allocation2 + $0xb2] sm:$0xff] }
 0x3cd   : > { %2871 = vst [vmem:[#allocation2 + $0x181] sm:$0xff] %v2839_v50  ;;  %5636 = vmatprep.mubr.f32.mxu0 %v8257_v20  ;;  %5995 = vmatprep.subr.bf16.mxu1 %v9378_v5  ;;  %v8285_v50 = vld [vmem:[#allocation2 + $0x9a] sm:$0xff]  ;;  %v8289_v60 = vld [vmem:[#allocation2 + $0xaa] sm:$0xff]  ;;  %v8299_v57 = vld [vmem:[#allocation2 + $0xc2] sm:$0xff] }
 0x3ce   : > { %3966 = vmatmul.mubr.f32.gmra.mrb[40].mxu1 %v8260_v24  ;;  %v8305_v63 = vld [vmem:[#allocation2 + $0xca] sm:$0xff]  ;;  %v8309_v49 = vld [vmem:[#allocation2 + $0xda] sm:$0xff]  ;;  %v8315_v7 = vld [vmem:[#allocation2 + $0xe2] sm:$0xff] }
 0x3cf   : > { %3970 = vmatprep.mubr.f32.mxu1 %v8153_v9  ;;  %v8279_v9 = vld [vmem:[#allocation2 + $0x92] sm:$0xff]  ;;  %v8325_v56 = vld [vmem:[#allocation2 + $0xfa] sm:$0xff]  ;;  %v8329_v18 = vld [vmem:[#allocation2 + $0x10a] sm:$0xff] }
 0x3d0   : > { %5637 = vmatmul.mubr.f32.gmra.mrb[68].mxu0 %v8264_v46  ;;  %5997 = vmatpush1.bf16.msra.mxu1 %v5996_v30  ;;  %v8319_v30 = vld [vmem:[#allocation2 + $0xf2] sm:$0xff]  ;;  %v8339_v47 = vld [vmem:[#allocation2 + $0x122] sm:$0xff]  ;;  %v8345_v42 = vld [vmem:[#allocation2 + $0x12a] sm:$0xff] }
 0x3d1   : > { %5639 = vmatprep.mubr.f32.mxu0 %v8268_v62  ;;  %5998 = vmatprep.subr.bf16.mxu1 %v9378_v5  ;;  %v8335_v1 = vld [vmem:[#allocation2 + $0x112] sm:$0xff]  ;;  %v8349_v31 = vld [vmem:[#allocation2 + $0x13a] sm:$0xff]  ;;  %v8355_v29 = vld [vmem:[#allocation2 + $0x142] sm:$0xff] }
 0x3d2   : > { %3971 = vmatmul.mubr.f32.gmra.mrb[42].mxu1 %v8271_v27  ;;  %v8359_v40 = vld [vmem:[#allocation2 + $0xa8] sm:$0xff]  ;;  %v8367_v55 = vld [vmem:[#allocation2 + $0xc0] sm:$0xff]  ;;  %v8375_v8 = vld [vmem:[#allocation2 + $0xd8] sm:$0xff] }
 0x3d3   : > { %3975 = vmatprep.mubr.f32.mxu1 %v8155_v54  ;;  %v8292_v54 = vld [vmem:[#allocation2 + $0x50] sm:$0xff] }
 0x3d4   : > { %5640 = vmatmul.mubr.f32.gmra.mrb[70].mxu0 %v8275_v35  ;;  %v8427_v3 = vld [vmem:[#allocation2 + $0x170] sm:$0xff] }
 0x3d5   : > { %5642 = vmatprep.mubr.f32.mxu0 %v8279_v9  ;;  %9389 = vst [vmem:[#allocation57_spill] sm:$0xff] %v8427_v3 }
 0x3d6   : > { %3976 = vmatmul.mubr.f32.gmra.mrb[44].mxu1 %v8282_v51 }
 0x3d7   : > { %3980 = vmatprep.mubr.f32.mxu1 %v8157_v41  ;;  %v8302_v41 = vld [vmem:[#allocation2 + $0x60] sm:$0xff] }
 0x3d8   : > { %5643 = vmatmul.mubr.f32.gmra.mrb[72].mxu0 %v8285_v50 }
 0x3d9   : > { %5645 = vmatprep.mubr.f32.mxu0 %v8289_v60 }
 0x3da   : > { %3981 = vmatmul.mubr.f32.gmra.mrb[46].mxu1 %v8292_v54 }
 0x3db   : > { %3985 = vmatprep.mubr.f32.mxu1 %v8159_v4  ;;  %v8312_v4 = vld [vmem:[#allocation2 + $0x68] sm:$0xff] }
 0x3dc   : > { %5646 = vmatmul.mubr.f32.gmra.mrb[74].mxu0 %v8295_v25 }
 0x3dd   : > { %5648 = vmatprep.mubr.f32.mxu0 %v8299_v57 }
 0x3de   : > { %3986 = vmatmul.mubr.f32.gmra.mrb[48].mxu1 %v8302_v41 }
 0x3df   : > { %3990 = vmatprep.mubr.f32.mxu1 %v8161_v6  ;;  %v8322_v6 = vld [vmem:[#allocation2 + $0x78] sm:$0xff] }
 0x3e0   : > { %5649 = vmatmul.mubr.f32.gmra.mrb[76].mxu0 %v8305_v63 }
 0x3e1   : > { %5651 = vmatprep.mubr.f32.mxu0 %v8309_v49 }
 0x3e2   : > { %3991 = vmatmul.mubr.f32.gmra.mrb[50].mxu1 %v8312_v4 }
 0x3e3   : > { %3995 = vmatprep.mubr.f32.mxu1 %v8163_v52  ;;  %v8332_v52 = vld [vmem:[#allocation2 + $0x80] sm:$0xff] }
 0x3e4   : > { %5652 = vmatmul.mubr.f32.gmra.mrb[78].mxu0 %v8315_v7 }
 0x3e5   : > { %5654 = vmatprep.mubr.f32.mxu0 %v8319_v30 }
 0x3e6   : > { %3996 = vmatmul.mubr.f32.gmra.mrb[52].mxu1 %v8322_v6 }
 0x3e7   : > { %4000 = vmatprep.mubr.f32.mxu1 %v8165_v19  ;;  %v8342_v19 = vld [vmem:[#allocation2 + $0x90] sm:$0xff] }
 0x3e8   : > { %5655 = vmatmul.mubr.f32.gmra.mrb[80].mxu0 %v8325_v56 }
 0x3e9   : > { %5657 = vmatprep.mubr.f32.mxu0 %v8329_v18 }
 0x3ea   : > { %4001 = vmatmul.mubr.f32.gmra.mrb[54].mxu1 %v8332_v52 }
 0x3eb   : > { %4005 = vmatprep.mubr.f32.mxu1 %v8167_v59  ;;  %v8352_v59 = vld [vmem:[#allocation2 + $0x98] sm:$0xff] }
 0x3ec   : > { %5658 = vmatmul.mubr.f32.gmra.mrb[82].mxu0 %v8335_v1 }
 0x3ed   : > { %5660 = vmatprep.mubr.f32.mxu0 %v8339_v47 }
 0x3ee   : > { %4006 = vmatmul.mubr.f32.gmra.mrb[56].mxu1 %v8342_v19 }
 0x3ef   : > { %4010 = vmatprep.mubr.f32.mxu1 %v8171_v16  ;;  %v8363_v16 = vld [vmem:[#allocation2 + $0xb0] sm:$0xff] }
 0x3f0   : > { %5661 = vmatmul.mubr.f32.gmra.mrb[84].mxu0 %v8345_v42 }
 0x3f1   : > { %5663 = vmatprep.mubr.f32.mxu0 %v8349_v31 }
 0x3f2   : > { %4011 = vmatmul.mubr.f32.gmra.mrb[58].mxu1 %v8352_v59 }
 0x3f3   : > { %4015 = vmatprep.mubr.f32.mxu1 %v8173_v61  ;;  %v8371_v61 = vld [vmem:[#allocation2 + $0xc8] sm:$0xff] }
 0x3f4   : > { %5664 = vmatmul.mubr.f32.gmra.mrb[86].mxu0 %v8355_v29 }
 0x3f6   : > { %4016 = vmatmul.mubr.f32.gmra.mrb[60].mxu1 %v8359_v40 }
 0x3f7   : > { %4020 = vmatprep.mubr.f32.mxu1 %v8175_v10  ;;  %v8379_v10 = vld [vmem:[#allocation2 + $0xe0] sm:$0xff] }
 0x3fa   : > { %4021 = vmatmul.mubr.f32.gmra.mrb[62].mxu1 %v8363_v16 }
 0x3fb   : > { %4025 = vmatprep.mubr.f32.mxu1 %v8177_v2  ;;  %v8383_v2 = vld [vmem:[#allocation2 + $0xf0] sm:$0xff] }
 0x3fe   : > { %4026 = vmatmul.mubr.f32.gmra.mrb[64].mxu1 %v8367_v55 }
 0x3ff   : > { %4030 = vmatprep.mubr.f32.mxu1 %v8183_v58  ;;  %v8387_v58 = vld [vmem:[#allocation2 + $0xf8] sm:$0xff] }
 0x402   : > { %4031 = vmatmul.mubr.f32.gmra.mrb[66].mxu1 %v8371_v61 }
 0x403   : > { %4035 = vmatprep.mubr.f32.mxu1 %v8185_v28  ;;  %v8391_v28 = vld [vmem:[#allocation2 + $0x108] sm:$0xff] }
 0x406   : > { %4036 = vmatmul.mubr.f32.gmra.mrb[68].mxu1 %v8375_v8 }
 0x407   : > { %4040 = vmatprep.mubr.f32.mxu1 %v8187_v12  ;;  %v8395_v12 = vld [vmem:[#allocation2 + $0x110] sm:$0xff] }
 0x40a   : > { %4041 = vmatmul.mubr.f32.gmra.mrb[70].mxu1 %v8379_v10 }
 0x40b   : > { %4045 = vmatprep.mubr.f32.mxu1 %v8189_v43  ;;  %v8399_v43 = vld [vmem:[#allocation2 + $0x120] sm:$0xff] }
 0x40e   : > { %4046 = vmatmul.mubr.f32.gmra.mrb[72].mxu1 %v8383_v2 }
 0x40f   : > { %4050 = vmatprep.mubr.f32.mxu1 %v8195_v0  ;;  %v8403_v0 = vld [vmem:[#allocation2 + $0x128] sm:$0xff] }
 0x412   : > { %4051 = vmatmul.mubr.f32.gmra.mrb[74].mxu1 %v8387_v58 }
 0x413   : > { %4055 = vmatprep.mubr.f32.mxu1 %v8197_v22  ;;  %v8407_v22 = vld [vmem:[#allocation2 + $0x138] sm:$0xff] }
 0x416   : > { %4056 = vmatmul.mubr.f32.gmra.mrb[76].mxu1 %v8391_v28 }
 0x417   : > { %4060 = vmatprep.mubr.f32.mxu1 %v8199_v45  ;;  %v8411_v45 = vld [vmem:[#allocation2 + $0x140] sm:$0xff] }
 0x41a   : > { %4061 = vmatmul.mubr.f32.gmra.mrb[78].mxu1 %v8395_v12 }
 0x41b   : > { %4065 = vmatprep.mubr.f32.mxu1 %v8201_v14  ;;  %v8415_v14 = vld [vmem:[#allocation2 + $0x150] sm:$0xff] }
 0x41e   : > { %4066 = vmatmul.mubr.f32.gmra.mrb[80].mxu1 %v8399_v43 }
 0x41f   : > { %4070 = vmatprep.mubr.f32.mxu1 %v8207_v34  ;;  %v8419_v34 = vld [vmem:[#allocation2 + $0x158] sm:$0xff] }
 0x422   : > { %4071 = vmatmul.mubr.f32.gmra.mrb[82].mxu1 %v8403_v0 }
 0x423   : > { %4075 = vmatprep.mubr.f32.mxu1 %v8209_v38  ;;  %v8423_v38 = vld [vmem:[#allocation2 + $0x168] sm:$0xff] }
 0x424   : > { %9388 = vst [vmem:[#allocation56_spill] sm:$0xff] %v8423_v38 }
 0x426   : > { %4076 = vmatmul.mubr.f32.gmra.mrb[84].mxu1 %v8407_v22 }
 0x427   : > { %4080 = vmatprep.mubr.f32.mxu1 %v8211_v33  ;;  %v3801_v33 = vld [vmem:[#allocation9 + $0x200] sm:$0xff] }
 0x42a   : > { %4081 = vmatmul.mubr.f32.gmra.mrb[86].mxu1 %v8411_v45 }
 0x42b   : > { %4085 = vmatprep.mubr.f32.mxu1 %v8213_v26  ;;  %v3802_v26 = vld [vmem:[#allocation9 + $0x208] sm:$0xff] }
 0x42c   : > { %v5999_v36 = vpack.c.bf16 %v3802_v26, %v3801_v33  ;;  %v3808_v33 = vld [vmem:[#allocation9 + $0x238] sm:$0xff]  ;;  %v8435_v26 = vld [vmem:[#allocation2 + $0x1a] sm:$0xff] }
 0x42e   : > { %4086 = vmatmul.mubr.f32.gmra.mrb[88].mxu1 %v8415_v14 }
 0x42f   : > { %4090 = vmatprep.mubr.f32.mxu1 %v8219_v39  ;;  %v3001_v39 = vld [vmem:[#allocation2 + $0x2] sm:$0xff] }
 0x432   : > { %4091 = vmatmul.mubr.f32.gmra.mrb[90].mxu1 %v8419_v34 }
 0x433   : > { %4095 = vmatprep.mubr.f32.mxu1 %v8221_v17  ;;  %v3002_v17 = vld [vmem:[#allocation2 + $0xa] sm:$0xff] }
 0x436   : > { %4096 = vmatmul.mubr.f32.gmra.mrb[92].mxu1 %v8423_v38  ;;  %v3806_v38 = vld [vmem:[#allocation9 + $0x228] sm:$0xff] }
 0x437   : > { %4100 = vmatprep.mubr.f32.mxu1 %v8223_v53  ;;  %v3805_v53 = vld [vmem:[#allocation9 + $0x220] sm:$0xff] }
 0x43a   : > { %4101 = vmatmul.mubr.f32.gmra.mrb[94].mxu1 %v8427_v3  ;;  %v6005_v3 = vpack.c.bf16 %v3806_v38, %v3805_v53  ;;  %v3812_v38 = vld [vmem:[#allocation9 + $0x258] sm:$0xff] }
 0x43b   : > { %4170 = vmatprep.mubr.f32.mxu1 %v8236_v44  ;;  %v3807_v44 = vld [vmem:[#allocation9 + $0x230] sm:$0xff]  ;;  %v3816_v53 = vld [vmem:[#allocation9 + $0x278] sm:$0xff] }
 0x43c   : > { %v6008_v15 = vpack.c.bf16 %v3808_v33, %v3807_v44  ;;  %v3817_v44 = vld [vmem:[#allocation9 + $0x280] sm:$0xff]  ;;  %v3818_v33 = vld [vmem:[#allocation9 + $0x288] sm:$0xff] }
 0x43e   : > { %4171 = vmatmul.mubr.f32.vlgmr.msra.gmra.mrb[32].mxu1 %v3001_v39  ;;  %v3814_v39 = vld [vmem:[#allocation9 + $0x268] sm:$0xff] }
 0x43f   : > { %4175 = vmatprep.mubr.f32.mxu1 %v8249_v48  ;;  %6000 = vmatpush1.bf16.msra.mxu1 %v5999_v36  ;;  %v3810_v36 = vld [vmem:[#allocation9 + $0x248] sm:$0xff]  ;;  %v8440_v48 = vld [vmem:[#allocation2 + $0x22] sm:$0xff] }
 0x440   : > { %6001 = vmatprep.subr.bf16.mxu1 %v9378_v5 }
 0x442   : > { %4176 = vmatmul.mubr.f32.gmra.mrb[34].mxu1 %v3002_v17  ;;  %v3815_v17 = vld [vmem:[#allocation9 + $0x270] sm:$0xff] }
 0x443   : > { %4180 = vmatprep.mubr.f32.mxu1 %v8260_v24  ;;  %6003 = vmatpush1.bf16.msra.mxu1 %v6002_v13  ;;  %v6011_v13 = vpack.c.bf16 %v3810_v36, %v3809_v23  ;;  %v3811_v24 = vld [vmem:[#allocation9 + $0x250] sm:$0xff]  ;;  %v3820_v23 = vld [vmem:[#allocation9 + $0x298] sm:$0xff]  ;;  %v3821_v36 = vld [vmem:[#allocation9 + $0x2a0] sm:$0xff] }
 0x444   : > { %6004 = vmatprep.subr.bf16.mxu1 %v9378_v5 }
 0x446   : > { %4181 = vmatmul.mubr.f32.gmra.mrb[36].mxu1 %v8435_v26 }
 0x447   : > { %4185 = vmatprep.mubr.f32.mxu1 %v8271_v27  ;;  %6006 = vmatpush1.bf16.msra.mxu1 %v6005_v3  ;;  %v6014_v3 = vpack.c.bf16 %v3812_v38, %v3811_v24  ;;  %v3813_v27 = vld [vmem:[#allocation9 + $0x260] sm:$0xff]  ;;  %v3823_v24 = vld [vmem:[#allocation9 + $0x2b0] sm:$0xff]  ;;  %v3824_v38 = vld [vmem:[#allocation9 + $0x2b8] sm:$0xff] }
 0x448   : > { %6007 = vmatprep.subr.bf16.mxu1 %v9378_v5 }
 0x44a   : > { %4186 = vmatmul.mubr.f32.gmra.mrb[38].mxu1 %v8440_v48 }
 0x44b   : > { %4190 = vmatprep.mubr.f32.mxu1 %v8282_v51  ;;  %6009 = vmatpush1.bf16.msra.mxu1 %v6008_v15  ;;  %v6017_v51 = vpack.c.bf16 %v3814_v39, %v3813_v27  ;;  %v3819_v15 = vld [vmem:[#allocation9 + $0x290] sm:$0xff]  ;;  %v3826_v27 = vld [vmem:[#allocation9 + $0x2c8] sm:$0xff] }
 0x44c   : > { %6010 = vmatprep.subr.bf16.mxu1 %v9378_v5  ;;  %v3827_v39 = vld [vmem:[#allocation9 + $0x2d0] sm:$0xff] }
 0x44e   : > { %4191 = vmatmul.mubr.f32.gmra.mrb[40].mxu1 %v8238_v37 }
 0x44f   : > { %4195 = vmatprep.mubr.f32.mxu1 %v8292_v54  ;;  %6012 = vmatpush1.bf16.msra.mxu1 %v6011_v13  ;;  %v6020_v54 = vpack.c.bf16 %v3816_v53, %v3815_v17  ;;  %v3822_v13 = vld [vmem:[#allocation9 + $0x2a8] sm:$0xff]  ;;  %v3829_v17 = vld [vmem:[#allocation9 + $0x2e0] sm:$0xff] }
 0x450   : > { %6013 = vmatprep.subr.bf16.mxu1 %v9378_v5  ;;  %v3830_v53 = vld [vmem:[#allocation9 + $0x2e8] sm:$0xff] }
 0x452   : > { %4196 = vmatmul.mubr.f32.gmra.mrb[42].mxu1 %v8241_v11 }
 0x453   : > { %4200 = vmatprep.mubr.f32.mxu1 %v8302_v41  ;;  %6015 = vmatpush1.bf16.msra.mxu1 %v6014_v3  ;;  %v6023_v41 = vpack.c.bf16 %v3818_v33, %v3817_v44  ;;  %v3825_v3 = vld [vmem:[#allocation9 + $0x2c0] sm:$0xff]  ;;  %v3832_v44 = vld [vmem:[#allocation9 + $0x2f8] sm:$0xff]  ;;  %v9391_v33 = vld [vmem:[#allocation57_spill] sm:$0xff] }
 0x454   : > { %6016 = vmatprep.subr.bf16.mxu1 %v9378_v5 }
 0x456   : > { %4201 = vmatmul.mubr.f32.gmra.mrb[44].mxu1 %v8246_v32 }
 0x457   : > { %4205 = vmatprep.mubr.f32.mxu1 %v8312_v4  ;;  %6018 = vmatpush1.bf16.msra.mxu1 %v6017_v51  ;;  %v6026_v4 = vpack.c.bf16 %v3820_v23, %v3819_v15  ;;  %v3828_v51 = vld [vmem:[#allocation9 + $0x2d8] sm:$0xff]  ;;  %v8536_v15 = vld [vmem:[#allocation2 + $0x180] sm:$0xff] }
 0x458   : > { %6019 = vmatprep.subr.bf16.mxu1 %v9378_v5 }
 0x45a   : > { %4206 = vmatmul.mubr.f32.gmra.mrb[46].mxu1 %v8253_v21 }
 0x45b   : > { %4210 = vmatprep.mubr.f32.mxu1 %v8322_v6  ;;  %6021 = vmatpush1.bf16.msra.mxu1 %v6020_v54  ;;  %v6029_v6 = vpack.c.bf16 %v3822_v13, %v3821_v36  ;;  %v3831_v54 = vld [vmem:[#allocation9 + $0x2f0] sm:$0xff]  ;;  %v8543_v36 = vld [vmem:[#allocation2 + $0x16a] sm:$0xff] }
 0x45c   : > { %6022 = vmatprep.subr.bf16.mxu1 %v9378_v5  ;;  %v8546_v13 = vld [vmem:[#allocation2 + $0x188] sm:$0xff] }
 0x45e   : > { %4211 = vmatmul.mubr.f32.gmra.mrb[48].mxu1 %v8257_v20 }
 0x45f   : > { %4215 = vmatprep.mubr.f32.mxu1 %v8332_v52  ;;  %6024 = vmatpush1.bf16.msra.mxu1 %v6023_v41  ;;  %v6032_v52 = vpack.c.bf16 %v3824_v38, %v3823_v24  ;;  %v3833_v38 = vld [vmem:[#allocation9 + $0x300] sm:$0xff] }
 0x460   : > { %6025 = vmatprep.subr.bf16.mxu1 %v9378_v5 }
 0x462   : > { %4216 = vmatmul.mubr.f32.gmra.mrb[50].mxu1 %v8264_v46 }
 0x463   : > { %4220 = vmatprep.mubr.f32.mxu1 %v8342_v19  ;;  %6027 = vmatpush1.bf16.msra.mxu1 %v6026_v4  ;;  %v6035_v19 = vpack.c.bf16 %v3826_v27, %v3825_v3  ;;  %v8553_v3 = vld [vmem:[#allocation2 + $0x172] sm:$0xff] }
 0x464   : > { %6028 = vmatprep.subr.bf16.mxu1 %v9378_v5 }
 0x466   : > { %4221 = vmatmul.mubr.f32.gmra.mrb[52].mxu1 %v8268_v62 }
 0x467   : > { %4225 = vmatprep.mubr.f32.mxu1 %v8352_v59  ;;  %6030 = vmatpush1.bf16.msra.mxu1 %v6029_v6  ;;  %v6038_v59 = vpack.c.bf16 %v3828_v51, %v3827_v39  ;;  %v3835_v51 = vld [vmem:[#allocation9 + $0x310] sm:$0xff] }
 0x468   : > { %6031 = vmatprep.subr.bf16.mxu1 %v9378_v5 }
 0x46a   : > { %4226 = vmatmul.mubr.f32.gmra.mrb[54].mxu1 %v8275_v35 }
 0x46b   : > { %4230 = vmatprep.mubr.f32.mxu1 %v8359_v40  ;;  %6033 = vmatpush1.bf16.msra.mxu1 %v6032_v52  ;;  %v6041_v40 = vpack.c.bf16 %v3830_v53, %v3829_v17  ;;  %v3834_v52 = vld [vmem:[#allocation9 + $0x308] sm:$0xff] }
 0x46c   : > { %6034 = vmatprep.subr.bf16.mxu1 %v9378_v5  ;;  %v3129_v17 = vld [vmem:[#allocation2 + $0x19] sm:$0xff] }
 0x46e   : > { %4231 = vmatmul.mubr.f32.gmra.mrb[56].mxu1 %v8279_v9 }
 0x46f   : > { %4235 = vmatprep.mubr.f32.mxu1 %v8363_v16  ;;  %6036 = vmatpush1.bf16.msra.mxu1 %v6035_v19  ;;  %v6044_v16 = vpack.c.bf16 %v3832_v44, %v3831_v54  ;;  %v6047_v19 = vpack.c.bf16 %v3834_v52, %v3833_v38  ;;  %v3837_v44 = vld [vmem:[#allocation9 + $0x320] sm:$0xff]  ;;  %v3840_v52 = vld [vmem:[#allocation9 + $0x338] sm:$0xff] }
 0x470   : > { %6037 = vmatprep.subr.bf16.mxu1 %v9378_v5 }
 0x472   : > { %4236 = vmatmul.mubr.f32.gmra.mrb[58].mxu1 %v8285_v50 }
 0x473   : > { %4240 = vmatprep.mubr.f32.mxu1 %v8367_v55  ;;  %6039 = vmatpush1.bf16.msra.mxu1 %v6038_v59  ;;  %v3836_v59 = vld [vmem:[#allocation9 + $0x318] sm:$0xff] }
 0x474   : > { %6040 = vmatprep.subr.bf16.mxu1 %v9378_v5 }
 0x476   : > { %4241 = vmatmul.mubr.f32.gmra.mrb[60].mxu1 %v8289_v60 }
 0x477   : > { %4245 = vmatprep.mubr.f32.mxu1 %v8371_v61  ;;  %6042 = vmatpush1.bf16.msra.mxu1 %v6041_v40  ;;  %v6050_v40 = vpack.c.bf16 %v3836_v59, %v3835_v51 }
 0x478   : > { %6043 = vmatprep.subr.bf16.mxu1 %v9378_v5 }
 0x47a   : > { %4246 = vmatmul.mubr.f32.gmra.mrb[62].mxu1 %v8295_v25 }
 0x47b   : > { %4250 = vmatprep.mubr.f32.mxu1 %v8375_v8  ;;  %6045 = vmatpush1.bf16.msra.mxu1 %v6044_v16  ;;  %v3838_v16 = vld [vmem:[#allocation9 + $0x328] sm:$0xff] }
 0x47c   : > { %6046 = vmatprep.subr.bf16.mxu1 %v9378_v5 }
 0x47e   : > { %4251 = vmatmul.mubr.f32.gmra.mrb[64].mxu1 %v8299_v57 }
 0x47f   : > { %4255 = vmatprep.mubr.f32.mxu1 %v8379_v10 }
 0x482   : > { %4256 = vmatmul.mubr.f32.gmra.mrb[66].mxu1 %v8305_v63 }
 0x483   : > { %4260 = vmatprep.mubr.f32.mxu1 %v8383_v2 }
 0x486   : > { %4261 = vmatmul.mubr.f32.gmra.mrb[68].mxu1 %v8309_v49 }
 0x487   : > { %4265 = vmatprep.mubr.f32.mxu1 %v8387_v58 }
 0x48a   : > { %4266 = vmatmul.mubr.f32.gmra.mrb[70].mxu1 %v8315_v7 }
 0x48b   : > { %4270 = vmatprep.mubr.f32.mxu1 %v8391_v28 }
 0x48e   : > { %4271 = vmatmul.mubr.f32.gmra.mrb[72].mxu1 %v8319_v30 }
 0x48f   : > { %4275 = vmatprep.mubr.f32.mxu1 %v8395_v12 }
 0x492   : > { %4276 = vmatmul.mubr.f32.gmra.mrb[74].mxu1 %v8325_v56 }
 0x493   : > { %4280 = vmatprep.mubr.f32.mxu1 %v8399_v43 }
 0x496   : > { %4281 = vmatmul.mubr.f32.gmra.mrb[76].mxu1 %v8329_v18 }
 0x497   : > { %4285 = vmatprep.mubr.f32.mxu1 %v8403_v0  ;;  %v9390_v0 = vld [vmem:[#allocation56_spill] sm:$0xff] }
 0x49a   : > { %4286 = vmatmul.mubr.f32.gmra.mrb[78].mxu1 %v8335_v1 }
 0x49b   : > { %v8496_v8 = vpop.f32.mrb[64].mxu0  ;;  %4290 = vmatprep.mubr.f32.mxu1 %v8407_v22 }
 0x49c   : > { %v8499_v55 = vpop.f32.mrb[65].mxu0 }
 0x49e   : > { %4291 = vmatmul.mubr.f32.gmra.mrb[80].mxu1 %v8339_v47 }
 0x49f   : > { %v8502_v61 = vpop.f32.mrb[66].mxu0  ;;  %4295 = vmatprep.mubr.f32.mxu1 %v8411_v45  ;;  %v8525_v45 = vld [vmem:[#allocation2 + $0x152] sm:$0xff] }
 0x4a0   : > { %v8505_v10 = vpop.f32.mrb[67].mxu0 }
 0x4a2   : > { %4296 = vmatmul.mubr.f32.gmra.mrb[82].mxu1 %v8345_v42 }
 0x4a3   : > { %v8508_v2 = vpop.f32.mrb[68].mxu0  ;;  %4300 = vmatprep.mubr.f32.mxu1 %v8415_v14 }
 0x4a4   : > { %v8511_v58 = vpop.f32.mrb[69].mxu0 }
 0x4a6   : > { %4301 = vmatmul.mubr.f32.gmra.mrb[84].mxu1 %v8349_v31 }
 0x4a7   : > { %v8514_v28 = vpop.f32.mrb[70].mxu0  ;;  %4305 = vmatprep.mubr.f32.mxu1 %v8419_v34  ;;  %v8533_v34 = vld [vmem:[#allocation2 + $0x15a] sm:$0xff] }
 0x4a8   : > { %v8517_v12 = vpop.f32.mrb[71].mxu0 }
 0x4aa   : > { %4306 = vmatmul.mubr.f32.gmra.mrb[86].mxu1 %v8355_v29 }
 0x4ab   : > { %v8520_v43 = vpop.f32.mrb[72].mxu0  ;;  %4310 = vmatprep.mubr.f32.mxu1 %v9390_v0 }
 0x4ac   : > { %v8523_v22 = vpop.f32.mrb[73].mxu0 }
 0x4ae   : > { %4311 = vmatmul.mubr.f32.gmra.mrb[88].mxu1 %v8525_v45 }
 0x4af   : > { %v8528_v14 = vpop.f32.mrb[74].mxu0  ;;  %4315 = vmatprep.mubr.f32.mxu1 %v9391_v33  ;;  %v6053_v33 = vpack.c.bf16 %v3838_v16, %v3837_v44  ;;  %v8582_v44 = vld [vmem:[#allocation2 + $0x39] sm:$0xff] }
 0x4b0   : > { %v8531_v41 = vpop.f32.mrb[75].mxu0 }
 0x4b2   : > { %4316 = vmatmul.mubr.f32.gmra.mrb[90].mxu1 %v8533_v34 }
 0x4b3   : > { %v8538_v23 = vpop.f32.mrb[76].mxu0  ;;  %4320 = vmatprep.mubr.f32.mxu1 %v8536_v15 }
 0x4b4   : > { %v8541_v4 = vpop.f32.mrb[77].mxu0 }
 0x4b6   : > { %4321 = vmatmul.mubr.f32.gmra.mrb[92].mxu1 %v8543_v36 }
 0x4b7   : > { %v8548_v6 = vpop.f32.mrb[78].mxu0  ;;  %4325 = vmatprep.mubr.f32.mxu1 %v8546_v13 }
 0x4b8   : > { %v8551_v24 = vpop.f32.mrb[79].mxu0 }
 0x4ba   : > { %4326 = vmatmul.mubr.f32.gmra.mrb[94].mxu1 %v8553_v3 }
 0x4bb   : > { %v8556_v27 = vpop.f32.mrb[80].mxu0  ;;  %4395 = vmatprep.mubr.f32.mxu1 %v8435_v26  ;;  %v3130_v26 = vld [vmem:[#allocation2 + $0x21] sm:$0xff] }
 0x4bc   : > { %v8559_v39 = vpop.f32.mrb[81].mxu0 }
 0x4be   : > { %4396 = vmatmul.mubr.f32.vlgmr.msra.gmra.mrb[32].mxu1 %v3129_v17 }
 0x4bf   : > { %v8561_v53 = vpop.f32.mrb[82].mxu0  ;;  %4400 = vmatprep.mubr.f32.mxu1 %v8440_v48  ;;  %6048 = vmatpush1.bf16.msra.mxu1 %v6047_v19  ;;  %v3839_v48 = vld [vmem:[#allocation9 + $0x330] sm:$0xff]  ;;  %v8573_v19 = vld [vmem:[#allocation2 + $0x31] sm:$0xff] }
 0x4c0   : > { %v8564_v54 = vpop.f32.mrb[83].mxu0  ;;  %6049 = vmatprep.subr.bf16.mxu1 %v9378_v5  ;;  %v6056_v59 = vpack.c.bf16 %v3840_v52, %v3839_v48  ;;  %v3845_v52 = vld [vmem:[#allocation9 + $0x360] sm:$0xff] }
 0x4c2   : > { %4401 = vmatmul.mubr.f32.gmra.mrb[34].mxu1 %v3130_v26  ;;  %v3843_v26 = vld [vmem:[#allocation9 + $0x350] sm:$0xff] }
 0x4c3   : > { %v8567_v0 = vpop.f32.mrb[84].mxu0  ;;  %4405 = vmatprep.mubr.f32.mxu1 %v8238_v37  ;;  %6051 = vmatpush1.bf16.msra.mxu1 %v6050_v40  ;;  %v3841_v37 = vld [vmem:[#allocation9 + $0x340] sm:$0xff]  ;;  %v3842_v40 = vld [vmem:[#allocation9 + $0x348] sm:$0xff] }
 0x4c4   : > { %9392 = vst [vmem:[#allocation56_spill] sm:$0xff] %v8567_v0  ;;  %v8570_v38 = vpop.f32.mrb[85].mxu0  ;;  %6052 = vmatprep.subr.bf16.mxu1 %v9378_v5  ;;  %v6059_v16 = vpack.c.bf16 %v3842_v40, %v3841_v37  ;;  %v3848_v37 = vld [vmem:[#allocation9 + $0x378] sm:$0xff]  ;;  %v9398_v0 = vld [vmem:[#allocation49_spill] sm:$0xff] }
 0x4c5   : > { %9393 = vst [vmem:[#allocation57_spill] sm:$0xff] %v8570_v38  ;;  %v8597_v40 = vld [vmem:[#allocation2 + $0x61] sm:$0xff] }
 0x4c6   : > { %4406 = vmatmul.mubr.f32.gmra.mrb[36].mxu1 %v8573_v19  ;;  %v3259_v38 = vld [vmem:[#allocation2 + $0x48] sm:$0xff] }
 0x4c7   : > { %v8576_v51 = vpop.f32.mrb[86].mxu0  ;;  %4410 = vmatprep.mubr.f32.mxu1 %v8241_v11  ;;  %6054 = vmatpush1.bf16.msra.mxu1 %v6053_v33  ;;  %v3844_v11 = vld [vmem:[#allocation9 + $0x358] sm:$0xff] }
 0x4c8   : > { %9394 = vst [vmem:[#allocation58_spill] sm:$0xff] %v8576_v51  ;;  %v8579_v17 = vpop.f32.mrb[87].mxu0  ;;  %6055 = vmatprep.subr.bf16.mxu1 %v9378_v5  ;;  %v8587_v33 = vld [vmem:[#allocation2 + $0x49] sm:$0xff]  ;;  %v6062_v48 = vpack.c.bf16 %v3844_v11, %v3843_v26  ;;  %v3846_v51 = vld [vmem:[#allocation9 + $0x368] sm:$0xff] }
 0x4c9   : > { %9395 = vst [vmem:[#allocation59_spill] sm:$0xff] %v8579_v17  ;;  %v8592_v17 = vld [vmem:[#allocation2 + $0x51] sm:$0xff]  ;;  %v8602_v11 = vld [vmem:[#allocation2 + $0x69] sm:$0xff] }
 0x4ca   : > { %4411 = vmatmul.mubr.f32.gmra.mrb[38].mxu1 %v8582_v44  ;;  %v3850_v26 = vld [vmem:[#allocation9 + $0x388] sm:$0xff] }
 0x4cb   : > { %4415 = vmatprep.mubr.f32.mxu1 %v8246_v32  ;;  %6057 = vmatpush1.bf16.msra.mxu1 %v6056_v59  ;;  %v6065_v32 = vpack.c.bf16 %v3846_v51, %v3845_v52  ;;  %v3847_v59 = vld [vmem:[#allocation9 + $0x370] sm:$0xff] }
 0x4cc   : > { %6058 = vmatprep.subr.bf16.mxu1 %v9378_v5  ;;  %v3851_v51 = vld [vmem:[#allocation9 + $0x390] sm:$0xff] }
 0x4cd   : > { %v8607_v52 = vld [vmem:[#allocation2 + $0x79] sm:$0xff] }
 0x4ce   : > { %4416 = vmatmul.mubr.f32.gmra.mrb[40].mxu1 %v8587_v33 }
 0x4cf   : > { %4420 = vmatprep.mubr.f32.mxu1 %v8253_v21  ;;  %6060 = vmatpush1.bf16.msra.mxu1 %v6059_v16  ;;  %v6068_v21 = vpack.c.bf16 %v3848_v37, %v3847_v59  ;;  %v3849_v16 = vld [vmem:[#allocation9 + $0x380] sm:$0xff]  ;;  %v3854_v59 = vld [vmem:[#allocation9 + $0x3a8] sm:$0xff]  ;;  %v8612_v37 = vld [vmem:[#allocation2 + $0x81] sm:$0xff] }
 0x4d0   : > { %6061 = vmatprep.subr.bf16.mxu1 %v9378_v5 }
 0x4d2   : > { %4421 = vmatmul.mubr.f32.gmra.mrb[42].mxu1 %v8592_v17 }
 0x4d3   : > { %4425 = vmatprep.mubr.f32.mxu1 %v8257_v20  ;;  %6063 = vmatpush1.bf16.msra.mxu1 %v6062_v48  ;;  %v6071_v20 = vpack.c.bf16 %v3850_v26, %v3849_v16  ;;  %v3852_v48 = vld [vmem:[#allocation9 + $0x398] sm:$0xff]  ;;  %v8617_v26 = vld [vmem:[#allocation2 + $0x91] sm:$0xff] }
 0x4d4   : > { %6064 = vmatprep.subr.bf16.mxu1 %v9378_v5  ;;  %v3856_v16 = vld [vmem:[#allocation9 + $0x3b8] sm:$0xff] }
 0x4d6   : > { %4426 = vmatmul.mubr.f32.gmra.mrb[44].mxu1 %v8597_v40 }
 0x4d7   : > { %4430 = vmatprep.mubr.f32.mxu1 %v8264_v46  ;;  %6066 = vmatpush1.bf16.msra.mxu1 %v6065_v32  ;;  %v6074_v46 = vpack.c.bf16 %v3852_v48, %v3851_v51  ;;  %v3853_v32 = vld [vmem:[#allocation9 + $0x3a0] sm:$0xff]  ;;  %v3858_v51 = vld [vmem:[#allocation9 + $0x3c8] sm:$0xff] }
 0x4d8   : > { %6067 = vmatprep.subr.bf16.mxu1 %v9378_v5  ;;  %v8622_v48 = vld [vmem:[#allocation2 + $0x99] sm:$0xff] }
 0x4da   : > { %4431 = vmatmul.mubr.f32.gmra.mrb[46].mxu1 %v8602_v11 }
 0x4db   : > { %4435 = vmatprep.mubr.f32.mxu1 %v8268_v62  ;;  %6069 = vmatpush1.bf16.msra.mxu1 %v6068_v21  ;;  %v6077_v62 = vpack.c.bf16 %v3854_v59, %v3853_v32  ;;  %v3855_v21 = vld [vmem:[#allocation9 + $0x3b0] sm:$0xff]  ;;  %v3860_v32 = vld [vmem:[#allocation9 + $0x3d8] sm:$0xff] }
 0x4dc   : > { %6070 = vmatprep.subr.bf16.mxu1 %v9378_v5  ;;  %v8627_v59 = vld [vmem:[#allocation2 + $0xa9] sm:$0xff] }
 0x4de   : > { %4436 = vmatmul.mubr.f32.gmra.mrb[48].mxu1 %v8607_v52 }
 0x4df   : > { %4440 = vmatprep.mubr.f32.mxu1 %v8275_v35  ;;  %6072 = vmatpush1.bf16.msra.mxu1 %v6071_v20  ;;  %v6080_v35 = vpack.c.bf16 %v3856_v16, %v3855_v21  ;;  %v3857_v20 = vld [vmem:[#allocation9 + $0x3c0] sm:$0xff]  ;;  %v3862_v21 = vld [vmem:[#allocation9 + $0x3e8] sm:$0xff] }
 0x4e0   : > { %6073 = vmatprep.subr.bf16.mxu1 %v9378_v5  ;;  %v8632_v16 = vld [vmem:[#allocation2 + $0xb1] sm:$0xff] }
 0x4e2   : > { %4441 = vmatmul.mubr.f32.gmra.mrb[50].mxu1 %v8612_v37 }
 0x4e3   : > { %4445 = vmatprep.mubr.f32.mxu1 %v8279_v9  ;;  %6075 = vmatpush1.bf16.msra.mxu1 %v6074_v46  ;;  %v6083_v9 = vpack.c.bf16 %v3858_v51, %v3857_v20  ;;  %v3859_v46 = vld [vmem:[#allocation9 + $0x3d0] sm:$0xff]  ;;  %v3864_v20 = vld [vmem:[#allocation9 + $0x3f8] sm:$0xff] }
 0x4e4   : > { %6076 = vmatprep.subr.bf16.mxu1 %v9378_v5  ;;  %v8637_v51 = vld [vmem:[#allocation2 + $0xc1] sm:$0xff] }
 0x4e6   : > { %4446 = vmatmul.mubr.f32.gmra.mrb[52].mxu1 %v8617_v26 }
 0x4e7   : > { %4450 = vmatprep.mubr.f32.mxu1 %v8285_v50  ;;  %6078 = vmatpush1.bf16.msra.mxu1 %v6077_v62  ;;  %v6086_v50 = vpack.c.bf16 %v3860_v32, %v3859_v46  ;;  %v3861_v62 = vld [vmem:[#allocation9 + $0x3e0] sm:$0xff]  ;;  %v8647_v46 = vld [vmem:[#allocation2 + $0xd9] sm:$0xff] }
 0x4e8   : > { %6079 = vmatprep.subr.bf16.mxu1 %v9378_v5  ;;  %v8663_v32 = vld [vmem:[#allocation2 + $0x109] sm:$0xff] }
 0x4ea   : > { %4451 = vmatmul.mubr.f32.gmra.mrb[54].mxu1 %v8622_v48 }
 0x4eb   : > { %4455 = vmatprep.mubr.f32.mxu1 %v8289_v60  ;;  %6081 = vmatpush1.bf16.msra.mxu1 %v6080_v35  ;;  %v6089_v60 = vpack.c.bf16 %v3862_v21, %v3861_v62  ;;  %v3863_v35 = vld [vmem:[#allocation9 + $0x3f0] sm:$0xff]  ;;  %v8708_v21 = vld [vmem:[#allocation2 + $0x18a] sm:$0xff] }
 0x4ec   : > { %6082 = vmatprep.subr.bf16.mxu1 %v9378_v5  ;;  %v8705_v62 = vld [vmem:[#allocation2 + $0x181] sm:$0xff] }
 0x4ee   : > { %4456 = vmatmul.mubr.f32.gmra.mrb[56].mxu1 %v8627_v59 }
 0x4ef   : > { %4460 = vmatprep.mubr.f32.mxu1 %v8295_v25  ;;  %6084 = vmatpush1.bf16.msra.mxu1 %v6083_v9  ;;  %v6092_v25 = vpack.c.bf16 %v3864_v20, %v3863_v35  ;;  %v8642_v9 = vld [vmem:[#allocation2 + $0xc9] sm:$0xff]  ;;  %v9397_v20 = vld [vmem:[#allocation48_spill] sm:$0xff] }
 0x4f0   : > { %6085 = vmatprep.subr.bf16.mxu1 %v9378_v5  ;;  %v3257_v35 = vld [vmem:[#allocation2 + $0x30] sm:$0xff] }
 0x4f2   : > { %4461 = vmatmul.mubr.f32.gmra.mrb[58].mxu1 %v8632_v16 }
 0x4f3   : > { %4465 = vmatprep.mubr.f32.mxu1 %v8299_v57  ;;  %6087 = vmatpush1.bf16.msra.mxu1 %v6086_v50  ;;  %v9396_v57 = vld [vmem:[#allocation47_spill] sm:$0xff]  ;;  %v8702_v50 = vld [vmem:[#allocation2 + $0x182] sm:$0xff] }
 0x4f4   : > { %6088 = vmatprep.subr.bf16.mxu1 %v9378_v5 }
 0x4f6   : > { %4466 = vmatmul.mubr.f32.gmra.mrb[60].mxu1 %v8637_v51 }
 0x4f7   : > { %4470 = vmatprep.mubr.f32.mxu1 %v8305_v63  ;;  %6090 = vmatpush1.bf16.msra.mxu1 %v6089_v60  ;;  %v8651_v63 = vld [vmem:[#allocation2 + $0xe1] sm:$0xff]  ;;  %v8711_v60 = vld [vmem:[#allocation2 + $0x189] sm:$0xff] }
 0x4f8   : > { %6091 = vmatprep.subr.bf16.mxu1 %v9378_v5  ;;  %v8655_v5 = vld [vmem:[#allocation2 + $0xf1] sm:$0xff] }
 0x4fa   : > { %4471 = vmatmul.mubr.f32.gmra.mrb[62].mxu1 %v8642_v9 }
 0x4fb   : > { %4475 = vmatprep.mubr.f32.mxu1 %v8309_v49  ;;  %6093 = vmatpush1.bf16.msra.mxu1 %v6092_v25  ;;  %v8659_v49 = vld [vmem:[#allocation2 + $0xf9] sm:$0xff] }
 0x4fc   : > { %6126 = vmatprep.subr.bf16.mxu1 %v9396_v57  ;;  %v3258_v25 = vld [vmem:[#allocation2 + $0x38] sm:$0xff] }
 0x4fe   : > { %4476 = vmatmul.mubr.f32.gmra.mrb[64].mxu1 %v8647_v46 }
 0x4ff   : > { %4480 = vmatprep.mubr.f32.mxu1 %v8315_v7  ;;  %v8667_v7 = vld [vmem:[#allocation2 + $0x111] sm:$0xff] }
 0x502   : > { %4481 = vmatmul.mubr.f32.gmra.mrb[66].mxu1 %v8651_v63 }
 0x503   : > { %4485 = vmatprep.mubr.f32.mxu1 %v8319_v30  ;;  %v8671_v30 = vld [vmem:[#allocation2 + $0x121] sm:$0xff] }
 0x506   : > { %4486 = vmatmul.mubr.f32.gmra.mrb[68].mxu1 %v8655_v5 }
 0x507   : > { %4490 = vmatprep.mubr.f32.mxu1 %v8325_v56  ;;  %v8675_v56 = vld [vmem:[#allocation2 + $0x129] sm:$0xff] }
 0x50a   : > { %4491 = vmatmul.mubr.f32.gmra.mrb[70].mxu1 %v8659_v49 }
 0x50b   : > { %4495 = vmatprep.mubr.f32.mxu1 %v8329_v18  ;;  %v8679_v18 = vld [vmem:[#allocation2 + $0x139] sm:$0xff] }
 0x50e   : > { %4496 = vmatmul.mubr.f32.gmra.mrb[72].mxu1 %v8663_v32 }
 0x50f   : > { %4500 = vmatprep.mubr.f32.mxu1 %v8335_v1  ;;  %v8683_v1 = vld [vmem:[#allocation2 + $0x141] sm:$0xff] }
 0x512   : > { %4501 = vmatmul.mubr.f32.gmra.mrb[74].mxu1 %v8667_v7 }
 0x513   : > { %4505 = vmatprep.mubr.f32.mxu1 %v8339_v47  ;;  %v8687_v47 = vld [vmem:[#allocation2 + $0x151] sm:$0xff] }
 0x516   : > { %4506 = vmatmul.mubr.f32.gmra.mrb[76].mxu1 %v8671_v30 }
 0x517   : > { %4510 = vmatprep.mubr.f32.mxu1 %v8345_v42  ;;  %v8691_v42 = vld [vmem:[#allocation2 + $0x159] sm:$0xff] }
 0x51a   : > { %4511 = vmatmul.mubr.f32.gmra.mrb[78].mxu1 %v8675_v56 }
 0x51b   : > { %4515 = vmatprep.mubr.f32.mxu1 %v8349_v31  ;;  %v8695_v31 = vld [vmem:[#allocation2 + $0x169] sm:$0xff] }
 0x51e   : > { %4516 = vmatmul.mubr.f32.gmra.mrb[80].mxu1 %v8679_v18 }
 0x51f   : > { %4520 = vmatprep.mubr.f32.mxu1 %v8355_v29  ;;  %v8699_v29 = vld [vmem:[#allocation2 + $0x171] sm:$0xff] }
 0x522   : > { %4521 = vmatmul.mubr.f32.gmra.mrb[82].mxu1 %v8683_v1 }
 0x523   : > { %4525 = vmatprep.mubr.f32.mxu1 %v8525_v45 }
 0x526   : > { %4526 = vmatmul.mubr.f32.gmra.mrb[84].mxu1 %v8687_v47 }
 0x527   : > { %4530 = vmatprep.mubr.f32.mxu1 %v8533_v34 }
 0x52a   : > { %4531 = vmatmul.mubr.f32.gmra.mrb[86].mxu1 %v8691_v42 }
 0x52b   : > { %4535 = vmatprep.mubr.f32.mxu1 %v8543_v36 }
 0x52e   : > { %4536 = vmatmul.mubr.f32.gmra.mrb[88].mxu1 %v8695_v31 }
 0x52f   : > { %4540 = vmatprep.mubr.f32.mxu1 %v8553_v3 }
 0x532   : > { %4541 = vmatmul.mubr.f32.gmra.mrb[90].mxu1 %v8699_v29 }
 0x533   : > { %4545 = vmatprep.mubr.f32.mxu1 %v8702_v50 }
 0x536   : > { %4546 = vmatmul.mubr.f32.gmra.mrb[92].mxu1 %v8705_v62 }
 0x537   : > { %4550 = vmatprep.mubr.f32.mxu1 %v8708_v21 }
 0x53a   : > { %4551 = vmatmul.mubr.f32.gmra.mrb[94].mxu1 %v8711_v60 }
 0x53b   : > { %4620 = vmatprep.mubr.f32.mxu1 %v8573_v19  ;;  %v9399_v19 = vld [vmem:[#allocation50_spill] sm:$0xff] }
 0x53e   : > { %4621 = vmatmul.mubr.f32.vlgmr.msra.gmra.mrb[32].mxu1 %v3257_v35  ;;  %v9403_v35 = vld [vmem:[#allocation54_spill] sm:$0xff] }
 0x53f   : > { %4625 = vmatprep.mubr.f32.mxu1 %v8582_v44  ;;  %6134 = vmatpush3.bf16.msra.mxu1 %v9396_v57  ;;  %v3260_v44 = vld [vmem:[#allocation2 + $0x50] sm:$0xff] }
 0x540   : > { %6127 = vmatprep.subr.bf16.mxu1 %v9397_v20  ;;  %v9400_v57 = vld [vmem:[#allocation51_spill] sm:$0xff] }
 0x542   : > { %4626 = vmatmul.mubr.f32.gmra.mrb[34].mxu1 %v3258_v25  ;;  %v3267_v25 = vld [vmem:[#allocation2 + $0xa8] sm:$0xff] }
 0x543   : > { %4630 = vmatprep.mubr.f32.mxu1 %v8587_v33  ;;  %6135 = vmatpush3.bf16.msra.mxu1 %v9397_v20  ;;  %v3261_v33 = vld [vmem:[#allocation2 + $0x60] sm:$0xff]  ;;  %v3265_v20 = vld [vmem:[#allocation2 + $0x90] sm:$0xff] }
 0x544   : > { %6128 = vmatprep.subr.bf16.mxu1 %v9398_v0 }
 0x546   : > { %4631 = vmatmul.mubr.f32.gmra.mrb[36].mxu1 %v3259_v38  ;;  %v9401_v38 = vld [vmem:[#allocation52_spill] sm:$0xff] }
 0x547   : > { %4635 = vmatprep.mubr.f32.mxu1 %v8592_v17  ;;  %6136 = vmatpush3.bf16.msra.mxu1 %v9398_v0  ;;  %v3262_v17 = vld [vmem:[#allocation2 + $0x68] sm:$0xff]  ;;  %v9402_v0 = vld [vmem:[#allocation53_spill] sm:$0xff] }
 0x548   : > { %6129 = vmatprep.subr.bf16.mxu1 %v9399_v19 }
 0x54a   : > { %4636 = vmatmul.mubr.f32.gmra.mrb[38].mxu1 %v3260_v44 }
 0x54b   : > { %4640 = vmatprep.mubr.f32.mxu1 %v8597_v40  ;;  %6137 = vmatpush3.bf16.msra.mxu1 %v9399_v19  ;;  %v3263_v40 = vld [vmem:[#allocation2 + $0x78] sm:$0xff]  ;;  %v3269_v19 = vld [vmem:[#allocation2 + $0xc0] sm:$0xff] }
 0x54c   : > { %6130 = vmatprep.subr.bf16.mxu1 %v9400_v57 }
 0x54e   : > { %4641 = vmatmul.mubr.f32.gmra.mrb[40].mxu1 %v3261_v33 }
 0x54f   : > { %4645 = vmatprep.mubr.f32.mxu1 %v8602_v11  ;;  %6138 = vmatpush3.bf16.msra.mxu1 %v9400_v57  ;;  %v3264_v11 = vld [vmem:[#allocation2 + $0x80] sm:$0xff] }
 0x550   : > { %6131 = vmatprep.subr.bf16.mxu1 %v9401_v38 }
 0x552   : > { %4646 = vmatmul.mubr.f32.gmra.mrb[42].mxu1 %v3262_v17 }
 0x553   : > { %4650 = vmatprep.mubr.f32.mxu1 %v8607_v52  ;;  %6139 = vmatpush3.bf16.msra.mxu1 %v9401_v38  ;;  %v3266_v52 = vld [vmem:[#allocation2 + $0x98] sm:$0xff] }
 0x554   : > { %6132 = vmatprep.subr.bf16.mxu1 %v9402_v0 }
 0x556   : > { %4651 = vmatmul.mubr.f32.gmra.mrb[44].mxu1 %v3263_v40 }
 0x557   : > { %4655 = vmatprep.mubr.f32.mxu1 %v8612_v37  ;;  %6140 = vmatpush3.bf16.msra.mxu1 %v9402_v0  ;;  %v3268_v37 = vld [vmem:[#allocation2 + $0xb0] sm:$0xff] }
 0x558   : > { %6133 = vmatprep.subr.bf16.mxu1 %v9403_v35 }
 0x55a   : > { %4656 = vmatmul.mubr.f32.gmra.mrb[46].mxu1 %v3264_v11 }
 0x55b   : > { %4660 = vmatprep.mubr.f32.mxu1 %v8617_v26  ;;  %6141 = vmatpush3.bf16.msra.mxu1 %v9403_v35  ;;  %v3270_v26 = vld [vmem:[#allocation2 + $0xc8] sm:$0xff] }
 0x55e   : > { %4661 = vmatmul.mubr.f32.gmra.mrb[48].mxu1 %v3265_v20 }
 0x55f   : > { %4665 = vmatprep.mubr.f32.mxu1 %v8622_v48  ;;  %v3271_v48 = vld [vmem:[#allocation2 + $0xd8] sm:$0xff] }
 0x562   : > { %4666 = vmatmul.mubr.f32.gmra.mrb[50].mxu1 %v3266_v52 }
 0x563   : > { %4670 = vmatprep.mubr.f32.mxu1 %v8627_v59  ;;  %v3272_v59 = vld [vmem:[#allocation2 + $0xe0] sm:$0xff] }
 0x566   : > { %4671 = vmatmul.mubr.f32.gmra.mrb[52].mxu1 %v3267_v25 }
 0x567   : > { %4675 = vmatprep.mubr.f32.mxu1 %v8632_v16  ;;  %v3273_v16 = vld [vmem:[#allocation2 + $0xf0] sm:$0xff] }
 0x56a   : > { %4676 = vmatmul.mubr.f32.gmra.mrb[54].mxu1 %v3268_v37 }
 0x56b   : > { %4680 = vmatprep.mubr.f32.mxu1 %v8637_v51  ;;  %v3274_v51 = vld [vmem:[#allocation2 + $0xf8] sm:$0xff] }
 0x56e   : > { %4681 = vmatmul.mubr.f32.gmra.mrb[56].mxu1 %v3269_v19 }
 0x56f   : > { %4685 = vmatprep.mubr.f32.mxu1 %v8642_v9  ;;  %v3275_v9 = vld [vmem:[#allocation2 + $0x108] sm:$0xff] }
 0x572   : > { %4686 = vmatmul.mubr.f32.gmra.mrb[58].mxu1 %v3270_v26 }
 0x573   : > { %4690 = vmatprep.mubr.f32.mxu1 %v8647_v46  ;;  %v3276_v46 = vld [vmem:[#allocation2 + $0x110] sm:$0xff] }
 0x576   : > { %4691 = vmatmul.mubr.f32.gmra.mrb[60].mxu1 %v3271_v48 }
 0x577   : > { %4695 = vmatprep.mubr.f32.mxu1 %v8651_v63  ;;  %v3277_v63 = vld [vmem:[#allocation2 + $0x120] sm:$0xff] }
 0x57a   : > { %4696 = vmatmul.mubr.f32.gmra.mrb[62].mxu1 %v3272_v59 }
 0x57b   : > { %4700 = vmatprep.mubr.f32.mxu1 %v8655_v5  ;;  %v3278_v5 = vld [vmem:[#allocation2 + $0x128] sm:$0xff] }
 0x57e   : > { %4701 = vmatmul.mubr.f32.gmra.mrb[64].mxu1 %v3273_v16 }
 0x57f   : > { %4705 = vmatprep.mubr.f32.mxu1 %v8659_v49  ;;  %v3279_v49 = vld [vmem:[#allocation2 + $0x138] sm:$0xff] }
 0x582   : > { %4706 = vmatmul.mubr.f32.gmra.mrb[66].mxu1 %v3274_v51 }
 0x583   : > { %4710 = vmatprep.mubr.f32.mxu1 %v8663_v32  ;;  %v3280_v32 = vld [vmem:[#allocation2 + $0x140] sm:$0xff] }
 0x586   : > { %4711 = vmatmul.mubr.f32.gmra.mrb[68].mxu1 %v3275_v9 }
 0x587   : > { %4715 = vmatprep.mubr.f32.mxu1 %v8667_v7  ;;  %v3281_v7 = vld [vmem:[#allocation2 + $0x150] sm:$0xff] }
 0x58a   : > { %4716 = vmatmul.mubr.f32.gmra.mrb[70].mxu1 %v3276_v46 }
 0x58b   : > { %4720 = vmatprep.mubr.f32.mxu1 %v8671_v30  ;;  %v3282_v30 = vld [vmem:[#allocation2 + $0x158] sm:$0xff] }
 0x58e   : > { %4721 = vmatmul.mubr.f32.gmra.mrb[72].mxu1 %v3277_v63 }
 0x58f   : > { %4725 = vmatprep.mubr.f32.mxu1 %v8675_v56  ;;  %v3283_v56 = vld [vmem:[#allocation2 + $0x168] sm:$0xff] }
 0x592   : > { %4726 = vmatmul.mubr.f32.gmra.mrb[74].mxu1 %v3278_v5 }
 0x593   : > { %4730 = vmatprep.mubr.f32.mxu1 %v8679_v18  ;;  %v3284_v18 = vld [vmem:[#allocation2 + $0x170] sm:$0xff] }
 0x596   : > { %4731 = vmatmul.mubr.f32.gmra.mrb[76].mxu1 %v3279_v49 }
 0x597   : > { %4735 = vmatprep.mubr.f32.mxu1 %v8683_v1  ;;  %v3351_v1 = vld [vmem:[#allocation2 + $0x199] sm:$0xff] }
 0x59a   : > { %4736 = vmatmul.mubr.f32.gmra.mrb[78].mxu1 %v3280_v32 }
 0x59b   : > { %4740 = vmatprep.mubr.f32.mxu1 %v8687_v47  ;;  %v3352_v47 = vld [vmem:[#allocation2 + $0x1a1] sm:$0xff] }
 0x59e   : > { %4741 = vmatmul.mubr.f32.gmra.mrb[80].mxu1 %v3281_v7 }
 0x59f   : > { %4745 = vmatprep.mubr.f32.mxu1 %v8691_v42  ;;  %v6636_v42 = vld [vmem:[#allocation2] sm:$0xff] }
 0x5a2   : > { %4746 = vmatmul.mubr.f32.gmra.mrb[82].mxu1 %v3282_v30 }
 0x5a3   : > { %4750 = vmatprep.mubr.f32.mxu1 %v8695_v31 }
 0x5a6   : > { %4751 = vmatmul.mubr.f32.gmra.mrb[84].mxu1 %v3283_v56 }
 0x5a7   : > { %4755 = vmatprep.mubr.f32.mxu1 %v8699_v29 }
 0x5aa   : > { %4756 = vmatmul.mubr.f32.gmra.mrb[86].mxu1 %v3284_v18 }
 0x5ab   : > { %4760 = vmatprep.mubr.f32.mxu1 %v8705_v62 }
 0x5ae   : > { %4761 = vmatmul.mubr.f32.gmra.mrb[88].mxu1 %v8536_v15  ;;  %v3415_v15 = vld [vmem:[#allocation2 + $0x19a] sm:$0xff] }
 0x5af   : > { %4765 = vmatprep.mubr.f32.mxu1 %v8711_v60 }
 0x5b2   : > { %4766 = vmatmul.mubr.f32.gmra.mrb[90].mxu1 %v8546_v13  ;;  %v3416_v13 = vld [vmem:[#allocation2 + $0x1a2] sm:$0xff] }
 0x5b3   : > { %4770 = vmatprep.mubr.f32.mxu1 %v3351_v1 }
 0x5b6   : > { %4771 = vmatmul.mubr.f32.gmra.mrb[92].mxu1 %v6636_v42 }
 0x5b7   : > { %4775 = vmatprep.mubr.f32.mxu1 %v3352_v47 }
 0x5ba   : > { %4776 = vmatmul.mubr.f32.gmra.mrb[94].mxu1 %v6636_v42 }
 0x5bb   : > { %5666 = vmatprep.mubr.f32.mxu1 %v8525_v45 }
 0x5be   : > { %5667 = vmatmul.mubr.f32.vlgmr.msra.gmra.mrb[96].mxu1 %v8533_v34 }
 0x5bf   : > { %5669 = vmatprep.mubr.f32.mxu1 %v8543_v36 }
 0x5c2   : > { %5670 = vmatmul.mubr.f32.gmra.mrb[98].mxu1 %v8553_v3 }
 0x5c3   : > { %5672 = vmatprep.mubr.f32.mxu1 %v8702_v50 }
 0x5c6   : > { %5673 = vmatmul.mubr.f32.gmra.mrb[100].mxu1 %v8708_v21 }
 0x5c7   : > { %5675 = vmatprep.mubr.f32.mxu1 %v3415_v15 }
 0x5ca   : > { %5676 = vmatmul.mubr.f32.gmra.mrb[102].mxu1 %v3416_v13 }
 0x611   : > { %v4622_v31 = vpop.f32.mrb[32].mxu1 }
 0x612   : > { %v8768_v29 = vadd.f32 %v8499_v55, %v4622_v31  ;;  %v4624_v62 = vpop.f32.mrb[33].mxu1 }
 0x613   : > { %v9404_v62 = vld [vmem:[#allocation57_spill] sm:$0xff] }
 0x615   : > { %v4627_v45 = vpop.f32.mrb[34].mxu1 }
 0x616   : > { %v8771_v34 = vadd.f32 %v8496_v8, %v4627_v45  ;;  %v4629_v36 = vpop.f32.mrb[35].mxu1 }
 0x619   : > { %v4632_v60 = vpop.f32.mrb[36].mxu1 }
 0x61a   : > { %v8774_v3 = vadd.f32 %v8505_v10, %v4632_v60  ;;  %v4634_v50 = vpop.f32.mrb[37].mxu1  ;;  %v9405_v60 = vld [vmem:[#allocation56_spill] sm:$0xff] }
 0x61d   : > { %v4637_v44 = vpop.f32.mrb[38].mxu1 }
 0x61e   : > { %v8777_v21 = vadd.f32 %v8502_v61, %v4637_v44  ;;  %v4639_v57 = vpop.f32.mrb[39].mxu1  ;;  %v5006_v44 = vmul.f32 %v8768_v29, %v8768_v29 }
 0x621   : > { %v4642_v33 = vpop.f32.mrb[40].mxu1 }
 0x622   : > { %v8780_v55 = vadd.f32 %v8511_v58, %v4642_v33  ;;  %v4644_v38 = vpop.f32.mrb[41].mxu1  ;;  %v5009_v33 = vmul.f32 %v8777_v21, %v8777_v21 }
 0x625   : > { %v4647_v17 = vpop.f32.mrb[42].mxu1 }
 0x626   : > { %v8783_v8 = vadd.f32 %v8508_v2, %v4647_v17  ;;  %v4649_v0 = vpop.f32.mrb[43].mxu1  ;;  %v9406_v17 = vld [vmem:[#allocation59_spill] sm:$0xff] }
 0x629   : > { %v4652_v40 = vpop.f32.mrb[44].mxu1 }
 0x62a   : > { %v8786_v10 = vadd.f32 %v8517_v12, %v4652_v40  ;;  %v4654_v35 = vpop.f32.mrb[45].mxu1 }
 0x62d   : > { %v4657_v11 = vpop.f32.mrb[46].mxu1 }
 0x62e   : > { %v8789_v61 = vadd.f32 %v8514_v28, %v4657_v11  ;;  %v4659_v20 = vpop.f32.mrb[47].mxu1  ;;  %v5010_v11 = vmul.f32 %v8780_v55, %v8780_v55 }
 0x631   : > { %v4662_v52 = vpop.f32.mrb[48].mxu1 }
 0x632   : > { %v8792_v58 = vadd.f32 %v8523_v22, %v4662_v52  ;;  %v4664_v25 = vpop.f32.mrb[49].mxu1  ;;  %v5011_v52 = vmul.f32 %v8783_v8, %v8783_v8 }
 0x635   : > { %v4667_v37 = vpop.f32.mrb[50].mxu1 }
 0x636   : > { %v8795_v2 = vadd.f32 %v8520_v43, %v4667_v37  ;;  %v4669_v19 = vpop.f32.mrb[51].mxu1  ;;  %v9407_v37 = vld [vmem:[#allocation58_spill] sm:$0xff] }
 0x639   : > { %v4672_v26 = vpop.f32.mrb[52].mxu1 }
 0x63a   : > { %v8798_v12 = vadd.f32 %v8531_v41, %v4672_v26  ;;  %v4674_v48 = vpop.f32.mrb[53].mxu1 }
 0x63d   : > { %v4677_v59 = vpop.f32.mrb[54].mxu1 }
 0x63e   : > { %v8801_v28 = vadd.f32 %v8528_v14, %v4677_v59  ;;  %v4679_v16 = vpop.f32.mrb[55].mxu1  ;;  %v5012_v59 = vmul.f32 %v8786_v10, %v8786_v10 }
 0x641   : > { %v4682_v51 = vpop.f32.mrb[56].mxu1 }
 0x642   : > { %v8804_v22 = vadd.f32 %v8541_v4, %v4682_v51  ;;  %v4684_v9 = vpop.f32.mrb[57].mxu1  ;;  %v5013_v51 = vmul.f32 %v8789_v61, %v8789_v61 }
 0x645   : > { %v4687_v46 = vpop.f32.mrb[58].mxu1 }
 0x646   : > { %v8807_v43 = vadd.f32 %v8538_v23, %v4687_v46  ;;  %v4689_v63 = vpop.f32.mrb[59].mxu1 }
 0x649   : > { %v4692_v5 = vpop.f32.mrb[60].mxu1 }
 0x64a   : > { %v8810_v41 = vadd.f32 %v8551_v24, %v4692_v5  ;;  %v4694_v49 = vpop.f32.mrb[61].mxu1  ;;  %v5014_v5 = vmul.f32 %v8792_v58, %v8792_v58 }
 0x64d   : > { %v4697_v32 = vpop.f32.mrb[62].mxu1 }
 0x64e   : > { %v8813_v14 = vadd.f32 %v8548_v6, %v4697_v32  ;;  %v4699_v7 = vpop.f32.mrb[63].mxu1  ;;  %v5015_v32 = vmul.f32 %v8795_v2, %v8795_v2 }
 0x651   : > { %v4702_v30 = vpop.f32.mrb[64].mxu1 }
 0x652   : > { %v8816_v4 = vadd.f32 %v8559_v39, %v4702_v30  ;;  %v4704_v56 = vpop.f32.mrb[65].mxu1 }
 0x655   : > { %v4707_v18 = vpop.f32.mrb[66].mxu1 }
 0x656   : > { %v8819_v23 = vadd.f32 %v8556_v27, %v4707_v18  ;;  %v4709_v1 = vpop.f32.mrb[67].mxu1  ;;  %v5007_v27 = vmul.f32 %v8771_v34, %v8771_v34  ;;  %v5016_v18 = vmul.f32 %v8798_v12, %v8798_v12 }
 0x658   : > { %v5038_v57 = vadd.f32 %v5007_v27, %v5006_v44 }
 0x659   : > { %v4712_v47 = vpop.f32.mrb[68].mxu1 }
 0x65a   : > { %v8822_v24 = vadd.f32 %v8564_v54, %v4712_v47  ;;  %v4714_v42 = vpop.f32.mrb[69].mxu1  ;;  %v5017_v47 = vmul.f32 %v8801_v28, %v8801_v28 }
 0x65d   : > { %v4717_v15 = vpop.f32.mrb[70].mxu1 }
 0x65e   : > { %v8825_v6 = vadd.f32 %v8561_v53, %v4717_v15  ;;  %v4719_v13 = vpop.f32.mrb[71].mxu1  ;;  %v5008_v53 = vmul.f32 %v8774_v3, %v8774_v3 }
 0x660   : > { %v5039_v35 = vadd.f32 %v5038_v57, %v5008_v53  ;;  %v5021_v53 = vmul.f32 %v8813_v14, %v8813_v14 }
 0x661   : > { %v4722_v31 = vpop.f32.mrb[72].mxu1 }
 0x662   : > { %v8828_v39 = vadd.f32 %v9404_v62, %v4722_v31  ;;  %v4724_v45 = vpop.f32.mrb[73].mxu1  ;;  %v5040_v20 = vadd.f32 %v5039_v35, %v5009_v33  ;;  %v5018_v31 = vmul.f32 %v8804_v22, %v8804_v22  ;;  %v5023_v35 = vmul.f32 %v8819_v23, %v8819_v23 }
 0x663   : > { %v5019_v45 = vmul.f32 %v8807_v43, %v8807_v43 }
 0x664   : > { %v5041_v48 = vadd.f32 %v5040_v20, %v5010_v11 }
 0x665   : > { %v4727_v36 = vpop.f32.mrb[74].mxu1 }
 0x666   : > { %v8833_v50 = vadd.f32 %v9405_v60, %v4727_v36  ;;  %v4729_v54 = vpop.f32.mrb[75].mxu1  ;;  %v5042_v16 = vadd.f32 %v5041_v48, %v5011_v52 }
 0x667   : > { %v5020_v54 = vmul.f32 %v8810_v41, %v8810_v41 }
 0x668   : > { %v5043_v63 = vadd.f32 %v5042_v16, %v5012_v59 }
 0x669   : > { %v4732_v38 = vpop.f32.mrb[76].mxu1 }
 0x66a   : > { %v8842_v0 = vadd.f32 %v9406_v17, %v4732_v38  ;;  %v4734_v40 = vpop.f32.mrb[77].mxu1  ;;  %v5044_v49 = vadd.f32 %v5043_v63, %v5013_v51  ;;  %v5022_v17 = vmul.f32 %v8816_v4, %v8816_v4  ;;  %v5026_v51 = vmul.f32 %v8828_v39, %v8828_v39 }
 0x66b   : > { %v5027_v63 = vmul.f32 %v8833_v50, %v8833_v50 }
 0x66c   : > { %v5045_v56 = vadd.f32 %v5044_v49, %v5014_v5 }
 0x66d   : > { %v4737_v25 = vpop.f32.mrb[78].mxu1 }
 0x66e   : > { %v8849_v19 = vadd.f32 %v9407_v37, %v4737_v25  ;;  %v4739_v26 = vpop.f32.mrb[79].mxu1  ;;  %v5046_v1 = vadd.f32 %v5045_v56, %v5015_v32  ;;  %v5024_v25 = vmul.f32 %v8822_v24, %v8822_v24 }
 0x66f   : > { %v5025_v26 = vmul.f32 %v8825_v6, %v8825_v6 }
 0x670   : > { %v5047_v13 = vadd.f32 %v5046_v1, %v5016_v18  ;;  %v5029_v18 = vmul.f32 %v8849_v19, %v8849_v19 }
 0x671   : > { %v4742_v9 = vpop.f32.mrb[80].mxu1 }
 0x672   : > { %v4744_v46 = vpop.f32.mrb[81].mxu1  ;;  %v5048_v62 = vadd.f32 %v5047_v13, %v5017_v47 }
 0x674   : > { %v5049_v60 = vadd.f32 %v5048_v62, %v5018_v31 }
 0x675   : > { %v4747_v7 = vpop.f32.mrb[82].mxu1 }
 0x676   : > { %v4749_v30 = vpop.f32.mrb[83].mxu1  ;;  %v5050_v44 = vadd.f32 %v5049_v60, %v5019_v45 }
 0x677   : > { %v5028_v30 = vmul.f32 %v8842_v0, %v8842_v0 }
 0x678   : > { %v5051_v38 = vadd.f32 %v5050_v44, %v5020_v54 }
 0x679   : > { %v4752_v42 = vpop.f32.mrb[84].mxu1 }
 0x67a   : > { %v4754_v15 = vpop.f32.mrb[85].mxu1  ;;  %v5052_v40 = vadd.f32 %v5051_v38, %v5021_v53 }
 0x67c   : > { %v5053_v52 = vadd.f32 %v5052_v40, %v5022_v17 }
 0x67d   : > { %v4757_v27 = vpop.f32.mrb[86].mxu1 }
 0x67e   : > { %v4759_v36 = vpop.f32.mrb[87].mxu1  ;;  %v5054_v37 = vadd.f32 %v5053_v52, %v5023_v35 }
 0x680   : > { %v5055_v16 = vadd.f32 %v5054_v37, %v5024_v25 }
 0x681   : > { %v4762_v57 = vpop.f32.mrb[88].mxu1 }
 0x682   : > { %v4764_v33 = vpop.f32.mrb[89].mxu1  ;;  %v5056_v46 = vadd.f32 %v5055_v16, %v5025_v26 }
 0x684   : > { %v5057_v32 = vadd.f32 %v5056_v46, %v5026_v51 }
 0x685   : > { %v4767_v11 = vpop.f32.mrb[90].mxu1 }
 0x686   : > { %v4769_v20 = vpop.f32.mrb[91].mxu1  ;;  %v5058_v56 = vadd.f32 %v5057_v32, %v5027_v63 }
 0x688   : > { %v5059_v13 = vadd.f32 %v5058_v56, %v5028_v30 }
 0x689   : > { %v4772_v48 = vpop.f32.mrb[92].mxu1 }
 0x68a   : > { %v4774_v59 = vpop.f32.mrb[93].mxu1  ;;  %v5060_v62 = vadd.f32 %v5059_v13, %v5029_v18 }
 0x68d   : > { %v4777_v5 = vpop.f32.mrb[94].mxu1 }
 0x68e   : > { %v4779_v49 = vpop.f32.mrb[95].mxu1 }
 0x691   : > { %v5668_v1 = vpop.f32.mrb[96].mxu1 }
 0x692   : > { %v8887_v47 = vadd.f32 %v5668_v1, %v4747_v7  ;;  %v4967_v15 = vpop.f32.mrb[97].mxu1 }
 0x693   : > { %v8889_v31 = vadd.f32 %v4967_v15, %v4742_v9 }
 0x694   : > { %v5031_v44 = vmul.f32 %v8887_v47, %v8887_v47 }
 0x695   : > { %v5030_v45 = vmul.f32 %v8889_v31, %v8889_v31  ;;  %v5671_v36 = vpop.f32.mrb[98].mxu1 }
 0x696   : > { %v8893_v60 = vadd.f32 %v5671_v36, %v4757_v27  ;;  %v4977_v54 = vpop.f32.mrb[99].mxu1  ;;  %v9408_v36 = vld [vmem:[#allocation55_spill] sm:$0xff] }
 0x697   : > { %v5061_v53 = vadd.f32 %v5060_v62, %v5030_v45  ;;  %v8897_v33 = vadd.f32 %v4977_v54, %v4752_v42  ;;  %v9409_v54 = vsub.s32 0, %v9408_v36 }
 0x698   : > { %v5033_v35 = vmul.f32 %v8893_v60, %v8893_v60 }
 0x699   : > { %v5032_v7 = vmul.f32 %v8897_v33, %v8897_v33  ;;  %v5062_v38 = vadd.f32 %v5061_v53, %v5031_v44  ;;  %v5674_v9 = vpop.f32.mrb[100].mxu1  ;;  %v8915_v53 = vld [vmem:[%s9270_s7] ss:$0 sm:$0xff] }
 0x69a   : > { %v8901_v17 = vadd.f32 %v5674_v9, %v4767_v11  ;;  %v4987_v40 = vpop.f32.mrb[101].mxu1 }
 0x69b   : > { %v5063_v27 = vadd.f32 %v5062_v38, %v5032_v7  ;;  %v4988_v20 = vadd.f32 %v4987_v40, %v4762_v57 }
 0x69c   : > { %v5035_v42 = vmul.f32 %v8901_v17, %v8901_v17 }
 0x69d   : > { %v5034_v52 = vmul.f32 %v4988_v20, %v4988_v20  ;;  %v5064_v25 = vadd.f32 %v5063_v27, %v5033_v35  ;;  %v5677_v37 = vpop.f32.mrb[102].mxu1  ;;  %v8923_v35 = vld [vmem:[%s9271_s8] ss:$0 sm:$0xff] }
 0x69e   : > { %v5003_v26 = vadd.f32 %v5677_v37, %v4777_v5  ;;  %v4997_v59 = vpop.f32.mrb[103].mxu1  ;;  %v5076_v5 = vld [vmem:[%s9269_s6] sm:$0x1] }
 0x69f   : > { %v5065_v16 = vadd.f32 %v5064_v25, %v5034_v52  ;;  %v4998_v51 = vadd.f32 %v4997_v59, %v4772_v48 }
 0x6a0   : > { %v5037_v11 = vmul.f32 %v5003_v26, %v5003_v26 }
 0x6a1   : > { %v5036_v46 = vmul.f32 %v4998_v51, %v4998_v51  ;;  %v5066_v63 = vadd.f32 %v5065_v16, %v5035_v42 }
 0x6a3   : > { %v5067_v49 = vadd.f32 %v5066_v63, %v5036_v46  ;;  %v9410_v46 = vld [vmem:[#allocation45_spill] sm:$0xff] }
 0x6a5   : > { %v5068_v32 = vadd.f32 %v5067_v49, %v5037_v11 }
 0x6a7   : > { %v5069_v30 = vrot.slane %v5068_v32, 4 }
 0x6a9   : > { %v5070_v56 = vadd.f32 %v5069_v30, %v5068_v32 }
 0x6ab   : > { %v5071_v18 = vrot.slane %v5070_v56, 2 }
 0x6ad   : > { %v5072_v1 = vadd.f32 %v5071_v18, %v5070_v56 }
 0x6af   : > { %v5073_v57 = vrot.slane %v5072_v1, 1 }
 0x6b1   : > { %v5074_v15 = vadd.f32 %v5073_v57, %v5072_v1 }
 0x6b3   : > { %v5075_v13 = vmul.f32 0.00390625, %v5074_v15 }
 0x6b5   : > { %v5077_v62 = vadd.f32 1e-06, %v5075_v13 }
 0x6b7   : > { %6601 = vrsqrt.f32 %v5077_v62 }
 0x6c1   : > { %v6602_v45 = vpop.eup %6601 }
 0x6c2   : > { %v5079_v48 = vmul.f32 %v6602_v45, %v5076_v5 }
 0x6c4   : > { %v5084_v44 = vrot.slane %v5079_v48, %v9409_v54 }
 0x6c6   : > { %v5116_v7 = vmul.f32 %v5084_v44, %v4998_v51  ;;  %v5086_v38 = vmul.f32 %v5084_v44, %v8768_v29  ;;  %v5087_v9 = vmul.f32 %v5084_v44, %v8771_v34  ;;  %v5088_v40 = vmul.f32 %v5084_v44, %v8774_v3 }
 0x6c7   : > { %v5089_v27 = vmul.f32 %v5084_v44, %v8777_v21  ;;  %v5090_v52 = vmul.f32 %v5084_v44, %v8780_v55  ;;  %v5091_v25 = vmul.f32 %v5084_v44, %v8783_v8  ;;  %v5092_v37 = vmul.f32 %v5084_v44, %v8786_v10 }
 0x6c8   : > { %v5155_v59 = vadd.f32 %v8915_v53, %v5116_v7  ;;  %v5093_v29 = vmul.f32 %v5084_v44, %v8789_v61  ;;  %v5094_v34 = vmul.f32 %v5084_v44, %v8792_v58  ;;  %v5095_v3 = vmul.f32 %v5084_v44, %v8795_v2 }
 0x6c9   : > { %v5096_v42 = vmul.f32 %v5084_v44, %v8798_v12  ;;  %v5097_v16 = vmul.f32 %v5084_v44, %v8801_v28  ;;  %v5098_v21 = vmul.f32 %v5084_v44, %v8804_v22  ;;  %v5099_v55 = vmul.f32 %v5084_v44, %v8807_v43 }
 0x6ca   : > { %v5194_v8 = vmax.f32 %v5155_v59, %v8923_v35  ;;  %v5100_v10 = vmul.f32 %v5084_v44, %v8810_v41  ;;  %v5101_v51 = vmul.f32 %v5084_v44, %v8813_v14  ;;  %v5102_v61 = vmul.f32 %v5084_v44, %v8816_v4 }
 0x6cb   : > { %v5103_v58 = vmul.f32 %v5084_v44, %v8819_v23  ;;  %v5104_v2 = vmul.f32 %v5084_v44, %v8822_v24  ;;  %v5105_v12 = vmul.f32 %v5084_v44, %v8825_v6  ;;  %v5106_v28 = vmul.f32 %v5084_v44, %v8828_v39 }
 0x6cc   : > { %v5226_v22 = vadd.f32 %v9410_v46, %v5194_v8  ;;  %v5107_v43 = vmul.f32 %v5084_v44, %v8833_v50  ;;  %v5108_v63 = vmul.f32 %v5084_v44, %v8842_v0  ;;  %v5109_v41 = vmul.f32 %v5084_v44, %v8849_v19 }
 0x6cd   : > { %v5110_v14 = vmul.f32 %v5084_v44, %v8889_v31  ;;  %v5111_v4 = vmul.f32 %v5084_v44, %v8887_v47  ;;  %v5112_v23 = vmul.f32 %v5084_v44, %v8897_v33  ;;  %v5113_v24 = vmul.f32 %v5084_v44, %v8893_v60 }
 0x6ce   : > { %v5258_v6 = vmax.f32 %v5226_v22, 0.0  ;;  %v5114_v11 = vmul.f32 %v5084_v44, %v4988_v20  ;;  %v5115_v39 = vmul.f32 %v5084_v44, %v8901_v17  ;;  %v5117_v49 = vmul.f32 %v5084_v44, %v5003_v26 }
 0x6cf   : > { %v8955_v32 = vadd.f32 %v8915_v53, %v5086_v38  ;;  %v8958_v50 = vadd.f32 %v8915_v53, %v5087_v9  ;;  %v8961_v0 = vadd.f32 %v8915_v53, %v5088_v40  ;;  %v8964_v19 = vadd.f32 %v8915_v53, %v5089_v27 }
 0x6d0   : > { %5290 = vst [vmem:[%s8968_s17 + $0xf0] sm:$0xff] %v5258_v6  ;;  %v8972_v47 = vadd.f32 %v8915_v53, %v5090_v52  ;;  %v8975_v31 = vadd.f32 %v8915_v53, %v5091_v25  ;;  %v8978_v60 = vadd.f32 %v8915_v53, %v5092_v37  ;;  %v8981_v33 = vadd.f32 %v8915_v53, %v5093_v29 }
 0x6d1   : > { %v8984_v17 = vadd.f32 %v8915_v53, %v5094_v34  ;;  %v8987_v20 = vadd.f32 %v8915_v53, %v5095_v3  ;;  %v8990_v26 = vadd.f32 %v8915_v53, %v5096_v42  ;;  %v8993_v30 = vadd.f32 %v8915_v53, %v5097_v16 }
 0x6d2   : > { %v8996_v56 = vadd.f32 %v8915_v53, %v5098_v21  ;;  %v8999_v18 = vadd.f32 %v8915_v53, %v5099_v55  ;;  %v9002_v1 = vadd.f32 %v8915_v53, %v5100_v10  ;;  %v9005_v57 = vadd.f32 %v8915_v53, %v5101_v51 }
 0x6d3   : > { %v9008_v15 = vadd.f32 %v8915_v53, %v5102_v61  ;;  %v9011_v13 = vadd.f32 %v8915_v53, %v5103_v58  ;;  %v9014_v62 = vadd.f32 %v8915_v53, %v5104_v2  ;;  %v9017_v5 = vadd.f32 %v8915_v53, %v5105_v12 }
 0x6d4   : > { %v9020_v45 = vadd.f32 %v8915_v53, %v5106_v28  ;;  %v9023_v48 = vadd.f32 %v8915_v53, %v5107_v43  ;;  %v9026_v36 = vadd.f32 %v8915_v53, %v5108_v63  ;;  %v9029_v54 = vadd.f32 %v8915_v53, %v5109_v41 }
 0x6d5   : > { %v9032_v44 = vadd.f32 %v8915_v53, %v5110_v14  ;;  %v9035_v7 = vadd.f32 %v8915_v53, %v5111_v4  ;;  %v9038_v38 = vadd.f32 %v8915_v53, %v5112_v23  ;;  %v9041_v9 = vadd.f32 %v8915_v53, %v5113_v24 }
 0x6d6   : > { %v9044_v40 = vadd.f32 %v8915_v53, %v5114_v11  ;;  %v9047_v27 = vadd.f32 %v8915_v53, %v5115_v39  ;;  %v9050_v52 = vadd.f32 %v8915_v53, %v5117_v49  ;;  %v5164_v25 = vmax.f32 %v8955_v32, %v8923_v35  ;;  %v9411_v49 = vld [vmem:[#allocation15_spill] sm:$0xff] }
 0x6d7   : > { %v5165_v37 = vmax.f32 %v8958_v50, %v8923_v35  ;;  %v5166_v59 = vmax.f32 %v8961_v0, %v8923_v35  ;;  %v5167_v29 = vmax.f32 %v8964_v19, %v8923_v35  ;;  %v5168_v34 = vmax.f32 %v8972_v47, %v8923_v35  ;;  %v9412_v50 = vld [vmem:[#allocation16_spill] sm:$0xff]  ;;  %v9413_v19 = vld [vmem:[#allocation17_spill] sm:$0xff] }
 0x6d8   : > { %v5169_v3 = vmax.f32 %v8975_v31, %v8923_v35  ;;  %v5170_v53 = vmax.f32 %v8978_v60, %v8923_v35  ;;  %v5171_v42 = vmax.f32 %v8981_v33, %v8923_v35  ;;  %v5172_v16 = vmax.f32 %v8984_v17, %v8923_v35  ;;  %v9414_v31 = vld [vmem:[#allocation18_spill] sm:$0xff]  ;;  %v9415_v33 = vld [vmem:[#allocation19_spill] sm:$0xff] }
 0x6d9   : > { %v5173_v21 = vmax.f32 %v8987_v20, %v8923_v35  ;;  %v5174_v55 = vmax.f32 %v8990_v26, %v8923_v35  ;;  %v5175_v8 = vmax.f32 %v8993_v30, %v8923_v35  ;;  %v5176_v10 = vmax.f32 %v8996_v56, %v8923_v35  ;;  %v9416_v20 = vld [vmem:[#allocation20_spill] sm:$0xff]  ;;  %v9417_v30 = vld [vmem:[#allocation21_spill] sm:$0xff] }
 0x6da   : > { %v5177_v51 = vmax.f32 %v8999_v18, %v8923_v35  ;;  %v5178_v61 = vmax.f32 %v9002_v1, %v8923_v35  ;;  %v5179_v58 = vmax.f32 %v9005_v57, %v8923_v35  ;;  %v5180_v2 = vmax.f32 %v9008_v15, %v8923_v35  ;;  %v9418_v18 = vld [vmem:[#allocation22_spill] sm:$0xff]  ;;  %v9419_v57 = vld [vmem:[#allocation23_spill] sm:$0xff] }
 0x6db   : > { %v5181_v12 = vmax.f32 %v9011_v13, %v8923_v35  ;;  %v5182_v28 = vmax.f32 %v9014_v62, %v8923_v35  ;;  %v5183_v46 = vmax.f32 %v9017_v5, %v8923_v35  ;;  %v5184_v22 = vmax.f32 %v9020_v45, %v8923_v35  ;;  %v9420_v13 = vld [vmem:[#allocation24_spill] sm:$0xff]  ;;  %v9421_v62 = vld [vmem:[#allocation25_spill] sm:$0xff]  ;;  %v9422_v45 = vld [vmem:[#allocation26_spill] sm:$0xff] }
 0x6dc   : > { %v5185_v43 = vmax.f32 %v9023_v48, %v8923_v35  ;;  %v5186_v63 = vmax.f32 %v9026_v36, %v8923_v35  ;;  %v5187_v41 = vmax.f32 %v9029_v54, %v8923_v35  ;;  %v5188_v14 = vmax.f32 %v9032_v44, %v8923_v35  ;;  %v9423_v36 = vld [vmem:[#allocation27_spill] sm:$0xff]  ;;  %v9424_v44 = vld [vmem:[#allocation28_spill] sm:$0xff] }
 0x6dd   : > { %v5189_v4 = vmax.f32 %v9035_v7, %v8923_v35  ;;  %v5190_v23 = vmax.f32 %v9038_v38, %v8923_v35  ;;  %v5191_v24 = vmax.f32 %v9041_v9, %v8923_v35  ;;  %v5192_v6 = vmax.f32 %v9044_v40, %v8923_v35  ;;  %v9425_v38 = vld [vmem:[#allocation29_spill] sm:$0xff]  ;;  %v9426_v40 = vld [vmem:[#allocation30_spill] sm:$0xff] }
 0x6de   : > { %v5193_v11 = vmax.f32 %v9047_v27, %v8923_v35  ;;  %v5195_v39 = vmax.f32 %v9050_v52, %v8923_v35  ;;  %v5196_v32 = vadd.f32 %v9411_v49, %v5164_v25  ;;  %v5197_v0 = vadd.f32 %v9412_v50, %v5165_v37  ;;  %v9427_v52 = vld [vmem:[#allocation31_spill] sm:$0xff]  ;;  %v9428_v37 = vld [vmem:[#allocation32_spill] sm:$0xff] }
 0x6df   : > { %v5198_v47 = vadd.f32 %v9413_v19, %v5166_v59  ;;  %v5199_v60 = vadd.f32 %v9414_v31, %v5167_v29  ;;  %v5200_v17 = vadd.f32 %v9415_v33, %v5168_v34  ;;  %v5201_v26 = vadd.f32 %v9416_v20, %v5169_v3  ;;  %v9429_v29 = vld [vmem:[#allocation33_spill] sm:$0xff]  ;;  %v9430_v3 = vld [vmem:[#allocation34_spill] sm:$0xff]  ;;  %v9440_v19 = vld [vmem:[#allocation44_spill] sm:$0xff] }
 0x6e0   : > { %v5202_v56 = vadd.f32 %v9417_v30, %v5170_v53  ;;  %v5203_v1 = vadd.f32 %v9418_v18, %v5171_v42  ;;  %v5204_v15 = vadd.f32 %v9419_v57, %v5172_v16  ;;  %v5205_v35 = vadd.f32 %v9420_v13, %v5173_v21  ;;  %v9431_v42 = vld [vmem:[#allocation35_spill] sm:$0xff]  ;;  %v9432_v21 = vld [vmem:[#allocation36_spill] sm:$0xff] }
 0x6e1   : > { %v5206_v5 = vadd.f32 %v9421_v62, %v5174_v55  ;;  %v5207_v48 = vadd.f32 %v9422_v45, %v5175_v8  ;;  %v5208_v54 = vadd.f32 %v9423_v36, %v5176_v10  ;;  %v5209_v7 = vadd.f32 %v9424_v44, %v5177_v51  ;;  %v9433_v8 = vld [vmem:[#allocation37_spill] sm:$0xff]  ;;  %v9434_v51 = vld [vmem:[#allocation38_spill] sm:$0xff] }
 0x6e2   : > { %v5210_v9 = vadd.f32 %v9425_v38, %v5178_v61  ;;  %v5211_v27 = vadd.f32 %v9426_v40, %v5179_v58  ;;  %v5212_v25 = vadd.f32 %v9427_v52, %v5180_v2  ;;  %v5213_v59 = vadd.f32 %v9428_v37, %v5181_v12  ;;  %v9435_v58 = vld [vmem:[#allocation39_spill] sm:$0xff]  ;;  %v9436_v12 = vld [vmem:[#allocation40_spill] sm:$0xff] }
 0x6e3   : > { %v5214_v34 = vadd.f32 %v9429_v29, %v5182_v28  ;;  %v9134_v53 = vadd.f32 %v9430_v3, %v5183_v46  ;;  %v9137_v16 = vadd.f32 %v9431_v42, %v5184_v22  ;;  %v9140_v55 = vadd.f32 %v9432_v21, %v5185_v43  ;;  %v9437_v46 = vld [vmem:[#allocation41_spill] sm:$0xff]  ;;  %v9438_v22 = vld [vmem:[#allocation42_spill] sm:$0xff]  ;;  %v9439_v43 = vld [vmem:[#allocation43_spill] sm:$0xff] }
 0x6e4   : > { %v9143_v10 = vadd.f32 %v9433_v8, %v5186_v63  ;;  %v9146_v61 = vadd.f32 %v9434_v51, %v5187_v41  ;;  %v9149_v2 = vadd.f32 %v9435_v58, %v5188_v14  ;;  %v9152_v28 = vadd.f32 %v9436_v12, %v5189_v4  ;;  %v9441_v14 = vld [vmem:[#allocation46_spill] sm:$0xff] }
 0x6e5   : > { %v9155_v49 = vadd.f32 %v9437_v46, %v5190_v23  ;;  %v9158_v50 = vadd.f32 %v9438_v22, %v5191_v24  ;;  %v9161_v63 = vadd.f32 %v9439_v43, %v5192_v6  ;;  %v9164_v41 = vadd.f32 %v9440_v19, %v5193_v11 }
 0x6e6   : > { %v9167_v31 = vadd.f32 %v9441_v14, %v5195_v39  ;;  %v5228_v4 = vmax.f32 %v5196_v32, 0.0  ;;  %v5229_v33 = vmax.f32 %v5197_v0, 0.0  ;;  %v5230_v20 = vmax.f32 %v5198_v47, 0.0 }
 0x6e7   : > { %v5231_v23 = vmax.f32 %v5199_v60, 0.0  ;;  %v5232_v30 = vmax.f32 %v5200_v17, 0.0  ;;  %v5233_v24 = vmax.f32 %v5201_v26, 0.0  ;;  %v5234_v18 = vmax.f32 %v5202_v56, 0.0 }
 0x6e8   : > { %v5235_v6 = vmax.f32 %v5203_v1, 0.0  ;;  %v5236_v57 = vmax.f32 %v5204_v15, 0.0  ;;  %v5237_v11 = vmax.f32 %v5205_v35, 0.0  ;;  %v5238_v13 = vmax.f32 %v5206_v5, 0.0  ;;  %5260 = vst [vmem:[%s8968_s17] sm:$0xff] %v5228_v4  ;;  %5261 = vst [vmem:[%s8968_s17 + $0x8] sm:$0xff] %v5229_v33 }
 0x6e9   : > { %5262 = vst [vmem:[%s8968_s17 + $0x10] sm:$0xff] %v5230_v20  ;;  %v5239_v39 = vmax.f32 %v5207_v48, 0.0  ;;  %v5240_v32 = vmax.f32 %v5208_v54, 0.0  ;;  %v5241_v0 = vmax.f32 %v5209_v7, 0.0  ;;  %v5242_v47 = vmax.f32 %v5210_v9, 0.0  ;;  %5263 = vst [vmem:[%s8968_s17 + $0x18] sm:$0xff] %v5231_v23 }
 0x6ea   : > { %5264 = vst [vmem:[%s8968_s17 + $0x20] sm:$0xff] %v5232_v30  ;;  %5265 = vst [vmem:[%s8968_s17 + $0x28] sm:$0xff] %v5233_v24  ;;  %v5243_v60 = vmax.f32 %v5211_v27, 0.0  ;;  %v5244_v17 = vmax.f32 %v5212_v25, 0.0  ;;  %v5245_v26 = vmax.f32 %v5213_v59, 0.0  ;;  %v5246_v56 = vmax.f32 %v5214_v34, 0.0 }
 0x6eb   : > { %5266 = vst [vmem:[%s8968_s17 + $0x30] sm:$0xff] %v5234_v18  ;;  %5267 = vst [vmem:[%s8968_s17 + $0x38] sm:$0xff] %v5235_v6  ;;  %v5247_v1 = vmax.f32 %v9134_v53, 0.0  ;;  %v5248_v15 = vmax.f32 %v9137_v16, 0.0  ;;  %v5249_v35 = vmax.f32 %v9140_v55, 0.0  ;;  %v5250_v62 = vmax.f32 %v9143_v10, 0.0 }
 0x6ec   : > { %5268 = vst [vmem:[%s8968_s17 + $0x40] sm:$0xff] %v5236_v57  ;;  %5269 = vst [vmem:[%s8968_s17 + $0x48] sm:$0xff] %v5237_v11  ;;  %v5251_v5 = vmax.f32 %v9146_v61, 0.0  ;;  %v5252_v45 = vmax.f32 %v9149_v2, 0.0  ;;  %v5253_v48 = vmax.f32 %v9152_v28, 0.0  ;;  %v5254_v36 = vmax.f32 %v9155_v49, 0.0 }
 0x6ed   : > { %5270 = vst [vmem:[%s8968_s17 + $0x50] sm:$0xff] %v5238_v13  ;;  %5271 = vst [vmem:[%s8968_s17 + $0x58] sm:$0xff] %v5239_v39  ;;  %v5255_v54 = vmax.f32 %v9158_v50, 0.0  ;;  %v5256_v44 = vmax.f32 %v9161_v63, 0.0  ;;  %v5257_v7 = vmax.f32 %v9164_v41, 0.0  ;;  %v5259_v38 = vmax.f32 %v9167_v31, 0.0 }
 0x6ee   : > { %5272 = vst [vmem:[%s8968_s17 + $0x60] sm:$0xff] %v5240_v32  ;;  %5273 = vst [vmem:[%s8968_s17 + $0x68] sm:$0xff] %v5241_v0 }
 0x6ef   : > { %5274 = vst [vmem:[%s8968_s17 + $0x70] sm:$0xff] %v5242_v47  ;;  %5275 = vst [vmem:[%s8968_s17 + $0x78] sm:$0xff] %v5243_v60 }
 0x6f0   : > { %5276 = vst [vmem:[%s8968_s17 + $0x80] sm:$0xff] %v5244_v17  ;;  %5277 = vst [vmem:[%s8968_s17 + $0x88] sm:$0xff] %v5245_v26 }
 0x6f1   : > { %5278 = vst [vmem:[%s8968_s17 + $0x90] sm:$0xff] %v5246_v56  ;;  %5279 = vst [vmem:[%s8968_s17 + $0x98] sm:$0xff] %v5247_v1 }
 0x6f2   : > { %5280 = vst [vmem:[%s8968_s17 + $0xa0] sm:$0xff] %v5248_v15  ;;  %5281 = vst [vmem:[%s8968_s17 + $0xa8] sm:$0xff] %v5249_v35 }
 0x6f3   : > { %5282 = vst [vmem:[%s8968_s17 + $0xb0] sm:$0xff] %v5250_v62  ;;  %5283 = vst [vmem:[%s8968_s17 + $0xb8] sm:$0xff] %v5251_v5 }
 0x6f4   : > { %5284 = vst [vmem:[%s8968_s17 + $0xc0] sm:$0xff] %v5252_v45  ;;  %5285 = vst [vmem:[%s8968_s17 + $0xc8] sm:$0xff] %v5253_v48 }
 0x6f5   : > { %5286 = vst [vmem:[%s8968_s17 + $0xd0] sm:$0xff] %v5254_v36  ;;  %5287 = vst [vmem:[%s8968_s17 + $0xd8] sm:$0xff] %v5255_v54 }
 0x6f6   : > { %5288 = vst [vmem:[%s8968_s17 + $0xe0] sm:$0xff] %v5256_v44  ;;  %5289 = vst [vmem:[%s8968_s17 + $0xe8] sm:$0xff] %v5257_v7 }
 0x6f7   : > { %5291 = vst [vmem:[%s8968_s17 + $0xf8] sm:$0xff] %v5259_v38 }
 0x6f8   : > { %6736 = shalt.err (!%p6733_p1)
}
 0x6f9   : > { %s6737_s24 = scalar_lea.hbm %s9201_s25, 4096  ;;  %s6741_s28 = scalar_lea.hbm %s9272_s9, 8192 }
 0x6fa   : > { %p6738_p13 = scmp.ne.s32.totalorder %s9201_s25, %s6737_s24  ;;  %p6742_p4 = scmp.lt.u32.totalorder %s9201_s25, %s9272_s9 }
 0x6fb   : > { %p6743_p5 = scmp.lt.u32.totalorder %s6741_s28, %s6737_s24  ;;  %p6745_p11 = scmp.lt.u32.totalorder %s6737_s24, %s9201_s25 }
 0x6fc   : > { %p6739_p6 = pnand %p6738_p13, %p9442_p0 }
 0x6fd   : > { %p6744_p8 = por %p6743_p5, %p6742_p4 }
 0x6fe   : > { %p6740_p10 = pneg %p6739_p6 }
 0x6ff   : > { %p6746_p2 = por %p6745_p11, %p6744_p8 }
 0x701   : > { %p6747_p3 = pnand %p6746_p2, %p6740_p10 }
 0x703   : > { %6750 = shalt.err (!%p6747_p3)
}
 0x704   : > { %s6803_s19 = smov 128   ;;  %s6804_s21 = smov 8  }
 0x705   : > { %6536 = dma.vmem_to_hbm [thread:$0]  (%p9442_p0), %s9203_s18, 4096, %s9201_s25, %s5293_s22, %s6803_s19, %s6803_s19, %s6804_s21  }
 0x706 PF: > { %s9443_s14 = sld [smem:[#allocation14_spill]]  ;;  %s5321_s29 = sand.u32 1, %s6781_s30  }
 0x707   : > { %p9445_p9 = scmp.ge.s32.totalorder %s6793_s12, 2  ;;  %s5322_s24 = scalar_lea.sflag [#allocation6], %s5321_s29 }
 0x70c   : > { %p9444_p7 = scmp.ne.s32.totalorder %s9443_s14, 0 }
 0x70e   : > { %p6550_p12 = pnand %p9445_p9, %p9444_p7 }
 0x710   : > { %6776 = dma.done.wait (!%p6550_p12), %s5322_s24, 4096  }
 0x711   : > { %6778 = vsyncadd (!%p6550_p12), %s5322_s24, 4294963200  ;;  %p23_p1 = scmp.ge.s32.totalorder %s6971_s20, 4   ;;  %s9446_s30 = smov %s6785_s10 }
 0x712   : > { %s9447_s10 = smov %s6789_s11  ;;  %s9448_s11 = smov %s6987_s27 }
 0x713   : > { %s9449_s12 = smov %s6971_s20  ;;  %25 = sbr.rel (!%p23_p1) target bundleno = 6 (0x6), region = 112 }
 0x71a   :  { %5327 = vsyncpa [#allocation5], 1 }
 0x71b   :  { %5329 = vsyncpa [#allocation5 + $0x1], 1 }
 0x71c   :  { %5330 = vsyncpa [#allocation8], 1 }
 0x71d   :  { %5331 = vsyncpa [#allocation6], 1 }
 0x71e   :  { %5333 = vsyncpa [#allocation6 + $0x1], 1 }

</bundles_post_ra>
